<compile_context>
chip_gen: v6e
topology: v6e:2x2x1
jax: 0.10.0
libtpu: 0.0.40
codegen_flags: <defaults>
</compile_context>

<pallas_src>
import functools

import jax
import jax.numpy as jnp
from jax import lax
from jax.experimental import pallas as pl
from jax.experimental.pallas import tpu as pltpu


# ----------------------------------------------------------------------------
# Fused Pallas kernel: num_layers LSTM layers + final Linear, single call.
# ----------------------------------------------------------------------------
def _fused_rqn_kernel(*refs, num_layers, hidden_dim, seq_len, batch_pad):
    """Ref layout (positional):
      inputs : x2d (T*Bp, I),
               [per layer: wih_T (in,4H), whh_T (H,4H), bias (1,4H)] * L  (gate order i,f,o,g),
               h0 (L,Bp,H), c0 (L,Bp,H), wfc_pad (H,Apad), bfc_pad (1,Apad)
      outputs: q (Bp,Apad), hn (L,Bp,H), cn (L,Bp,H)   (hn/cn aliased onto h0/c0)
      scratch: gx_sc (T*Bp,4H), act_sc (T*Bp,H)
    """
    L, H, T, Bp = num_layers, hidden_dim, seq_len, batch_pad

    idx = 0
    x_ref = refs[idx]; idx += 1
    layer_refs = []
    for _ in range(L):
        layer_refs.append((refs[idx], refs[idx + 1], refs[idx + 2]))
        idx += 3
    h0_ref, c0_ref, wfc_ref, bfc_ref = refs[idx:idx + 4]; idx += 4
    q_ref, hn_ref, cn_ref = refs[idx:idx + 3]; idx += 3
    gx_sc, act_sc = refs[idx:idx + 2]

    h_last = None
    for l in range(L):
        wih_ref, whh_ref, b_ref = layer_refs[l]

        # ---- hoisted input projection: one big MXU matmul per layer -------------
        x_in = x_ref[...] if l == 0 else act_sc[...]            # (T*Bp, in)
        gx_sc[...] = (jnp.dot(x_in, wih_ref[...],
                              preferred_element_type=jnp.float32)
                      + b_ref[...])                             # (T*Bp, 4H)

        # Loop-invariant recurrent weight: read from VMEM once per layer.
        whh = whh_ref[...]                                      # (H, 4H)

        # ---- serial recurrence: fori_loop(unroll=True) over timesteps -----------
        def step(t, carry):
            h, c = carry
            row0 = pl.multiple_of(t * Bp, Bp)                   # sublane-aligned start
            gates = (jnp.dot(h, whh, preferred_element_type=jnp.float32)
                     + gx_sc[pl.ds(row0, Bp), :])               # (Bp, 4H)
            # Gates were pre-permuted to (i, f, o, g): one sigmoid + one tanh.
            sig = jax.nn.sigmoid(gates[:, :3 * H])
            i_g = sig[:, 0 * H:1 * H]
            f_g = sig[:, 1 * H:2 * H]
            o_g = sig[:, 2 * H:3 * H]
            g_g = jnp.tanh(gates[:, 3 * H:4 * H])
            c = f_g * c + i_g * g_g
            h = o_g * jnp.tanh(c)
            act_sc[pl.ds(row0, Bp), :] = h                      # layer output / next input
            return (h, c)

        h, c = lax.fori_loop(0, T, step, (h0_ref[l], c0_ref[l]), unroll=True)

        hn_ref[l] = h
        cn_ref[l] = c
        h_last = h

    # ---- final Linear on the last timestep's hidden state (lane-dense slab) -----
    q_ref[...] = (jnp.dot(h_last, wfc_ref[...],
                          preferred_element_type=jnp.float32)
                  + bfc_ref[...])


def _fused_forward(x2d, flat_layer_weights, h0, c0, wfc_pad, bfc_pad,
                   *, num_layers, hidden_dim, seq_len, batch_pad, a_pad, state_size):
    TB = x2d.shape[0]
    L, Bp, H = h0.shape
    vmem = pl.BlockSpec(memory_space=pltpu.MemorySpace.VMEM)
    n_layer_in = len(flat_layer_weights)
    n_in = 1 + n_layer_in + 4

    kernel = functools.partial(_fused_rqn_kernel,
                               num_layers=num_layers, hidden_dim=hidden_dim,
                               seq_len=seq_len, batch_pad=batch_pad)

    # --- advisory cost estimate for XLA scheduling around the custom call --------
    flops = 0
    for l in range(L):
        in_dim = state_size if l == 0 else H
        flops += 2 * seq_len * Bp * in_dim * 4 * H      # hoisted input projection
        flops += 2 * seq_len * Bp * H * 4 * H           # recurrent matmuls
    flops += 2 * Bp * H * a_pad                         # final FC
    transcendentals = 5 * seq_len * L * Bp * H          # 3 sigmoid + 2 tanh per element/step
    in_bytes = (x2d.size + sum(w.size for w in flat_layer_weights)
                + h0.size + c0.size + wfc_pad.size + bfc_pad.size) * 4
    out_bytes = (Bp * a_pad + 2 * L * Bp * H) * 4
    cost = pl.CostEstimate(flops=flops, transcendentals=transcendentals,
                           bytes_accessed=in_bytes + out_bytes)

    q, hn, cn = pl.pallas_call(
        kernel,
        out_shape=(
            jax.ShapeDtypeStruct((Bp, a_pad), jnp.float32),
            jax.ShapeDtypeStruct((L, Bp, H), jnp.float32),
            jax.ShapeDtypeStruct((L, Bp, H), jnp.float32),
        ),
        in_specs=[vmem] * n_in,
        out_specs=(vmem, vmem, vmem),
        scratch_shapes=[
            pltpu.VMEM((TB, 4 * H), jnp.float32),   # gates from input projection
            pltpu.VMEM((TB, H), jnp.float32),       # inter-layer activation
        ],
        # h0 -> h_n, c0 -> c_n: reuse the hidden-state buffers across rollout steps.
        input_output_aliases={1 + n_layer_in: 1, 2 + n_layer_in: 2},
        compiler_params=pltpu.CompilerParams(
            vmem_limit_bytes=32 * 1024 * 1024),      # explicit budget (v7x: 64 MiB phys)
        cost_estimate=cost,
    )(x2d, *flat_layer_weights, h0, c0, wfc_pad, bfc_pad)
    return q, hn, cn


# ----------------------------------------------------------------------------
# Module: parameter init + forward
# ----------------------------------------------------------------------------
def _reorder_ifgo_to_ifog(w):
    """Permute fused-gate rows (axis 0) from PyTorch (i,f,g,o) to (i,f,o,g)."""
    H = w.shape[0] // 4
    return jnp.concatenate([w[:2 * H], w[3 * H:4 * H], w[2 * H:3 * H]], axis=0)


class RecurrentQNetworkPallas:
    def __init__(self, state_size, action_size, hidden_dim, num_layers, key):
        self.state_size = state_size
        self.action_size = action_size
        self.hidden_dim = hidden_dim
        self.num_layers = num_layers
        self.a_pad = max(128, ((action_size + 127) // 128) * 128)

        H = hidden_dim
        scale = 1.0 / jnp.sqrt(jnp.float32(H))   # PyTorch default U(-1/sqrt(H), 1/sqrt(H))
        keys = jax.random.split(key, num_layers * 4 + 2)

        # Raw (PyTorch-layout) parameters, kept for the pure-JAX reference.
        self.lstm_params = []
        k_idx = 0
        for layer in range(num_layers):
            in_dim = state_size if layer == 0 else H
            w_ih = jax.random.uniform(keys[k_idx + 0], (4 * H, in_dim),
                                      minval=-scale, maxval=scale, dtype=jnp.float32)
            w_hh = jax.random.uniform(keys[k_idx + 1], (4 * H, H),
                                      minval=-scale, maxval=scale, dtype=jnp.float32)
            b_ih = jax.random.uniform(keys[k_idx + 2], (4 * H,),
                                      minval=-scale, maxval=scale, dtype=jnp.float32)
            b_hh = jax.random.uniform(keys[k_idx + 3], (4 * H,),
                                      minval=-scale, maxval=scale, dtype=jnp.float32)
            self.lstm_params.append((w_ih, w_hh, b_ih, b_hh))
            k_idx += 4

        self.w_fc = jax.random.uniform(keys[k_idx + 0], (action_size, H),
                                       minval=-scale, maxval=scale, dtype=jnp.float32)
        self.b_fc = jax.random.uniform(keys[k_idx + 1], (action_size,),
                                       minval=-scale, maxval=scale, dtype=jnp.float32)

        # Pre-transposed / pre-fused / gate-permuted kernel parameters (done ONCE).
        flat = []
        for (w_ih, w_hh, b_ih, b_hh) in self.lstm_params:
            flat.append(jnp.transpose(_reorder_ifgo_to_ifog(w_ih)))           # (in, 4H)
            flat.append(jnp.transpose(_reorder_ifgo_to_ifog(w_hh)))           # (H, 4H)
            flat.append(_reorder_ifgo_to_ifog(b_ih + b_hh).reshape(1, 4 * H))  # (1, 4H)
        self.flat_layer_weights = flat

        wfc_t = jnp.transpose(self.w_fc)                          # (H, A)
        self.wfc_pad = jnp.pad(wfc_t, ((0, 0), (0, self.a_pad - action_size)))
        self.bfc_pad = jnp.pad(self.b_fc, (0, self.a_pad - action_size)).reshape(1, self.a_pad)

    def __call__(self, state, hidden=None):
        """state: (B, T, state_size), batch-first like PyTorch batch_first=True.
        Returns (q_values (B, A), (h_n (L,B,H), c_n (L,B,H)))."""
        B, T, _ = state.shape
        H, L = self.hidden_dim, self.num_layers
        Bp = ((B + 7) // 8) * 8                                   # pad batch to 8 sublanes

        if hidden is None:
            h0 = jnp.zeros((L, Bp, H), jnp.float32)
            c0 = jnp.zeros((L, Bp, H), jnp.float32)
        else:
            h0_in, c0_in = hidden
            h0 = jnp.pad(h0_in.astype(jnp.float32), ((0, 0), (0, Bp - B), (0, 0)))
            c0 = jnp.pad(c0_in.astype(jnp.float32), ((0, 0), (0, Bp - B), (0, 0)))

        # batch-first -> time-major, pad batch, flatten to (T*Bp, I)
        x_tm = jnp.transpose(state.astype(jnp.float32), (1, 0, 2))   # (T, B, I)
        x_tm = jnp.pad(x_tm, ((0, 0), (0, Bp - B), (0, 0)))          # (T, Bp, I)
        x2d = x_tm.reshape(T * Bp, self.state_size)

        q_pad, hn_pad, cn_pad = _fused_forward(
            x2d, self.flat_layer_weights, h0, c0, self.wfc_pad, self.bfc_pad,
            num_layers=L, hidden_dim=H, seq_len=T, batch_pad=Bp, a_pad=self.a_pad,
            state_size=self.state_size)

        q_values = q_pad[:B, :self.action_size]
        hidden_out = (hn_pad[:, :B, :], cn_pad[:, :B, :])
        return q_values, hidden_out

    # Pure-JAX reference for correctness checking (PyTorch semantics, gate order i,f,g,o).
    def reference(self, state, hidden=None):
        B, T, _ = state.shape
        H = self.hidden_dim
        if hidden is None:
            h0_all = jnp.zeros((self.num_layers, B, H), jnp.float32)
            c0_all = jnp.zeros((self.num_layers, B, H), jnp.float32)
        else:
            h0_all, c0_all = hidden
        x = state.astype(jnp.float32)
        h_finals, c_finals = [], []
        for layer in range(self.num_layers):
            w_ih, w_hh, b_ih, b_hh = self.lstm_params[layer]
            h, c = h0_all[layer], c0_all[layer]
            ys = []
            for t in range(T):
                g = x[:, t, :] @ w_ih.T + h @ w_hh.T + b_ih + b_hh
                i_g = jax.nn.sigmoid(g[:, :H])
                f_g = jax.nn.sigmoid(g[:, H:2 * H])
                g_g = jnp.tanh(g[:, 2 * H:3 * H])
                o_g = jax.nn.sigmoid(g[:, 3 * H:])
                c = f_g * c + i_g * g_g
                h = o_g * jnp.tanh(c)
                ys.append(h)
            x = jnp.stack(ys, axis=1)
            h_finals.append(h)
            c_finals.append(c)
        q = x[:, -1, :] @ self.w_fc.T + self.b_fc
        return q, (jnp.stack(h_finals, 0), jnp.stack(c_finals, 0))


# ----------------------------------------------------------------------------
# Main
# ----------------------------------------------------------------------------
if __name__ == "__main__":
    # Small shapes consistent with the module's forward (hidden_dim/num_layers scaled down).
    B, T = 2, 8
    state_size, action_size = 16, 8
    hidden_dim, num_layers = 128, 2

    key = jax.random.PRNGKey(0)
    k_params, k_x, k_h, k_c = jax.random.split(key, 4)

    net = RecurrentQNetworkPallas(state_size, action_size, hidden_dim, num_layers, k_params)
    state = jax.random.normal(k_x, (B, T, state_size), dtype=jnp.float32)

    # --- forward with hidden=None --------------------------------------------
    q_values, (h_n, c_n) = net(state)
    jax.block_until_ready(q_values)
    jax.block_until_ready(h_n)
    jax.block_until_ready(c_n)

    q_ref, (h_ref, c_ref) = net.reference(state)
    assert q_values.shape == (B, action_size)
    assert h_n.shape == (num_layers, B, hidden_dim)
    assert c_n.shape == (num_layers, B, hidden_dim)
    assert jnp.allclose(q_values, q_ref, atol=1e-3, rtol=1e-3)
    assert jnp.allclose(h_n, h_ref, atol=1e-3, rtol=1e-3)
    assert jnp.allclose(c_n, c_ref, atol=1e-3, rtol=1e-3)

    # --- forward with a provided hidden state ---------------------------------
    h0 = 0.1 * jax.random.normal(k_h, (num_layers, B, hidden_dim), dtype=jnp.float32)
    c0 = 0.1 * jax.random.normal(k_c, (num_layers, B, hidden_dim), dtype=jnp.float32)
    q2, (h2, c2) = net(state, (h0, c0))
    jax.block_until_ready(q2)
    q2_ref, (h2_ref, c2_ref) = net.reference(state, (h0, c0))
    assert jnp.allclose(q2, q2_ref, atol=1e-3, rtol=1e-3)
    assert jnp.allclose(h2, h2_ref, atol=1e-3, rtol=1e-3)
    assert jnp.allclose(c2, c2_ref, atol=1e-3, rtol=1e-3)

    print("KERNEL_OK")
</pallas_src>

<mosaic_0001>
module attributes {stable_mosaic.version = 11 : i64} {
  func.func @_fused_rqn_kernel(%arg0: memref<64x16xf32, #tpu.memory_space<vmem>>, %arg1: memref<16x512xf32, #tpu.memory_space<vmem>>, %arg2: memref<128x512xf32, #tpu.memory_space<vmem>>, %arg3: memref<1x512xf32, #tpu.memory_space<vmem>>, %arg4: memref<128x512xf32, #tpu.memory_space<vmem>>, %arg5: memref<128x512xf32, #tpu.memory_space<vmem>>, %arg6: memref<1x512xf32, #tpu.memory_space<vmem>>, %arg7: memref<2x8x128xf32, #tpu.memory_space<vmem>>, %arg8: memref<2x8x128xf32, #tpu.memory_space<vmem>>, %arg9: memref<128x128xf32, #tpu.memory_space<vmem>>, %arg10: memref<1x128xf32, #tpu.memory_space<vmem>>, %arg11: memref<8x128xf32, #tpu.memory_space<vmem>>, %arg12: memref<2x8x128xf32, #tpu.memory_space<vmem>>, %arg13: memref<2x8x128xf32, #tpu.memory_space<vmem>>, %arg14: memref<64x512xf32, #tpu.memory_space<vmem>>, %arg15: memref<64x128xf32, #tpu.memory_space<vmem>>) attributes {dimension_semantics = [], scalar_prefetch = 0 : i64, scratch_operands = 2 : i64, tpu.core_type = #tpu.core_type<tc>} {
    %c0 = arith.constant 0 : index
    %c0_0 = arith.constant 0 : index
    %0 = vector.load %arg0[%c0, %c0_0] : memref<64x16xf32, #tpu.memory_space<vmem>>, vector<64x16xf32>
    %c0_1 = arith.constant 0 : index
    %c0_2 = arith.constant 0 : index
    %1 = vector.load %arg1[%c0_1, %c0_2] : memref<16x512xf32, #tpu.memory_space<vmem>>, vector<16x512xf32>
    %cst = arith.constant dense<0.000000e+00> : vector<64x512xf32>
    %2 = tpu.matmul %0, %1, %cst {dimension_numbers = #tpu.dot_dimension_numbers<[1], [0], [0], [1], [0, 0, 1, 1], [], []>} : vector<64x16xf32>, vector<16x512xf32>, vector<64x512xf32> -> vector<64x512xf32>
    %c0_3 = arith.constant 0 : index
    %c0_4 = arith.constant 0 : index
    %3 = vector.load %arg3[%c0_3, %c0_4] : memref<1x512xf32, #tpu.memory_space<vmem>>, vector<1x512xf32>
    %4 = vector.broadcast %3 : vector<1x512xf32> to vector<64x512xf32>
    %5 = arith.addf %2, %4 : vector<64x512xf32>
    %c0_5 = arith.constant 0 : index
    %c0_6 = arith.constant 0 : index
    %6 = vector.load %arg14[%c0_5, %c0_6] : memref<64x512xf32, #tpu.memory_space<vmem>>, vector<64x512xf32>
    tpu.vector_store %arg14[%c0_5, %c0_6], %5 {strides = array<i32>} : memref<64x512xf32, #tpu.memory_space<vmem>>, vector<64x512xf32>,
    %c0_7 = arith.constant 0 : index
    %c0_8 = arith.constant 0 : index
    %7 = vector.load %arg2[%c0_7, %c0_8] : memref<128x512xf32, #tpu.memory_space<vmem>>, vector<128x512xf32>
    %c0_9 = arith.constant 0 : index
    %c0_10 = arith.constant 0 : index
    %c0_11 = arith.constant 0 : index
    %8 = vector.load %arg7[%c0_9, %c0_10, %c0_11] : memref<2x8x128xf32, #tpu.memory_space<vmem>>, vector<1x8x128xf32>
    %9 = vector.shape_cast %8 : vector<1x8x128xf32> to vector<8x128xf32>
    %c0_12 = arith.constant 0 : index
    %c0_13 = arith.constant 0 : index
    %c0_14 = arith.constant 0 : index
    %10 = vector.load %arg8[%c0_12, %c0_13, %c0_14] : memref<2x8x128xf32, #tpu.memory_space<vmem>>, vector<1x8x128xf32>
    %11 = vector.shape_cast %10 : vector<1x8x128xf32> to vector<8x128xf32>
    %c0_i32 = arith.constant 0 : i32
    %c8_i32 = arith.constant 8 : i32
    %12 = arith.muli %c0_i32, %c8_i32 : i32
    %13 = tpu.assume_multiple %12, 8 : i32
    %cst_15 = arith.constant dense<0.000000e+00> : vector<8x512xf32>
    %14 = tpu.matmul %9, %7, %cst_15 {dimension_numbers = #tpu.dot_dimension_numbers<[1], [0], [0], [1], [0, 0, 1, 1], [], []>} : vector<8x128xf32>, vector<128x512xf32>, vector<8x512xf32> -> vector<8x512xf32>
    %15 = arith.index_cast %13 : i32 to index
    %c0_16 = arith.constant 0 : index
    %16 = vector.load %arg14[%15, %c0_16] : memref<64x512xf32, #tpu.memory_space<vmem>>, vector<8x512xf32>
    %17 = arith.addf %14, %16 : vector<8x512xf32>
    %18 = vector.extract_strided_slice %17 {offsets = [0, 0], sizes = [8, 384], strides = [1, 1]} : vector<8x512xf32> to vector<8x384xf32>
    %19 = arith.negf %18 : vector<8x384xf32>
    %20 = math.exp %19 : vector<8x384xf32>
    %cst_17 = arith.constant 1.000000e+00 : f32
    %21 = vector.broadcast %cst_17 : f32 to vector<8x384xf32>
    %22 = arith.addf %21, %20 : vector<8x384xf32>
    %23 = arith.divf %21, %22 : vector<8x384xf32>
    %24 = vector.extract_strided_slice %23 {offsets = [0, 0], sizes = [8, 128], strides = [1, 1]} : vector<8x384xf32> to vector<8x128xf32>
    %25 = vector.extract_strided_slice %23 {offsets = [0, 128], sizes = [8, 128], strides = [1, 1]} : vector<8x384xf32> to vector<8x128xf32>
    %26 = vector.extract_strided_slice %23 {offsets = [0, 256], sizes = [8, 128], strides = [1, 1]} : vector<8x384xf32> to vector<8x128xf32>
    %27 = vector.extract_strided_slice %17 {offsets = [0, 384], sizes = [8, 128], strides = [1, 1]} : vector<8x512xf32> to vector<8x128xf32>
    %28 = math.tanh %27 : vector<8x128xf32>
    %29 = arith.mulf %25, %11 : vector<8x128xf32>
    %30 = arith.mulf %24, %28 : vector<8x128xf32>
    %31 = arith.addf %29, %30 : vector<8x128xf32>
    %32 = math.tanh %31 : vector<8x128xf32>
    %33 = arith.mulf %26, %32 : vector<8x128xf32>
    %34 = arith.index_cast %13 : i32 to index
    %c0_18 = arith.constant 0 : index
    %35 = vector.load %arg15[%34, %c0_18] : memref<64x128xf32, #tpu.memory_space<vmem>>, vector<8x128xf32>
    tpu.vector_store %arg15[%34, %c0_18], %33 {strides = array<i32>} : memref<64x128xf32, #tpu.memory_space<vmem>>, vector<8x128xf32>,
    %c1_i32 = arith.constant 1 : i32
    %c8_i32_19 = arith.constant 8 : i32
    %36 = arith.muli %c1_i32, %c8_i32_19 : i32
    %37 = tpu.assume_multiple %36, 8 : i32
    %cst_20 = arith.constant dense<0.000000e+00> : vector<8x512xf32>
    %38 = tpu.matmul %33, %7, %cst_20 {dimension_numbers = #tpu.dot_dimension_numbers<[1], [0], [0], [1], [0, 0, 1, 1], [], []>} : vector<8x128xf32>, vector<128x512xf32>, vector<8x512xf32> -> vector<8x512xf32>
    %39 = arith.index_cast %37 : i32 to index
    %c0_21 = arith.constant 0 : index
    %40 = vector.load %arg14[%39, %c0_21] : memref<64x512xf32, #tpu.memory_space<vmem>>, vector<8x512xf32>
    %41 = arith.addf %38, %40 : vector<8x512xf32>
    %42 = vector.extract_strided_slice %41 {offsets = [0, 0], sizes = [8, 384], strides = [1, 1]} : vector<8x512xf32> to vector<8x384xf32>
    %43 = arith.negf %42 : vector<8x384xf32>
    %44 = math.exp %43 : vector<8x384xf32>
    %cst_22 = arith.constant 1.000000e+00 : f32
    %45 = vector.broadcast %cst_22 : f32 to vector<8x384xf32>
    %46 = arith.addf %45, %44 : vector<8x384xf32>
    %47 = arith.divf %45, %46 : vector<8x384xf32>
    %48 = vector.extract_strided_slice %47 {offsets = [0, 0], sizes = [8, 128], strides = [1, 1]} : vector<8x384xf32> to vector<8x128xf32>
    %49 = vector.extract_strided_slice %47 {offsets = [0, 128], sizes = [8, 128], strides = [1, 1]} : vector<8x384xf32> to vector<8x128xf32>
    %50 = vector.extract_strided_slice %47 {offsets = [0, 256], sizes = [8, 128], strides = [1, 1]} : vector<8x384xf32> to vector<8x128xf32>
    %51 = vector.extract_strided_slice %41 {offsets = [0, 384], sizes = [8, 128], strides = [1, 1]} : vector<8x512xf32> to vector<8x128xf32>
    %52 = math.tanh %51 : vector<8x128xf32>
    %53 = arith.mulf %49, %31 : vector<8x128xf32>
    %54 = arith.mulf %48, %52 : vector<8x128xf32>
    %55 = arith.addf %53, %54 : vector<8x128xf32>
    %56 = math.tanh %55 : vector<8x128xf32>
    %57 = arith.mulf %50, %56 : vector<8x128xf32>
    %58 = arith.index_cast %37 : i32 to index
    %c0_23 = arith.constant 0 : index
    %59 = vector.load %arg15[%58, %c0_23] : memref<64x128xf32, #tpu.memory_space<vmem>>, vector<8x128xf32>
    tpu.vector_store %arg15[%58, %c0_23], %57 {strides = array<i32>} : memref<64x128xf32, #tpu.memory_space<vmem>>, vector<8x128xf32>,
    %c2_i32 = arith.constant 2 : i32
    %c8_i32_24 = arith.constant 8 : i32
    %60 = arith.muli %c2_i32, %c8_i32_24 : i32
    %61 = tpu.assume_multiple %60, 8 : i32
    %cst_25 = arith.constant dense<0.000000e+00> : vector<8x512xf32>
    %62 = tpu.matmul %57, %7, %cst_25 {dimension_numbers = #tpu.dot_dimension_numbers<[1], [0], [0], [1], [0, 0, 1, 1], [], []>} : vector<8x128xf32>, vector<128x512xf32>, vector<8x512xf32> -> vector<8x512xf32>
    %63 = arith.index_cast %61 : i32 to index
    %c0_26 = arith.constant 0 : index
    %64 = vector.load %arg14[%63, %c0_26] : memref<64x512xf32, #tpu.memory_space<vmem>>, vector<8x512xf32>
    %65 = arith.addf %62, %64 : vector<8x512xf32>
    %66 = vector.extract_strided_slice %65 {offsets = [0, 0], sizes = [8, 384], strides = [1, 1]} : vector<8x512xf32> to vector<8x384xf32>
    %67 = arith.negf %66 : vector<8x384xf32>
    %68 = math.exp %67 : vector<8x384xf32>
    %cst_27 = arith.constant 1.000000e+00 : f32
    %69 = vector.broadcast %cst_27 : f32 to vector<8x384xf32>
    %70 = arith.addf %69, %68 : vector<8x384xf32>
    %71 = arith.divf %69, %70 : vector<8x384xf32>
    %72 = vector.extract_strided_slice %71 {offsets = [0, 0], sizes = [8, 128], strides = [1, 1]} : vector<8x384xf32> to vector<8x128xf32>
    %73 = vector.extract_strided_slice %71 {offsets = [0, 128], sizes = [8, 128], strides = [1, 1]} : vector<8x384xf32> to vector<8x128xf32>
    %74 = vector.extract_strided_slice %71 {offsets = [0, 256], sizes = [8, 128], strides = [1, 1]} : vector<8x384xf32> to vector<8x128xf32>
    %75 = vector.extract_strided_slice %65 {offsets = [0, 384], sizes = [8, 128], strides = [1, 1]} : vector<8x512xf32> to vector<8x128xf32>
    %76 = math.tanh %75 : vector<8x128xf32>
    %77 = arith.mulf %73, %55 : vector<8x128xf32>
    %78 = arith.mulf %72, %76 : vector<8x128xf32>
    %79 = arith.addf %77, %78 : vector<8x128xf32>
    %80 = math.tanh %79 : vector<8x128xf32>
    %81 = arith.mulf %74, %80 : vector<8x128xf32>
    %82 = arith.index_cast %61 : i32 to index
    %c0_28 = arith.constant 0 : index
    %83 = vector.load %arg15[%82, %c0_28] : memref<64x128xf32, #tpu.memory_space<vmem>>, vector<8x128xf32>
    tpu.vector_store %arg15[%82, %c0_28], %81 {strides = array<i32>} : memref<64x128xf32, #tpu.memory_space<vmem>>, vector<8x128xf32>,
    %c3_i32 = arith.constant 3 : i32
    %c8_i32_29 = arith.constant 8 : i32
    %84 = arith.muli %c3_i32, %c8_i32_29 : i32
    %85 = tpu.assume_multiple %84, 8 : i32
    %cst_30 = arith.constant dense<0.000000e+00> : vector<8x512xf32>
    %86 = tpu.matmul %81, %7, %cst_30 {dimension_numbers = #tpu.dot_dimension_numbers<[1], [0], [0], [1], [0, 0, 1, 1], [], []>} : vector<8x128xf32>, vector<128x512xf32>, vector<8x512xf32> -> vector<8x512xf32>
    %87 = arith.index_cast %85 : i32 to index
    %c0_31 = arith.constant 0 : index
    %88 = vector.load %arg14[%87, %c0_31] : memref<64x512xf32, #tpu.memory_space<vmem>>, vector<8x512xf32>
    %89 = arith.addf %86, %88 : vector<8x512xf32>
    %90 = vector.extract_strided_slice %89 {offsets = [0, 0], sizes = [8, 384], strides = [1, 1]} : vector<8x512xf32> to vector<8x384xf32>
    %91 = arith.negf %90 : vector<8x384xf32>
    %92 = math.exp %91 : vector<8x384xf32>
    %cst_32 = arith.constant 1.000000e+00 : f32
    %93 = vector.broadcast %cst_32 : f32 to vector<8x384xf32>
    %94 = arith.addf %93, %92 : vector<8x384xf32>
    %95 = arith.divf %93, %94 : vector<8x384xf32>
    %96 = vector.extract_strided_slice %95 {offsets = [0, 0], sizes = [8, 128], strides = [1, 1]} : vector<8x384xf32> to vector<8x128xf32>
    %97 = vector.extract_strided_slice %95 {offsets = [0, 128], sizes = [8, 128], strides = [1, 1]} : vector<8x384xf32> to vector<8x128xf32>
    %98 = vector.extract_strided_slice %95 {offsets = [0, 256], sizes = [8, 128], strides = [1, 1]} : vector<8x384xf32> to vector<8x128xf32>
    %99 = vector.extract_strided_slice %89 {offsets = [0, 384], sizes = [8, 128], strides = [1, 1]} : vector<8x512xf32> to vector<8x128xf32>
    %100 = math.tanh %99 : vector<8x128xf32>
    %101 = arith.mulf %97, %79 : vector<8x128xf32>
    %102 = arith.mulf %96, %100 : vector<8x128xf32>
    %103 = arith.addf %101, %102 : vector<8x128xf32>
    %104 = math.tanh %103 : vector<8x128xf32>
    %105 = arith.mulf %98, %104 : vector<8x128xf32>
    %106 = arith.index_cast %85 : i32 to index
    %c0_33 = arith.constant 0 : index
    %107 = vector.load %arg15[%106, %c0_33] : memref<64x128xf32, #tpu.memory_space<vmem>>, vector<8x128xf32>
    tpu.vector_store %arg15[%106, %c0_33], %105 {strides = array<i32>} : memref<64x128xf32, #tpu.memory_space<vmem>>, vector<8x128xf32>,
    %c4_i32 = arith.constant 4 : i32
    %c8_i32_34 = arith.constant 8 : i32
    %108 = arith.muli %c4_i32, %c8_i32_34 : i32
    %109 = tpu.assume_multiple %108, 8 : i32
    %cst_35 = arith.constant dense<0.000000e+00> : vector<8x512xf32>
    %110 = tpu.matmul %105, %7, %cst_35 {dimension_numbers = #tpu.dot_dimension_numbers<[1], [0], [0], [1], [0, 0, 1, 1], [], []>} : vector<8x128xf32>, vector<128x512xf32>, vector<8x512xf32> -> vector<8x512xf32>
    %111 = arith.index_cast %109 : i32 to index
    %c0_36 = arith.constant 0 : index
    %112 = vector.load %arg14[%111, %c0_36] : memref<64x512xf32, #tpu.memory_space<vmem>>, vector<8x512xf32>
    %113 = arith.addf %110, %112 : vector<8x512xf32>
    %114 = vector.extract_strided_slice %113 {offsets = [0, 0], sizes = [8, 384], strides = [1, 1]} : vector<8x512xf32> to vector<8x384xf32>
    %115 = arith.negf %114 : vector<8x384xf32>
    %116 = math.exp %115 : vector<8x384xf32>
    %cst_37 = arith.constant 1.000000e+00 : f32
    %117 = vector.broadcast %cst_37 : f32 to vector<8x384xf32>
    %118 = arith.addf %117, %116 : vector<8x384xf32>
    %119 = arith.divf %117, %118 : vector<8x384xf32>
    %120 = vector.extract_strided_slice %119 {offsets = [0, 0], sizes = [8, 128], strides = [1, 1]} : vector<8x384xf32> to vector<8x128xf32>
    %121 = vector.extract_strided_slice %119 {offsets = [0, 128], sizes = [8, 128], strides = [1, 1]} : vector<8x384xf32> to vector<8x128xf32>
    %122 = vector.extract_strided_slice %119 {offsets = [0, 256], sizes = [8, 128], strides = [1, 1]} : vector<8x384xf32> to vector<8x128xf32>
    %123 = vector.extract_strided_slice %113 {offsets = [0, 384], sizes = [8, 128], strides = [1, 1]} : vector<8x512xf32> to vector<8x128xf32>
    %124 = math.tanh %123 : vector<8x128xf32>
    %125 = arith.mulf %121, %103 : vector<8x128xf32>
    %126 = arith.mulf %120, %124 : vector<8x128xf32>
    %127 = arith.addf %125, %126 : vector<8x128xf32>
    %128 = math.tanh %127 : vector<8x128xf32>
    %129 = arith.mulf %122, %128 : vector<8x128xf32>
    %130 = arith.index_cast %109 : i32 to index
    %c0_38 = arith.constant 0 : index
    %131 = vector.load %arg15[%130, %c0_38] : memref<64x128xf32, #tpu.memory_space<vmem>>, vector<8x128xf32>
    tpu.vector_store %arg15[%130, %c0_38], %129 {strides = array<i32>} : memref<64x128xf32, #tpu.memory_space<vmem>>, vector<8x128xf32>,
    %c5_i32 = arith.constant 5 : i32
    %c8_i32_39 = arith.constant 8 : i32
    %132 = arith.muli %c5_i32, %c8_i32_39 : i32
    %133 = tpu.assume_multiple %132, 8 : i32
    %cst_40 = arith.constant dense<0.000000e+00> : vector<8x512xf32>
    %134 = tpu.matmul %129, %7, %cst_40 {dimension_numbers = #tpu.dot_dimension_numbers<[1], [0], [0], [1], [0, 0, 1, 1], [], []>} : vector<8x128xf32>, vector<128x512xf32>, vector<8x512xf32> -> vector<8x512xf32>
    %135 = arith.index_cast %133 : i32 to index
    %c0_41 = arith.constant 0 : index
    %136 = vector.load %arg14[%135, %c0_41] : memref<64x512xf32, #tpu.memory_space<vmem>>, vector<8x512xf32>
    %137 = arith.addf %134, %136 : vector<8x512xf32>
    %138 = vector.extract_strided_slice %137 {offsets = [0, 0], sizes = [8, 384], strides = [1, 1]} : vector<8x512xf32> to vector<8x384xf32>
    %139 = arith.negf %138 : vector<8x384xf32>
    %140 = math.exp %139 : vector<8x384xf32>
    %cst_42 = arith.constant 1.000000e+00 : f32
    %141 = vector.broadcast %cst_42 : f32 to vector<8x384xf32>
    %142 = arith.addf %141, %140 : vector<8x384xf32>
    %143 = arith.divf %141, %142 : vector<8x384xf32>
    %144 = vector.extract_strided_slice %143 {offsets = [0, 0], sizes = [8, 128], strides = [1, 1]} : vector<8x384xf32> to vector<8x128xf32>
    %145 = vector.extract_strided_slice %143 {offsets = [0, 128], sizes = [8, 128], strides = [1, 1]} : vector<8x384xf32> to vector<8x128xf32>
    %146 = vector.extract_strided_slice %143 {offsets = [0, 256], sizes = [8, 128], strides = [1, 1]} : vector<8x384xf32> to vector<8x128xf32>
    %147 = vector.extract_strided_slice %137 {offsets = [0, 384], sizes = [8, 128], strides = [1, 1]} : vector<8x512xf32> to vector<8x128xf32>
    %148 = math.tanh %147 : vector<8x128xf32>
    %149 = arith.mulf %145, %127 : vector<8x128xf32>
    %150 = arith.mulf %144, %148 : vector<8x128xf32>
    %151 = arith.addf %149, %150 : vector<8x128xf32>
    %152 = math.tanh %151 : vector<8x128xf32>
    %153 = arith.mulf %146, %152 : vector<8x128xf32>
    %154 = arith.index_cast %133 : i32 to index
    %c0_43 = arith.constant 0 : index
    %155 = vector.load %arg15[%154, %c0_43] : memref<64x128xf32, #tpu.memory_space<vmem>>, vector<8x128xf32>
    tpu.vector_store %arg15[%154, %c0_43], %153 {strides = array<i32>} : memref<64x128xf32, #tpu.memory_space<vmem>>, vector<8x128xf32>,
    %c6_i32 = arith.constant 6 : i32
    %c8_i32_44 = arith.constant 8 : i32
    %156 = arith.muli %c6_i32, %c8_i32_44 : i32
    %157 = tpu.assume_multiple %156, 8 : i32
    %cst_45 = arith.constant dense<0.000000e+00> : vector<8x512xf32>
    %158 = tpu.matmul %153, %7, %cst_45 {dimension_numbers = #tpu.dot_dimension_numbers<[1], [0], [0], [1], [0, 0, 1, 1], [], []>} : vector<8x128xf32>, vector<128x512xf32>, vector<8x512xf32> -> vector<8x512xf32>
    %159 = arith.index_cast %157 : i32 to index
    %c0_46 = arith.constant 0 : index
    %160 = vector.load %arg14[%159, %c0_46] : memref<64x512xf32, #tpu.memory_space<vmem>>, vector<8x512xf32>
    %161 = arith.addf %158, %160 : vector<8x512xf32>
    %162 = vector.extract_strided_slice %161 {offsets = [0, 0], sizes = [8, 384], strides = [1, 1]} : vector<8x512xf32> to vector<8x384xf32>
    %163 = arith.negf %162 : vector<8x384xf32>
    %164 = math.exp %163 : vector<8x384xf32>
    %cst_47 = arith.constant 1.000000e+00 : f32
    %165 = vector.broadcast %cst_47 : f32 to vector<8x384xf32>
    %166 = arith.addf %165, %164 : vector<8x384xf32>
    %167 = arith.divf %165, %166 : vector<8x384xf32>
    %168 = vector.extract_strided_slice %167 {offsets = [0, 0], sizes = [8, 128], strides = [1, 1]} : vector<8x384xf32> to vector<8x128xf32>
    %169 = vector.extract_strided_slice %167 {offsets = [0, 128], sizes = [8, 128], strides = [1, 1]} : vector<8x384xf32> to vector<8x128xf32>
    %170 = vector.extract_strided_slice %167 {offsets = [0, 256], sizes = [8, 128], strides = [1, 1]} : vector<8x384xf32> to vector<8x128xf32>
    %171 = vector.extract_strided_slice %161 {offsets = [0, 384], sizes = [8, 128], strides = [1, 1]} : vector<8x512xf32> to vector<8x128xf32>
    %172 = math.tanh %171 : vector<8x128xf32>
    %173 = arith.mulf %169, %151 : vector<8x128xf32>
    %174 = arith.mulf %168, %172 : vector<8x128xf32>
    %175 = arith.addf %173, %174 : vector<8x128xf32>
    %176 = math.tanh %175 : vector<8x128xf32>
    %177 = arith.mulf %170, %176 : vector<8x128xf32>
    %178 = arith.index_cast %157 : i32 to index
    %c0_48 = arith.constant 0 : index
    %179 = vector.load %arg15[%178, %c0_48] : memref<64x128xf32, #tpu.memory_space<vmem>>, vector<8x128xf32>
    tpu.vector_store %arg15[%178, %c0_48], %177 {strides = array<i32>} : memref<64x128xf32, #tpu.memory_space<vmem>>, vector<8x128xf32>,
    %c7_i32 = arith.constant 7 : i32
    %c8_i32_49 = arith.constant 8 : i32
    %180 = arith.muli %c7_i32, %c8_i32_49 : i32
    %181 = tpu.assume_multiple %180, 8 : i32
    %cst_50 = arith.constant dense<0.000000e+00> : vector<8x512xf32>
    %182 = tpu.matmul %177, %7, %cst_50 {dimension_numbers = #tpu.dot_dimension_numbers<[1], [0], [0], [1], [0, 0, 1, 1], [], []>} : vector<8x128xf32>, vector<128x512xf32>, vector<8x512xf32> -> vector<8x512xf32>
    %183 = arith.index_cast %181 : i32 to index
    %c0_51 = arith.constant 0 : index
    %184 = vector.load %arg14[%183, %c0_51] : memref<64x512xf32, #tpu.memory_space<vmem>>, vector<8x512xf32>
    %185 = arith.addf %182, %184 : vector<8x512xf32>
    %186 = vector.extract_strided_slice %185 {offsets = [0, 0], sizes = [8, 384], strides = [1, 1]} : vector<8x512xf32> to vector<8x384xf32>
    %187 = arith.negf %186 : vector<8x384xf32>
    %188 = math.exp %187 : vector<8x384xf32>
    %cst_52 = arith.constant 1.000000e+00 : f32
    %189 = vector.broadcast %cst_52 : f32 to vector<8x384xf32>
    %190 = arith.addf %189, %188 : vector<8x384xf32>
    %191 = arith.divf %189, %190 : vector<8x384xf32>
    %192 = vector.extract_strided_slice %191 {offsets = [0, 0], sizes = [8, 128], strides = [1, 1]} : vector<8x384xf32> to vector<8x128xf32>
    %193 = vector.extract_strided_slice %191 {offsets = [0, 128], sizes = [8, 128], strides = [1, 1]} : vector<8x384xf32> to vector<8x128xf32>
    %194 = vector.extract_strided_slice %191 {offsets = [0, 256], sizes = [8, 128], strides = [1, 1]} : vector<8x384xf32> to vector<8x128xf32>
    %195 = vector.extract_strided_slice %185 {offsets = [0, 384], sizes = [8, 128], strides = [1, 1]} : vector<8x512xf32> to vector<8x128xf32>
    %196 = math.tanh %195 : vector<8x128xf32>
    %197 = arith.mulf %193, %175 : vector<8x128xf32>
    %198 = arith.mulf %192, %196 : vector<8x128xf32>
    %199 = arith.addf %197, %198 : vector<8x128xf32>
    %200 = math.tanh %199 : vector<8x128xf32>
    %201 = arith.mulf %194, %200 : vector<8x128xf32>
    %202 = arith.index_cast %181 : i32 to index
    %c0_53 = arith.constant 0 : index
    %203 = vector.load %arg15[%202, %c0_53] : memref<64x128xf32, #tpu.memory_space<vmem>>, vector<8x128xf32>
    tpu.vector_store %arg15[%202, %c0_53], %201 {strides = array<i32>} : memref<64x128xf32, #tpu.memory_space<vmem>>, vector<8x128xf32>,
    %c8_i32_54 = arith.constant 8 : i32
    %c0_55 = arith.constant 0 : index
    %c0_56 = arith.constant 0 : index
    %c0_57 = arith.constant 0 : index
    %204 = vector.load %arg12[%c0_55, %c0_56, %c0_57] : memref<2x8x128xf32, #tpu.memory_space<vmem>>, vector<1x8x128xf32>
    %205 = vector.shape_cast %204 : vector<1x8x128xf32> to vector<8x128xf32>
    %206 = vector.shape_cast %201 : vector<8x128xf32> to vector<1x8x128xf32>
    tpu.vector_store %arg12[%c0_55, %c0_56, %c0_57], %206 {strides = array<i32>} : memref<2x8x128xf32, #tpu.memory_space<vmem>>, vector<1x8x128xf32>,
    %c0_58 = arith.constant 0 : index
    %c0_59 = arith.constant 0 : index
    %c0_60 = arith.constant 0 : index
    %207 = vector.load %arg13[%c0_58, %c0_59, %c0_60] : memref<2x8x128xf32, #tpu.memory_space<vmem>>, vector<1x8x128xf32>
    %208 = vector.shape_cast %207 : vector<1x8x128xf32> to vector<8x128xf32>
    %209 = vector.shape_cast %199 : vector<8x128xf32> to vector<1x8x128xf32>
    tpu.vector_store %arg13[%c0_58, %c0_59, %c0_60], %209 {strides = array<i32>} : memref<2x8x128xf32, #tpu.memory_space<vmem>>, vector<1x8x128xf32>,
    %c0_61 = arith.constant 0 : index
    %c0_62 = arith.constant 0 : index
    %210 = vector.load %arg15[%c0_61, %c0_62] : memref<64x128xf32, #tpu.memory_space<vmem>>, vector<64x128xf32>
    %c0_63 = arith.constant 0 : index
    %c0_64 = arith.constant 0 : index
    %211 = vector.load %arg4[%c0_63, %c0_64] : memref<128x512xf32, #tpu.memory_space<vmem>>, vector<128x512xf32>
    %cst_65 = arith.constant dense<0.000000e+00> : vector<64x512xf32>
    %212 = tpu.matmul %210, %211, %cst_65 {dimension_numbers = #tpu.dot_dimension_numbers<[1], [0], [0], [1], [0, 0, 1, 1], [], []>} : vector<64x128xf32>, vector<128x512xf32>, vector<64x512xf32> -> vector<64x512xf32>
    %c0_66 = arith.constant 0 : index
    %c0_67 = arith.constant 0 : index
    %213 = vector.load %arg6[%c0_66, %c0_67] : memref<1x512xf32, #tpu.memory_space<vmem>>, vector<1x512xf32>
    %214 = vector.broadcast %213 : vector<1x512xf32> to vector<64x512xf32>
    %215 = arith.addf %212, %214 : vector<64x512xf32>
    %c0_68 = arith.constant 0 : index
    %c0_69 = arith.constant 0 : index
    %216 = vector.load %arg14[%c0_68, %c0_69] : memref<64x512xf32, #tpu.memory_space<vmem>>, vector<64x512xf32>
    tpu.vector_store %arg14[%c0_68, %c0_69], %215 {strides = array<i32>} : memref<64x512xf32, #tpu.memory_space<vmem>>, vector<64x512xf32>,
    %c0_70 = arith.constant 0 : index
    %c0_71 = arith.constant 0 : index
    %217 = vector.load %arg5[%c0_70, %c0_71] : memref<128x512xf32, #tpu.memory_space<vmem>>, vector<128x512xf32>
    %c1 = arith.constant 1 : index
    %c0_72 = arith.constant 0 : index
    %c0_73 = arith.constant 0 : index
    %218 = vector.load %arg7[%c1, %c0_72, %c0_73] : memref<2x8x128xf32, #tpu.memory_space<vmem>>, vector<1x8x128xf32>
    %219 = vector.shape_cast %218 : vector<1x8x128xf32> to vector<8x128xf32>
    %c1_74 = arith.constant 1 : index
    %c0_75 = arith.constant 0 : index
    %c0_76 = arith.constant 0 : index
    %220 = vector.load %arg8[%c1_74, %c0_75, %c0_76] : memref<2x8x128xf32, #tpu.memory_space<vmem>>, vector<1x8x128xf32>
    %221 = vector.shape_cast %220 : vector<1x8x128xf32> to vector<8x128xf32>
    %c0_i32_77 = arith.constant 0 : i32
    %c8_i32_78 = arith.constant 8 : i32
    %222 = arith.muli %c0_i32_77, %c8_i32_78 : i32
    %223 = tpu.assume_multiple %222, 8 : i32
    %cst_79 = arith.constant dense<0.000000e+00> : vector<8x512xf32>
    %224 = tpu.matmul %219, %217, %cst_79 {dimension_numbers = #tpu.dot_dimension_numbers<[1], [0], [0], [1], [0, 0, 1, 1], [], []>} : vector<8x128xf32>, vector<128x512xf32>, vector<8x512xf32> -> vector<8x512xf32>
    %225 = arith.index_cast %223 : i32 to index
    %c0_80 = arith.constant 0 : index
    %226 = vector.load %arg14[%225, %c0_80] : memref<64x512xf32, #tpu.memory_space<vmem>>, vector<8x512xf32>
    %227 = arith.addf %224, %226 : vector<8x512xf32>
    %228 = vector.extract_strided_slice %227 {offsets = [0, 0], sizes = [8, 384], strides = [1, 1]} : vector<8x512xf32> to vector<8x384xf32>
    %229 = arith.negf %228 : vector<8x384xf32>
    %230 = math.exp %229 : vector<8x384xf32>
    %cst_81 = arith.constant 1.000000e+00 : f32
    %231 = vector.broadcast %cst_81 : f32 to vector<8x384xf32>
    %232 = arith.addf %231, %230 : vector<8x384xf32>
    %233 = arith.divf %231, %232 : vector<8x384xf32>
    %234 = vector.extract_strided_slice %233 {offsets = [0, 0], sizes = [8, 128], strides = [1, 1]} : vector<8x384xf32> to vector<8x128xf32>
    %235 = vector.extract_strided_slice %233 {offsets = [0, 128], sizes = [8, 128], strides = [1, 1]} : vector<8x384xf32> to vector<8x128xf32>
    %236 = vector.extract_strided_slice %233 {offsets = [0, 256], sizes = [8, 128], strides = [1, 1]} : vector<8x384xf32> to vector<8x128xf32>
    %237 = vector.extract_strided_slice %227 {offsets = [0, 384], sizes = [8, 128], strides = [1, 1]} : vector<8x512xf32> to vector<8x128xf32>
    %238 = math.tanh %237 : vector<8x128xf32>
    %239 = arith.mulf %235, %221 : vector<8x128xf32>
    %240 = arith.mulf %234, %238 : vector<8x128xf32>
    %241 = arith.addf %239, %240 : vector<8x128xf32>
    %242 = math.tanh %241 : vector<8x128xf32>
    %243 = arith.mulf %236, %242 : vector<8x128xf32>
    %244 = arith.index_cast %223 : i32 to index
    %c0_82 = arith.constant 0 : index
    %245 = vector.load %arg15[%244, %c0_82] : memref<64x128xf32, #tpu.memory_space<vmem>>, vector<8x128xf32>
    tpu.vector_store %arg15[%244, %c0_82], %243 {strides = array<i32>} : memref<64x128xf32, #tpu.memory_space<vmem>>, vector<8x128xf32>,
    %c1_i32_83 = arith.constant 1 : i32
    %c8_i32_84 = arith.constant 8 : i32
    %246 = arith.muli %c1_i32_83, %c8_i32_84 : i32
    %247 = tpu.assume_multiple %246, 8 : i32
    %cst_85 = arith.constant dense<0.000000e+00> : vector<8x512xf32>
    %248 = tpu.matmul %243, %217, %cst_85 {dimension_numbers = #tpu.dot_dimension_numbers<[1], [0], [0], [1], [0, 0, 1, 1], [], []>} : vector<8x128xf32>, vector<128x512xf32>, vector<8x512xf32> -> vector<8x512xf32>
    %249 = arith.index_cast %247 : i32 to index
    %c0_86 = arith.constant 0 : index
    %250 = vector.load %arg14[%249, %c0_86] : memref<64x512xf32, #tpu.memory_space<vmem>>, vector<8x512xf32>
    %251 = arith.addf %248, %250 : vector<8x512xf32>
    %252 = vector.extract_strided_slice %251 {offsets = [0, 0], sizes = [8, 384], strides = [1, 1]} : vector<8x512xf32> to vector<8x384xf32>
    %253 = arith.negf %252 : vector<8x384xf32>
    %254 = math.exp %253 : vector<8x384xf32>
    %cst_87 = arith.constant 1.000000e+00 : f32
    %255 = vector.broadcast %cst_87 : f32 to vector<8x384xf32>
    %256 = arith.addf %255, %254 : vector<8x384xf32>
    %257 = arith.divf %255, %256 : vector<8x384xf32>
    %258 = vector.extract_strided_slice %257 {offsets = [0, 0], sizes = [8, 128], strides = [1, 1]} : vector<8x384xf32> to vector<8x128xf32>
    %259 = vector.extract_strided_slice %257 {offsets = [0, 128], sizes = [8, 128], strides = [1, 1]} : vector<8x384xf32> to vector<8x128xf32>
    %260 = vector.extract_strided_slice %257 {offsets = [0, 256], sizes = [8, 128], strides = [1, 1]} : vector<8x384xf32> to vector<8x128xf32>
    %261 = vector.extract_strided_slice %251 {offsets = [0, 384], sizes = [8, 128], strides = [1, 1]} : vector<8x512xf32> to vector<8x128xf32>
    %262 = math.tanh %261 : vector<8x128xf32>
    %263 = arith.mulf %259, %241 : vector<8x128xf32>
    %264 = arith.mulf %258, %262 : vector<8x128xf32>
    %265 = arith.addf %263, %264 : vector<8x128xf32>
    %266 = math.tanh %265 : vector<8x128xf32>
    %267 = arith.mulf %260, %266 : vector<8x128xf32>
    %268 = arith.index_cast %247 : i32 to index
    %c0_88 = arith.constant 0 : index
    %269 = vector.load %arg15[%268, %c0_88] : memref<64x128xf32, #tpu.memory_space<vmem>>, vector<8x128xf32>
    tpu.vector_store %arg15[%268, %c0_88], %267 {strides = array<i32>} : memref<64x128xf32, #tpu.memory_space<vmem>>, vector<8x128xf32>,
    %c2_i32_89 = arith.constant 2 : i32
    %c8_i32_90 = arith.constant 8 : i32
    %270 = arith.muli %c2_i32_89, %c8_i32_90 : i32
    %271 = tpu.assume_multiple %270, 8 : i32
    %cst_91 = arith.constant dense<0.000000e+00> : vector<8x512xf32>
    %272 = tpu.matmul %267, %217, %cst_91 {dimension_numbers = #tpu.dot_dimension_numbers<[1], [0], [0], [1], [0, 0, 1, 1], [], []>} : vector<8x128xf32>, vector<128x512xf32>, vector<8x512xf32> -> vector<8x512xf32>
    %273 = arith.index_cast %271 : i32 to index
    %c0_92 = arith.constant 0 : index
    %274 = vector.load %arg14[%273, %c0_92] : memref<64x512xf32, #tpu.memory_space<vmem>>, vector<8x512xf32>
    %275 = arith.addf %272, %274 : vector<8x512xf32>
    %276 = vector.extract_strided_slice %275 {offsets = [0, 0], sizes = [8, 384], strides = [1, 1]} : vector<8x512xf32> to vector<8x384xf32>
    %277 = arith.negf %276 : vector<8x384xf32>
    %278 = math.exp %277 : vector<8x384xf32>
    %cst_93 = arith.constant 1.000000e+00 : f32
    %279 = vector.broadcast %cst_93 : f32 to vector<8x384xf32>
    %280 = arith.addf %279, %278 : vector<8x384xf32>
    %281 = arith.divf %279, %280 : vector<8x384xf32>
    %282 = vector.extract_strided_slice %281 {offsets = [0, 0], sizes = [8, 128], strides = [1, 1]} : vector<8x384xf32> to vector<8x128xf32>
    %283 = vector.extract_strided_slice %281 {offsets = [0, 128], sizes = [8, 128], strides = [1, 1]} : vector<8x384xf32> to vector<8x128xf32>
    %284 = vector.extract_strided_slice %281 {offsets = [0, 256], sizes = [8, 128], strides = [1, 1]} : vector<8x384xf32> to vector<8x128xf32>
    %285 = vector.extract_strided_slice %275 {offsets = [0, 384], sizes = [8, 128], strides = [1, 1]} : vector<8x512xf32> to vector<8x128xf32>
    %286 = math.tanh %285 : vector<8x128xf32>
    %287 = arith.mulf %283, %265 : vector<8x128xf32>
    %288 = arith.mulf %282, %286 : vector<8x128xf32>
    %289 = arith.addf %287, %288 : vector<8x128xf32>
    %290 = math.tanh %289 : vector<8x128xf32>
    %291 = arith.mulf %284, %290 : vector<8x128xf32>
    %292 = arith.index_cast %271 : i32 to index
    %c0_94 = arith.constant 0 : index
    %293 = vector.load %arg15[%292, %c0_94] : memref<64x128xf32, #tpu.memory_space<vmem>>, vector<8x128xf32>
    tpu.vector_store %arg15[%292, %c0_94], %291 {strides = array<i32>} : memref<64x128xf32, #tpu.memory_space<vmem>>, vector<8x128xf32>,
    %c3_i32_95 = arith.constant 3 : i32
    %c8_i32_96 = arith.constant 8 : i32
    %294 = arith.muli %c3_i32_95, %c8_i32_96 : i32
    %295 = tpu.assume_multiple %294, 8 : i32
    %cst_97 = arith.constant dense<0.000000e+00> : vector<8x512xf32>
    %296 = tpu.matmul %291, %217, %cst_97 {dimension_numbers = #tpu.dot_dimension_numbers<[1], [0], [0], [1], [0, 0, 1, 1], [], []>} : vector<8x128xf32>, vector<128x512xf32>, vector<8x512xf32> -> vector<8x512xf32>
    %297 = arith.index_cast %295 : i32 to index
    %c0_98 = arith.constant 0 : index
    %298 = vector.load %arg14[%297, %c0_98] : memref<64x512xf32, #tpu.memory_space<vmem>>, vector<8x512xf32>
    %299 = arith.addf %296, %298 : vector<8x512xf32>
    %300 = vector.extract_strided_slice %299 {offsets = [0, 0], sizes = [8, 384], strides = [1, 1]} : vector<8x512xf32> to vector<8x384xf32>
    %301 = arith.negf %300 : vector<8x384xf32>
    %302 = math.exp %301 : vector<8x384xf32>
    %cst_99 = arith.constant 1.000000e+00 : f32
    %303 = vector.broadcast %cst_99 : f32 to vector<8x384xf32>
    %304 = arith.addf %303, %302 : vector<8x384xf32>
    %305 = arith.divf %303, %304 : vector<8x384xf32>
    %306 = vector.extract_strided_slice %305 {offsets = [0, 0], sizes = [8, 128], strides = [1, 1]} : vector<8x384xf32> to vector<8x128xf32>
    %307 = vector.extract_strided_slice %305 {offsets = [0, 128], sizes = [8, 128], strides = [1, 1]} : vector<8x384xf32> to vector<8x128xf32>
    %308 = vector.extract_strided_slice %305 {offsets = [0, 256], sizes = [8, 128], strides = [1, 1]} : vector<8x384xf32> to vector<8x128xf32>
    %309 = vector.extract_strided_slice %299 {offsets = [0, 384], sizes = [8, 128], strides = [1, 1]} : vector<8x512xf32> to vector<8x128xf32>
    %310 = math.tanh %309 : vector<8x128xf32>
    %311 = arith.mulf %307, %289 : vector<8x128xf32>
    %312 = arith.mulf %306, %310 : vector<8x128xf32>
    %313 = arith.addf %311, %312 : vector<8x128xf32>
    %314 = math.tanh %313 : vector<8x128xf32>
    %315 = arith.mulf %308, %314 : vector<8x128xf32>
    %316 = arith.index_cast %295 : i32 to index
    %c0_100 = arith.constant 0 : index
    %317 = vector.load %arg15[%316, %c0_100] : memref<64x128xf32, #tpu.memory_space<vmem>>, vector<8x128xf32>
    tpu.vector_store %arg15[%316, %c0_100], %315 {strides = array<i32>} : memref<64x128xf32, #tpu.memory_space<vmem>>, vector<8x128xf32>,
    %c4_i32_101 = arith.constant 4 : i32
    %c8_i32_102 = arith.constant 8 : i32
    %318 = arith.muli %c4_i32_101, %c8_i32_102 : i32
    %319 = tpu.assume_multiple %318, 8 : i32
    %cst_103 = arith.constant dense<0.000000e+00> : vector<8x512xf32>
    %320 = tpu.matmul %315, %217, %cst_103 {dimension_numbers = #tpu.dot_dimension_numbers<[1], [0], [0], [1], [0, 0, 1, 1], [], []>} : vector<8x128xf32>, vector<128x512xf32>, vector<8x512xf32> -> vector<8x512xf32>
    %321 = arith.index_cast %319 : i32 to index
    %c0_104 = arith.constant 0 : index
    %322 = vector.load %arg14[%321, %c0_104] : memref<64x512xf32, #tpu.memory_space<vmem>>, vector<8x512xf32>
    %323 = arith.addf %320, %322 : vector<8x512xf32>
    %324 = vector.extract_strided_slice %323 {offsets = [0, 0], sizes = [8, 384], strides = [1, 1]} : vector<8x512xf32> to vector<8x384xf32>
    %325 = arith.negf %324 : vector<8x384xf32>
    %326 = math.exp %325 : vector<8x384xf32>
    %cst_105 = arith.constant 1.000000e+00 : f32
    %327 = vector.broadcast %cst_105 : f32 to vector<8x384xf32>
    %328 = arith.addf %327, %326 : vector<8x384xf32>
    %329 = arith.divf %327, %328 : vector<8x384xf32>
    %330 = vector.extract_strided_slice %329 {offsets = [0, 0], sizes = [8, 128], strides = [1, 1]} : vector<8x384xf32> to vector<8x128xf32>
    %331 = vector.extract_strided_slice %329 {offsets = [0, 128], sizes = [8, 128], strides = [1, 1]} : vector<8x384xf32> to vector<8x128xf32>
    %332 = vector.extract_strided_slice %329 {offsets = [0, 256], sizes = [8, 128], strides = [1, 1]} : vector<8x384xf32> to vector<8x128xf32>
    %333 = vector.extract_strided_slice %323 {offsets = [0, 384], sizes = [8, 128], strides = [1, 1]} : vector<8x512xf32> to vector<8x128xf32>
    %334 = math.tanh %333 : vector<8x128xf32>
    %335 = arith.mulf %331, %313 : vector<8x128xf32>
    %336 = arith.mulf %330, %334 : vector<8x128xf32>
    %337 = arith.addf %335, %336 : vector<8x128xf32>
    %338 = math.tanh %337 : vector<8x128xf32>
    %339 = arith.mulf %332, %338 : vector<8x128xf32>
    %340 = arith.index_cast %319 : i32 to index
    %c0_106 = arith.constant 0 : index
    %341 = vector.load %arg15[%340, %c0_106] : memref<64x128xf32, #tpu.memory_space<vmem>>, vector<8x128xf32>
    tpu.vector_store %arg15[%340, %c0_106], %339 {strides = array<i32>} : memref<64x128xf32, #tpu.memory_space<vmem>>, vector<8x128xf32>,
    %c5_i32_107 = arith.constant 5 : i32
    %c8_i32_108 = arith.constant 8 : i32
    %342 = arith.muli %c5_i32_107, %c8_i32_108 : i32
    %343 = tpu.assume_multiple %342, 8 : i32
    %cst_109 = arith.constant dense<0.000000e+00> : vector<8x512xf32>
    %344 = tpu.matmul %339, %217, %cst_109 {dimension_numbers = #tpu.dot_dimension_numbers<[1], [0], [0], [1], [0, 0, 1, 1], [], []>} : vector<8x128xf32>, vector<128x512xf32>, vector<8x512xf32> -> vector<8x512xf32>
    %345 = arith.index_cast %343 : i32 to index
    %c0_110 = arith.constant 0 : index
    %346 = vector.load %arg14[%345, %c0_110] : memref<64x512xf32, #tpu.memory_space<vmem>>, vector<8x512xf32>
    %347 = arith.addf %344, %346 : vector<8x512xf32>
    %348 = vector.extract_strided_slice %347 {offsets = [0, 0], sizes = [8, 384], strides = [1, 1]} : vector<8x512xf32> to vector<8x384xf32>
    %349 = arith.negf %348 : vector<8x384xf32>
    %350 = math.exp %349 : vector<8x384xf32>
    %cst_111 = arith.constant 1.000000e+00 : f32
    %351 = vector.broadcast %cst_111 : f32 to vector<8x384xf32>
    %352 = arith.addf %351, %350 : vector<8x384xf32>
    %353 = arith.divf %351, %352 : vector<8x384xf32>
    %354 = vector.extract_strided_slice %353 {offsets = [0, 0], sizes = [8, 128], strides = [1, 1]} : vector<8x384xf32> to vector<8x128xf32>
    %355 = vector.extract_strided_slice %353 {offsets = [0, 128], sizes = [8, 128], strides = [1, 1]} : vector<8x384xf32> to vector<8x128xf32>
    %356 = vector.extract_strided_slice %353 {offsets = [0, 256], sizes = [8, 128], strides = [1, 1]} : vector<8x384xf32> to vector<8x128xf32>
    %357 = vector.extract_strided_slice %347 {offsets = [0, 384], sizes = [8, 128], strides = [1, 1]} : vector<8x512xf32> to vector<8x128xf32>
    %358 = math.tanh %357 : vector<8x128xf32>
    %359 = arith.mulf %355, %337 : vector<8x128xf32>
    %360 = arith.mulf %354, %358 : vector<8x128xf32>
    %361 = arith.addf %359, %360 : vector<8x128xf32>
    %362 = math.tanh %361 : vector<8x128xf32>
    %363 = arith.mulf %356, %362 : vector<8x128xf32>
    %364 = arith.index_cast %343 : i32 to index
    %c0_112 = arith.constant 0 : index
    %365 = vector.load %arg15[%364, %c0_112] : memref<64x128xf32, #tpu.memory_space<vmem>>, vector<8x128xf32>
    tpu.vector_store %arg15[%364, %c0_112], %363 {strides = array<i32>} : memref<64x128xf32, #tpu.memory_space<vmem>>, vector<8x128xf32>,
    %c6_i32_113 = arith.constant 6 : i32
    %c8_i32_114 = arith.constant 8 : i32
    %366 = arith.muli %c6_i32_113, %c8_i32_114 : i32
    %367 = tpu.assume_multiple %366, 8 : i32
    %cst_115 = arith.constant dense<0.000000e+00> : vector<8x512xf32>
    %368 = tpu.matmul %363, %217, %cst_115 {dimension_numbers = #tpu.dot_dimension_numbers<[1], [0], [0], [1], [0, 0, 1, 1], [], []>} : vector<8x128xf32>, vector<128x512xf32>, vector<8x512xf32> -> vector<8x512xf32>
    %369 = arith.index_cast %367 : i32 to index
    %c0_116 = arith.constant 0 : index
    %370 = vector.load %arg14[%369, %c0_116] : memref<64x512xf32, #tpu.memory_space<vmem>>, vector<8x512xf32>
    %371 = arith.addf %368, %370 : vector<8x512xf32>
    %372 = vector.extract_strided_slice %371 {offsets = [0, 0], sizes = [8, 384], strides = [1, 1]} : vector<8x512xf32> to vector<8x384xf32>
    %373 = arith.negf %372 : vector<8x384xf32>
    %374 = math.exp %373 : vector<8x384xf32>
    %cst_117 = arith.constant 1.000000e+00 : f32
    %375 = vector.broadcast %cst_117 : f32 to vector<8x384xf32>
    %376 = arith.addf %375, %374 : vector<8x384xf32>
    %377 = arith.divf %375, %376 : vector<8x384xf32>
    %378 = vector.extract_strided_slice %377 {offsets = [0, 0], sizes = [8, 128], strides = [1, 1]} : vector<8x384xf32> to vector<8x128xf32>
    %379 = vector.extract_strided_slice %377 {offsets = [0, 128], sizes = [8, 128], strides = [1, 1]} : vector<8x384xf32> to vector<8x128xf32>
    %380 = vector.extract_strided_slice %377 {offsets = [0, 256], sizes = [8, 128], strides = [1, 1]} : vector<8x384xf32> to vector<8x128xf32>
    %381 = vector.extract_strided_slice %371 {offsets = [0, 384], sizes = [8, 128], strides = [1, 1]} : vector<8x512xf32> to vector<8x128xf32>
    %382 = math.tanh %381 : vector<8x128xf32>
    %383 = arith.mulf %379, %361 : vector<8x128xf32>
    %384 = arith.mulf %378, %382 : vector<8x128xf32>
    %385 = arith.addf %383, %384 : vector<8x128xf32>
    %386 = math.tanh %385 : vector<8x128xf32>
    %387 = arith.mulf %380, %386 : vector<8x128xf32>
    %388 = arith.index_cast %367 : i32 to index
    %c0_118 = arith.constant 0 : index
    %389 = vector.load %arg15[%388, %c0_118] : memref<64x128xf32, #tpu.memory_space<vmem>>, vector<8x128xf32>
    tpu.vector_store %arg15[%388, %c0_118], %387 {strides = array<i32>} : memref<64x128xf32, #tpu.memory_space<vmem>>, vector<8x128xf32>,
    %c7_i32_119 = arith.constant 7 : i32
    %c8_i32_120 = arith.constant 8 : i32
    %390 = arith.muli %c7_i32_119, %c8_i32_120 : i32
    %391 = tpu.assume_multiple %390, 8 : i32
    %cst_121 = arith.constant dense<0.000000e+00> : vector<8x512xf32>
    %392 = tpu.matmul %387, %217, %cst_121 {dimension_numbers = #tpu.dot_dimension_numbers<[1], [0], [0], [1], [0, 0, 1, 1], [], []>} : vector<8x128xf32>, vector<128x512xf32>, vector<8x512xf32> -> vector<8x512xf32>
    %393 = arith.index_cast %391 : i32 to index
    %c0_122 = arith.constant 0 : index
    %394 = vector.load %arg14[%393, %c0_122] : memref<64x512xf32, #tpu.memory_space<vmem>>, vector<8x512xf32>
    %395 = arith.addf %392, %394 : vector<8x512xf32>
    %396 = vector.extract_strided_slice %395 {offsets = [0, 0], sizes = [8, 384], strides = [1, 1]} : vector<8x512xf32> to vector<8x384xf32>
    %397 = arith.negf %396 : vector<8x384xf32>
    %398 = math.exp %397 : vector<8x384xf32>
    %cst_123 = arith.constant 1.000000e+00 : f32
    %399 = vector.broadcast %cst_123 : f32 to vector<8x384xf32>
    %400 = arith.addf %399, %398 : vector<8x384xf32>
    %401 = arith.divf %399, %400 : vector<8x384xf32>
    %402 = vector.extract_strided_slice %401 {offsets = [0, 0], sizes = [8, 128], strides = [1, 1]} : vector<8x384xf32> to vector<8x128xf32>
    %403 = vector.extract_strided_slice %401 {offsets = [0, 128], sizes = [8, 128], strides = [1, 1]} : vector<8x384xf32> to vector<8x128xf32>
    %404 = vector.extract_strided_slice %401 {offsets = [0, 256], sizes = [8, 128], strides = [1, 1]} : vector<8x384xf32> to vector<8x128xf32>
    %405 = vector.extract_strided_slice %395 {offsets = [0, 384], sizes = [8, 128], strides = [1, 1]} : vector<8x512xf32> to vector<8x128xf32>
    %406 = math.tanh %405 : vector<8x128xf32>
    %407 = arith.mulf %403, %385 : vector<8x128xf32>
    %408 = arith.mulf %402, %406 : vector<8x128xf32>
    %409 = arith.addf %407, %408 : vector<8x128xf32>
    %410 = math.tanh %409 : vector<8x128xf32>
    %411 = arith.mulf %404, %410 : vector<8x128xf32>
    %412 = arith.index_cast %391 : i32 to index
    %c0_124 = arith.constant 0 : index
    %413 = vector.load %arg15[%412, %c0_124] : memref<64x128xf32, #tpu.memory_space<vmem>>, vector<8x128xf32>
    tpu.vector_store %arg15[%412, %c0_124], %411 {strides = array<i32>} : memref<64x128xf32, #tpu.memory_space<vmem>>, vector<8x128xf32>,
    %c8_i32_125 = arith.constant 8 : i32
    %c1_126 = arith.constant 1 : index
    %c0_127 = arith.constant 0 : index
    %c0_128 = arith.constant 0 : index
    %414 = vector.load %arg12[%c1_126, %c0_127, %c0_128] : memref<2x8x128xf32, #tpu.memory_space<vmem>>, vector<1x8x128xf32>
    %415 = vector.shape_cast %414 : vector<1x8x128xf32> to vector<8x128xf32>
    %416 = vector.shape_cast %411 : vector<8x128xf32> to vector<1x8x128xf32>
    tpu.vector_store %arg12[%c1_126, %c0_127, %c0_128], %416 {strides = array<i32>} : memref<2x8x128xf32, #tpu.memory_space<vmem>>, vector<1x8x128xf32>,
    %c1_129 = arith.constant 1 : index
    %c0_130 = arith.constant 0 : index
    %c0_131 = arith.constant 0 : index
    %417 = vector.load %arg13[%c1_129, %c0_130, %c0_131] : memref<2x8x128xf32, #tpu.memory_space<vmem>>, vector<1x8x128xf32>
    %418 = vector.shape_cast %417 : vector<1x8x128xf32> to vector<8x128xf32>
    %419 = vector.shape_cast %409 : vector<8x128xf32> to vector<1x8x128xf32>
    tpu.vector_store %arg13[%c1_129, %c0_130, %c0_131], %419 {strides = array<i32>} : memref<2x8x128xf32, #tpu.memory_space<vmem>>, vector<1x8x128xf32>,
    %c0_132 = arith.constant 0 : index
    %c0_133 = arith.constant 0 : index
    %420 = vector.load %arg9[%c0_132, %c0_133] : memref<128x128xf32, #tpu.memory_space<vmem>>, vector<128x128xf32>
    %cst_134 = arith.constant dense<0.000000e+00> : vector<8x128xf32>
    %421 = tpu.matmul %411, %420, %cst_134 {dimension_numbers = #tpu.dot_dimension_numbers<[1], [0], [0], [1], [0, 0, 1, 1], [], []>} : vector<8x128xf32>, vector<128x128xf32>, vector<8x128xf32> -> vector<8x128xf32>
    %c0_135 = arith.constant 0 : index
    %c0_136 = arith.constant 0 : index
    %422 = vector.load %arg10[%c0_135, %c0_136] : memref<1x128xf32, #tpu.memory_space<vmem>>, vector<1x128xf32>
    %423 = vector.broadcast %422 : vector<1x128xf32> to vector<8x128xf32>
    %424 = arith.addf %421, %423 : vector<8x128xf32>
    %c0_137 = arith.constant 0 : index
    %c0_138 = arith.constant 0 : index
    %425 = vector.load %arg11[%c0_137, %c0_138] : memref<8x128xf32, #tpu.memory_space<vmem>>, vector<8x128xf32>
    tpu.vector_store %arg11[%c0_137, %c0_138], %424 {strides = array<i32>} : memref<8x128xf32, #tpu.memory_space<vmem>>, vector<8x128xf32>,
    return
  }
}

</mosaic_0001>

<bundles_post_ra>
// kernel: tpu_custom_call.1
= control target key start
LH: loop header
LB: loop body
LE: loop exit
PB: predicated region body
PF: predicated region fallthrough
CT: control target
= control target key end

     0   :  { %19 = vsyncpa [#allocation5], 0  ;;  %s6876_s0 = inlined_call_operand.vmem [shape: f32[64,16], index: 0, kind: input, shape index: {}]   ;;  %s6877_s1 = inlined_call_operand.hbm [shape: f32[16,512], index: 1, kind: input, shape index: {}]   ;;  %s6878_s2 = inlined_call_operand.hbm [shape: f32[128,512], index: 2, kind: input, shape index: {}]   ;;  %s6879_s3 = inlined_call_operand.hbm [shape: f32[1,512], index: 3, kind: input, shape index: {}]   ;;  %s6880_s4 = inlined_call_operand.hbm [shape: f32[128,512], index: 4, kind: input, shape index: {}]   ;;  %s6881_s5 = inlined_call_operand.hbm [shape: f32[128,512], index: 5, kind: input, shape index: {}]   ;;  %s6882_s6 = inlined_call_operand.hbm [shape: f32[1,512], index: 6, kind: input, shape index: {}]   ;;  %s6883_s7 = inlined_call_operand.hbm [shape: f32[2,8,128], index: 7, kind: input, shape index: {}, may-alias: {7,12}]   ;;  %s6884_s8 = inlined_call_operand.hbm [shape: f32[2,8,128], index: 8, kind: input, shape index: {}, may-alias: {8,13}]   ;;  %s6885_s9 = inlined_call_operand.vmem [shape: f32[128,128], index: 9, kind: input, shape index: {}]   ;;  %s6886_s10 = inlined_call_operand.hbm [shape: f32[1,128], index: 10, kind: input, shape index: {}]   ;;  %s6887_s11 = inlined_call_operand.hbm [shape: f32[8,128], index: 11, kind: output, shape index: {0}]   ;;  %s6888_s12 = inlined_call_operand.hbm [shape: f32[2,8,128], index: 12, kind: output, shape index: {1}, may-alias: {7,12}]   ;;  %s6889_s13 = inlined_call_operand.hbm [shape: f32[2,8,128], index: 13, kind: output, shape index: {2}, may-alias: {8,13}]  }
   0x1   :  { %20 = vsyncpa [#allocation8], 0 }
   0x2   :  { %21 = vsyncpa [#allocation11], 0 }
   0x3   :  { %22 = vsyncpa [#allocation14], 0 }
   0x4   :  { %23 = vsyncpa [#allocation17], 0 }
   0x5   :  { %24 = vsyncpa [#allocation6], 0 }
   0x6   :  { %25 = vsyncpa [#allocation21], 0  ;;  %s4663_s25 = smov [#allocation7]   ;;  %s4664_s27 = smov [#allocation10]  }
   0x7   :  { %s45_s26 = sshll.u32 %s4663_s25, 4  ;;  %s67_s28 = sshll.u32 %s4664_s27, 4  ;;  %s46_s26 = int_to_ptr.vmem [resolvable:$true] %s45_s26  ;;  %s68_s28 = int_to_ptr.vmem [resolvable:$true] %s67_s28 }
   0x8   :  { %s4417_s29 = scalar_lea.vmem %s46_s26, 8192  ;;  %p4422_p1 = scmp.lt.s32.totalorder %s46_s26, %s46_s26 }
   0x9   :  { %p4418_p0 = scmp.ne.s32.totalorder %s46_s26, %s4417_s29  ;;  %p4423_p2 = scmp.lt.s32.totalorder %s4417_s29, %s4417_s29 }
   0xb   :  { %p4424_p3 = por %p4423_p2, %p4422_p1 }
   0xd   :  { %p4425_p4 = pnand %p4424_p3, %p4418_p0 }
   0xf   :  { %4428 = shalt.err (!%p4425_p4)
}
  0x10   :  { %s4665_s30 = smov 512   ;;  %s4666_s14 = smov 32  }
  0x11   :  { %51 = dma.hbm_to_vmem [thread:$0]  %s6878_s2, 8192, %s46_s26, [#allocation8], %s4665_s30, %s4665_s30, %s4666_s14  }
  0x12   :  { %s4437_s17 = scalar_lea.vmem %s68_s28, 8192  ;;  %p4442_p6 = scmp.lt.s32.totalorder %s68_s28, %s68_s28 }
  0x13   :  { %p4438_p5 = scmp.ne.s32.totalorder %s68_s28, %s4437_s17  ;;  %p4443_p7 = scmp.lt.s32.totalorder %s4437_s17, %s4437_s17 }
  0x15   :  { %p4444_p8 = por %p4443_p7, %p4442_p6 }
  0x17   :  { %p4445_p9 = pnand %p4444_p8, %p4438_p5 }
  0x19   :  { %4448 = shalt.err (!%p4445_p9)
}
  0x1a   :  { %73 = dma.hbm_to_vmem [thread:$0]  %s6880_s4, 8192, %s68_s28, [#allocation11], %s4665_s30, %s4665_s30, %s4666_s14  }
  0x1b   :  { %s4667_s20 = smov [#allocation13]  }
  0x1c   :  { %s92_s21 = sshll.u32 %s4667_s20, 4  ;;  %s93_s21 = int_to_ptr.vmem [resolvable:$true] %s92_s21 }
  0x1d   :  { %s4457_s22 = scalar_lea.vmem %s93_s21, 64  ;;  %p4462_p11 = scmp.lt.s32.totalorder %s93_s21, %s93_s21 }
  0x1e   :  { %p4458_p10 = scmp.ne.s32.totalorder %s93_s21, %s4457_s22  ;;  %p4463_p12 = scmp.lt.s32.totalorder %s4457_s22, %s4457_s22 }
  0x20   :  { %p4464_p13 = por %p4463_p12, %p4462_p11 }
  0x22   :  { %p4465_p0 = pnand %p4464_p13, %p4458_p10 }
  0x24   :  { %4468 = shalt.err (!%p4465_p0)
}
  0x25   :  { %95 = dma.hbm_to_vmem [thread:$0]  %s6882_s6, 64, %s93_s21, [#allocation14]  }
  0x26   :  { %s4668_s24 = smov [#allocation16]   ;;  %s4669_s26 = smov [#allocation4]  }
  0x27   :  { %s113_s25 = sshll.u32 %s4668_s24, 4  ;;  %s33_s27 = sshll.u32 %s4669_s26, 4  ;;  %s114_s25 = int_to_ptr.vmem [resolvable:$true] %s113_s25  ;;  %s34_s27 = int_to_ptr.vmem [resolvable:$true] %s33_s27 }
  0x28   :  { %s4477_s4 = scalar_lea.vmem %s114_s25, 256  ;;  %p4482_p2 = scmp.lt.s32.totalorder %s114_s25, %s114_s25 }
  0x29   :  { %p4478_p1 = scmp.ne.s32.totalorder %s114_s25, %s4477_s4  ;;  %p4483_p3 = scmp.lt.s32.totalorder %s4477_s4, %s4477_s4 }
  0x2b   :  { %p4484_p4 = por %p4483_p3, %p4482_p2 }
  0x2d   :  { %p4485_p5 = pnand %p4484_p4, %p4478_p1 }
  0x2f   :  { %4488 = shalt.err (!%p4485_p5)
}
  0x30   :  { %s4670_s28 = smov 128   ;;  %s4671_s29 = smov 8  }
  0x31   :  { %119 = dma.hbm_to_vmem [thread:$0]  %s6884_s8, 256, %s114_s25, [#allocation17], %s4670_s28, %s4670_s28, %s4671_s29  }
  0x32   :  { %s4497_s6 = scalar_lea.vmem %s34_s27, 1024  ;;  %p4502_p7 = scmp.lt.s32.totalorder %s34_s27, %s34_s27 }
  0x33   :  { %p4498_p6 = scmp.ne.s32.totalorder %s34_s27, %s4497_s6  ;;  %p4503_p8 = scmp.lt.s32.totalorder %s4497_s6, %s4497_s6 }
  0x35   :  { %p4504_p9 = por %p4503_p8, %p4502_p7 }
  0x37   :  { %p4505_p10 = pnand %p4504_p9, %p4498_p6 }
  0x39   :  { %4508 = shalt.err (!%p4505_p10)
}
  0x3a   :  { %39 = dma.hbm_to_vmem [thread:$0]  %s6877_s1, 1024, %s34_s27, [#allocation5], %s4665_s30, %s4665_s30, %s4666_s14  }
  0x3b   :  { %s4672_s19 = smov [#allocation9]   ;;  %s4673_s21 = smov [#allocation12]  }
  0x3c   :  { %s58_s20 = sshll.u32 %s4672_s19, 4  ;;  %s79_s8 = sshll.u32 %s4673_s21, 4  ;;  %s59_s20 = int_to_ptr.vmem [resolvable:$true] %s58_s20  ;;  %s80_s8 = int_to_ptr.vmem [resolvable:$true] %s79_s8 }
  0x3d   :  { %s4517_s22 = scalar_lea.vmem %s59_s20, 64  ;;  %p4522_p12 = scmp.lt.s32.totalorder %s59_s20, %s59_s20 }
  0x3e   :  { %p4518_p11 = scmp.ne.s32.totalorder %s59_s20, %s4517_s22  ;;  %p4523_p13 = scmp.lt.s32.totalorder %s4517_s22, %s4517_s22 }
  0x40   :  { %p4524_p0 = por %p4523_p13, %p4522_p12 }
  0x42   :  { %p4525_p1 = pnand %p4524_p0, %p4518_p11 }
  0x44   :  { %4528 = shalt.err (!%p4525_p1)
}
  0x45   :  { %61 = dma.hbm_to_vmem [thread:$0]  %s6879_s3, 64, %s59_s20, [#allocation8]  }
  0x46   :  { %s4537_s24 = scalar_lea.vmem %s80_s8, 8192  ;;  %p4542_p3 = scmp.lt.s32.totalorder %s80_s8, %s80_s8 }
  0x47   :  { %p4538_p2 = scmp.ne.s32.totalorder %s80_s8, %s4537_s24  ;;  %p4543_p4 = scmp.lt.s32.totalorder %s4537_s24, %s4537_s24 }
  0x49   :  { %p4544_p5 = por %p4543_p4, %p4542_p3 }
  0x4b   :  { %p4545_p6 = pnand %p4544_p5, %p4538_p2 }
  0x4d   :  { %4548 = shalt.err (!%p4545_p6)
}
  0x4e   :  { %85 = dma.hbm_to_vmem [thread:$0]  %s6881_s5, 8192, %s80_s8, [#allocation11], %s4665_s30, %s4665_s30, %s4666_s14  }
  0x4f   :  { %s4674_s26 = smov [#allocation15]   ;;  %s4675_s4 = smov [#allocation18]  }
  0x50   :  { %s101_s27 = sshll.u32 %s4674_s26, 4  ;;  %s128_s3 = sshll.u32 %s4675_s4, 4  ;;  %s102_s27 = int_to_ptr.vmem [resolvable:$true] %s101_s27  ;;  %s129_s3 = int_to_ptr.vmem [resolvable:$true] %s128_s3 }
  0x51   :  { %s4557_s15 = scalar_lea.vmem %s102_s27, 256  ;;  %p4562_p8 = scmp.lt.s32.totalorder %s102_s27, %s102_s27 }
  0x52   :  { %p4558_p7 = scmp.ne.s32.totalorder %s102_s27, %s4557_s15  ;;  %p4563_p9 = scmp.lt.s32.totalorder %s4557_s15, %s4557_s15 }
  0x54   :  { %p4564_p10 = por %p4563_p9, %p4562_p8 }
  0x56   :  { %p4565_p11 = pnand %p4564_p10, %p4558_p7 }
  0x58   :  { %4568 = shalt.err (!%p4565_p11)
}
  0x59   :  { %107 = dma.hbm_to_vmem [thread:$0]  %s6883_s7, 256, %s102_s27, [#allocation14], %s4670_s28, %s4670_s28, %s4671_s29  }
  0x5a   :  { %s4577_s5 = scalar_lea.vmem %s129_s3, 16  ;;  %s4581_s30 = scalar_lea.vmem %s129_s3, 32 }
  0x5b   :  { %p4578_p12 = scmp.ne.s32.totalorder %s129_s3, %s4577_s5  ;;  %p4582_p13 = scmp.lt.s32.totalorder %s129_s3, %s129_s3 }
  0x5c   :  { %p4583_p0 = scmp.lt.s32.totalorder %s4581_s30, %s4577_s5 }
  0x5e   :  { %p4584_p1 = por %p4583_p0, %p4582_p13 }
  0x60   :  { %p4585_p2 = pnand %p4584_p1, %p4578_p12 }
  0x62   :  { %4588 = shalt.err (!%p4585_p2)
}
  0x63   :  { %131 = dma.hbm_to_vmem [thread:$0]  %s6886_s10, 16, %s129_s3, [#allocation17]  }
  0x64   :  { %4649 = dma.done.wait [#allocation5], 1024  }
  0x65   :  { %4650 = vsyncadd [#allocation5], 4294966272 }
  0x66   :  { %4651 = dma.done.wait [#allocation8], 8256  }
  0x67   :  { %4652 = vsyncadd [#allocation8], 4294959040 }
  0x68   :  { %4653 = dma.done.wait [#allocation11], 16384  }
  0x69   :  { %4654 = vsyncadd [#allocation11], 4294950912 }
  0x6a   :  { %4655 = dma.done.wait [#allocation14], 320  }
  0x6b   :  { %4656 = vsyncadd [#allocation14], 4294966976 }
  0x6c   :  { %4657 = dma.done.wait [#allocation17], 272  }
  0x6d   :  { %4658 = vsyncadd [#allocation17], 4294967024  ;;  %v6890_v0 = vmov 0.0   ;;  %v172_v1 = vld [vmem:[#allocation4 + $0x28] sm:$0xff]  ;;  %v174_v2 = vld [vmem:[#allocation4 + $0x38] sm:$0xff]  ;;  %vm197_vm0 = vcmask 130048  }
  0x6e   :  { %286 = vmatprep.mubr.f32.mxu0 %v6890_v0  ;;  %399 = vmatprep.mubr.f32.mxu1 %v6890_v0  ;;  %v171_v3 = vld [vmem:[#allocation4 + $0x20] sm:$0xff]  ;;  %v173_v4 = vld [vmem:[#allocation4 + $0x30] sm:$0xff]  ;;  %v168_v5 = vld [vmem:[#allocation4 + $0x8] sm:$0xff]  ;;  %vm4677_vm1 = vmmov 0  }
  0x6f   :  { %250 = vmatprep.subr.mxu0 %v172_v1  ;;  %363 = vmatprep.subr.mxu1 %v174_v2  ;;  %v170_v6 = vld [vmem:[#allocation4 + $0x18] sm:$0xff]  ;;  %v167_v7 = vld [vmem:[#allocation4] sm:$0xff]  ;;  %v169_v8 = vld [vmem:[#allocation4 + $0x10] sm:$0xff] }
  0x70   :  { %251 = vmatpush1.msra.mxu0 %v171_v3  ;;  %364 = vmatpush1.msra.mxu1 %v173_v4  ;;  %v159_v9 = vld [vmem:[%s6876_s0] sm:$0xff]  ;;  %v4801_v10 = vld [vmem:[#allocation7 + $0x1e8] sm:$0xff]  ;;  %v4803_v11 = vld [vmem:[#allocation7 + $0x1f8] sm:$0xff] }
  0x71   :  { %252 = vmatprep.subr.mxu0 %v168_v5  ;;  %365 = vmatprep.subr.mxu1 %v170_v6  ;;  %7098 = vst [vmem:[#allocation30_spill] sm:$0xff] %v4801_v10  ;;  %7099 = vst [vmem:[#allocation31_spill] sm:$0xff] %v4803_v11  ;;  %v4805_v12 = vld [vmem:[#allocation7 + $0x1e0] sm:$0xff]  ;;  %v4807_v13 = vld [vmem:[#allocation7 + $0x1f0] sm:$0xff] }
  0x72   :  { %253 = vmatpush1.msra.mxu0 %v167_v7  ;;  %366 = vmatpush1.msra.mxu1 %v169_v8  ;;  %v4811_v14 = vld [vmem:[#allocation7 + $0x1c8] sm:$0xff]  ;;  %v4813_v15 = vld [vmem:[#allocation7 + $0x1d8] sm:$0xff]  ;;  %v4819_v16 = vld [vmem:[#allocation7 + $0x1c0] sm:$0xff] }
  0x73   :  { %3890 = vmatmul.mubr.msk.f32.vlgmr.msra.gmra.mxu0 %vm197_vm0, %v159_v9  ;;  %3898 = vmatmul.mubr.msk.f32.vlgmr.msra.gmra.mxu1 %vm197_vm0, %v159_v9  ;;  %v4821_v17 = vld [vmem:[#allocation7 + $0x1d0] sm:$0xff]  ;;  %v160_v18 = vld [vmem:[%s6876_s0 + $0x8] sm:$0xff]  ;;  %v4832_v20 = vld [vmem:[#allocation7 + $0x1b8] sm:$0xff] }
  0x74   :  { %553 = vmatprep.subr.mxu0 %v4801_v10  ;;  %624 = vmatprep.subr.mxu1 %v4803_v11  ;;  %v4830_v19 = vld [vmem:[#allocation7 + $0x1a8] sm:$0xff]  ;;  %v4836_v21 = vld [vmem:[#allocation7 + $0x1a0] sm:$0xff]  ;;  %v4838_v22 = vld [vmem:[#allocation7 + $0x1b0] sm:$0xff] }
  0x75   :  { %554 = vmatpush1.msra.mxu0 %v4805_v12  ;;  %625 = vmatpush1.msra.mxu1 %v4807_v13  ;;  %v4842_v23 = vld [vmem:[#allocation7 + $0x188] sm:$0xff]  ;;  %v4844_v24 = vld [vmem:[#allocation7 + $0x198] sm:$0xff]  ;;  %v4850_v25 = vld [vmem:[#allocation7 + $0x180] sm:$0xff] }
  0x76   :  { %555 = vmatprep.subr.mxu0 %v4811_v14  ;;  %626 = vmatprep.subr.mxu1 %v4813_v15  ;;  %v4852_v26 = vld [vmem:[#allocation7 + $0x190] sm:$0xff]  ;;  %v4861_v28 = vld [vmem:[#allocation7 + $0x168] sm:$0xff]  ;;  %v4863_v29 = vld [vmem:[#allocation7 + $0x178] sm:$0xff] }
  0x77   :  { %292 = vmatprep.mubr.f32.mxu0 %v6890_v0  ;;  %405 = vmatprep.mubr.f32.mxu1 %v6890_v0  ;;  %v161_v27 = vld [vmem:[%s6876_s0 + $0x10] sm:$0xff]  ;;  %v4867_v30 = vld [vmem:[#allocation7 + $0x160] sm:$0xff]  ;;  %v4873_v32 = vld [vmem:[#allocation7 + $0x148] sm:$0xff] }
  0x78   :  { %556 = vmatpush1.msra.mxu0 %v4819_v16  ;;  %627 = vmatpush1.msra.mxu1 %v4821_v17  ;;  %v4869_v31 = vld [vmem:[#allocation7 + $0x170] sm:$0xff]  ;;  %v4875_v33 = vld [vmem:[#allocation7 + $0x158] sm:$0xff]  ;;  %v4881_v34 = vld [vmem:[#allocation7 + $0x140] sm:$0xff] }
  0x79   :  { %3891 = vmatmul.mubr.msk.f32.gmra.mxu0 %vm197_vm0, %v160_v18  ;;  %3899 = vmatmul.mubr.msk.f32.gmra.mxu1 %vm197_vm0, %v160_v18  ;;  %v4883_v35 = vld [vmem:[#allocation7 + $0x150] sm:$0xff]  ;;  %v162_v36 = vld [vmem:[%s6876_s0 + $0x18] sm:$0xff]  ;;  %v4892_v37 = vld [vmem:[#allocation7 + $0x128] sm:$0xff] }
  0x7a   :  { %557 = vmatprep.subr.mxu0 %v4830_v19  ;;  %628 = vmatprep.subr.mxu1 %v4832_v20  ;;  %v4894_v38 = vld [vmem:[#allocation7 + $0x138] sm:$0xff]  ;;  %v4898_v39 = vld [vmem:[#allocation7 + $0x120] sm:$0xff]  ;;  %v4900_v40 = vld [vmem:[#allocation7 + $0x130] sm:$0xff] }
  0x7b   :  { %558 = vmatpush1.msra.mxu0 %v4836_v21  ;;  %629 = vmatpush1.msra.mxu1 %v4838_v22  ;;  %v4904_v41 = vld [vmem:[#allocation7 + $0x108] sm:$0xff]  ;;  %v4906_v42 = vld [vmem:[#allocation7 + $0x118] sm:$0xff]  ;;  %v4912_v43 = vld [vmem:[#allocation7 + $0x100] sm:$0xff] }
  0x7c   :  { %559 = vmatprep.subr.mxu0 %v4842_v23  ;;  %630 = vmatprep.subr.mxu1 %v4844_v24  ;;  %v4914_v44 = vld [vmem:[#allocation7 + $0x110] sm:$0xff]  ;;  %v163_v45 = vld [vmem:[%s6876_s0 + $0x20] sm:$0xff]  ;;  %v4923_v46 = vld [vmem:[#allocation7 + $0xe8] sm:$0xff] }
  0x7d   :  { %298 = vmatprep.mubr.f32.mxu0 %v6890_v0  ;;  %411 = vmatprep.mubr.f32.mxu1 %v6890_v0  ;;  %v4925_v47 = vld [vmem:[#allocation7 + $0xf8] sm:$0xff]  ;;  %v4929_v48 = vld [vmem:[#allocation7 + $0xe0] sm:$0xff]  ;;  %v4931_v49 = vld [vmem:[#allocation7 + $0xf0] sm:$0xff] }
  0x7e   :  { %560 = vmatpush1.msra.mxu0 %v4850_v25  ;;  %631 = vmatpush1.msra.mxu1 %v4852_v26  ;;  %v4935_v50 = vld [vmem:[#allocation7 + $0xc8] sm:$0xff]  ;;  %v4937_v51 = vld [vmem:[#allocation7 + $0xd8] sm:$0xff]  ;;  %v4943_v52 = vld [vmem:[#allocation7 + $0xc0] sm:$0xff] }
  0x7f   :  { %3892 = vmatmul.mubr.msk.f32.gmra.mxu0 %vm197_vm0, %v161_v27  ;;  %3900 = vmatmul.mubr.msk.f32.gmra.mxu1 %vm197_vm0, %v161_v27  ;;  %v4945_v53 = vld [vmem:[#allocation7 + $0xd0] sm:$0xff]  ;;  %v164_v54 = vld [vmem:[%s6876_s0 + $0x28] sm:$0xff]  ;;  %v4956_v56 = vld [vmem:[#allocation7 + $0xb8] sm:$0xff] }
  0x80   :  { %561 = vmatprep.subr.mxu0 %v4861_v28  ;;  %632 = vmatprep.subr.mxu1 %v4863_v29  ;;  %v4954_v55 = vld [vmem:[#allocation7 + $0xa8] sm:$0xff]  ;;  %v4960_v57 = vld [vmem:[#allocation7 + $0xa0] sm:$0xff]  ;;  %v4962_v58 = vld [vmem:[#allocation7 + $0xb0] sm:$0xff] }
  0x81   :  { %562 = vmatpush1.msra.mxu0 %v4867_v30  ;;  %633 = vmatpush1.msra.mxu1 %v4869_v31  ;;  %7100 = vst [vmem:[#allocation32_spill] sm:$0xff] %v4962_v58  ;;  %v4966_v59 = vld [vmem:[#allocation7 + $0x88] sm:$0xff]  ;;  %v4968_v60 = vld [vmem:[#allocation7 + $0x98] sm:$0xff]  ;;  %v4974_v61 = vld [vmem:[#allocation7 + $0x80] sm:$0xff] }
  0x82   :  { %563 = vmatprep.subr.mxu0 %v4873_v32  ;;  %634 = vmatprep.subr.mxu1 %v4875_v33  ;;  %7101 = vst [vmem:[#allocation33_spill] sm:$0xff] %v4966_v59  ;;  %7102 = vst [vmem:[#allocation34_spill] sm:$0xff] %v4968_v60  ;;  %v4976_v62 = vld [vmem:[#allocation7 + $0x90] sm:$0xff]  ;;  %v4985_v1 = vld [vmem:[#allocation7 + $0x68] sm:$0xff] }
  0x83   :  { %304 = vmatprep.mubr.f32.mxu0 %v6890_v0  ;;  %417 = vmatprep.mubr.f32.mxu1 %v6890_v0  ;;  %7103 = vst [vmem:[#allocation35_spill] sm:$0xff] %v4974_v61  ;;  %7104 = vst [vmem:[#allocation36_spill] sm:$0xff] %v4976_v62  ;;  %v165_v63 = vld [vmem:[%s6876_s0 + $0x30] sm:$0xff]  ;;  %v4987_v2 = vld [vmem:[#allocation7 + $0x78] sm:$0xff] }
  0x84   :  { %564 = vmatpush1.msra.mxu0 %v4881_v34  ;;  %635 = vmatpush1.msra.mxu1 %v4883_v35  ;;  %7105 = vst [vmem:[#allocation37_spill] sm:$0xff] %v4985_v1  ;;  %7106 = vst [vmem:[#allocation38_spill] sm:$0xff] %v4987_v2  ;;  %v4991_v3 = vld [vmem:[#allocation7 + $0x60] sm:$0xff]  ;;  %v4993_v4 = vld [vmem:[#allocation7 + $0x70] sm:$0xff] }
  0x85   :  { %3893 = vmatmul.mubr.msk.f32.gmra.mxu0 %vm197_vm0, %v162_v36  ;;  %3901 = vmatmul.mubr.msk.f32.gmra.mxu1 %vm197_vm0, %v162_v36  ;;  %7107 = vst [vmem:[#allocation39_spill] sm:$0xff] %v4991_v3  ;;  %7108 = vst [vmem:[#allocation40_spill] sm:$0xff] %v4993_v4  ;;  %v4997_v5 = vld [vmem:[#allocation7 + $0x48] sm:$0xff]  ;;  %v4999_v6 = vld [vmem:[#allocation7 + $0x58] sm:$0xff] }
  0x86   :  { %565 = vmatprep.subr.mxu0 %v4892_v37  ;;  %636 = vmatprep.subr.mxu1 %v4894_v38  ;;  %7109 = vst [vmem:[#allocation41_spill] sm:$0xff] %v4997_v5  ;;  %7110 = vst [vmem:[#allocation42_spill] sm:$0xff] %v4999_v6  ;;  %v5005_v7 = vld [vmem:[#allocation7 + $0x40] sm:$0xff]  ;;  %v5007_v8 = vld [vmem:[#allocation7 + $0x50] sm:$0xff] }
  0x87   :  { %566 = vmatpush1.msra.mxu0 %v4898_v39  ;;  %637 = vmatpush1.msra.mxu1 %v4900_v40  ;;  %7111 = vst [vmem:[#allocation43_spill] sm:$0xff] %v5005_v7  ;;  %7112 = vst [vmem:[#allocation44_spill] sm:$0xff] %v5007_v8  ;;  %v166_v9 = vld [vmem:[%s6876_s0 + $0x38] sm:$0xff]  ;;  %v5016_v18 = vld [vmem:[#allocation7 + $0x28] sm:$0xff] }
  0x88   :  { %567 = vmatprep.subr.mxu0 %v4904_v41  ;;  %638 = vmatprep.subr.mxu1 %v4906_v42  ;;  %7113 = vst [vmem:[#allocation45_spill] sm:$0xff] %v5016_v18  ;;  %v5018_v27 = vld [vmem:[#allocation7 + $0x38] sm:$0xff]  ;;  %v5022_v36 = vld [vmem:[#allocation7 + $0x20] sm:$0xff] }
  0x89   :  { %310 = vmatprep.mubr.f32.mxu0 %v6890_v0  ;;  %423 = vmatprep.mubr.f32.mxu1 %v6890_v0  ;;  %7114 = vst [vmem:[#allocation46_spill] sm:$0xff] %v5018_v27  ;;  %7115 = vst [vmem:[#allocation47_spill] sm:$0xff] %v5022_v36 }
  0x8a   :  { %568 = vmatpush1.msra.mxu0 %v4912_v43  ;;  %639 = vmatpush1.msra.mxu1 %v4914_v44 }
  0x8b   :  { %3894 = vmatmul.mubr.msk.f32.gmra.mxu0 %vm197_vm0, %v163_v45  ;;  %3902 = vmatmul.mubr.msk.f32.gmra.mxu1 %vm197_vm0, %v163_v45  ;;  %v5024_v45 = vld [vmem:[#allocation7 + $0x30] sm:$0xff] }
  0x8c   :  { %569 = vmatprep.subr.mxu0 %v4923_v46  ;;  %640 = vmatprep.subr.mxu1 %v4925_v47  ;;  %7116 = vst [vmem:[#allocation48_spill] sm:$0xff] %v5024_v45 }
  0x8d   :  { %570 = vmatpush1.msra.mxu0 %v4929_v48  ;;  %641 = vmatpush1.msra.mxu1 %v4931_v49 }
  0x8e   :  { %571 = vmatprep.subr.mxu0 %v4935_v50  ;;  %642 = vmatprep.subr.mxu1 %v4937_v51 }
  0x8f   :  { %316 = vmatprep.mubr.f32.mxu0 %v6890_v0  ;;  %429 = vmatprep.mubr.f32.mxu1 %v6890_v0 }
  0x90   :  { %572 = vmatpush1.msra.mxu0 %v4943_v52  ;;  %643 = vmatpush1.msra.mxu1 %v4945_v53 }
  0x91   :  { %3895 = vmatmul.mubr.msk.f32.gmra.mxu0 %vm197_vm0, %v164_v54  ;;  %3903 = vmatmul.mubr.msk.f32.gmra.mxu1 %vm197_vm0, %v164_v54  ;;  %v5028_v54 = vld [vmem:[#allocation7 + $0x8] sm:$0xff] }
  0x92   :  { %573 = vmatprep.subr.mxu0 %v4954_v55  ;;  %644 = vmatprep.subr.mxu1 %v4956_v56  ;;  %7117 = vst [vmem:[#allocation49_spill] sm:$0xff] %v5028_v54 }
  0x93   :  { %574 = vmatpush1.msra.mxu0 %v4960_v57  ;;  %645 = vmatpush1.msra.mxu1 %v4962_v58 }
  0x94   :  { %575 = vmatprep.subr.mxu0 %v4966_v59  ;;  %646 = vmatprep.subr.mxu1 %v4968_v60 }
  0x95   :  { %322 = vmatprep.mubr.f32.mxu0 %v6890_v0  ;;  %435 = vmatprep.mubr.f32.mxu1 %v6890_v0 }
  0x96   :  { %576 = vmatpush1.msra.mxu0 %v4974_v61  ;;  %647 = vmatpush1.msra.mxu1 %v4976_v62 }
  0x97   :  { %3896 = vmatmul.mubr.msk.f32.gmra.mxu0 %vm197_vm0, %v165_v63  ;;  %3904 = vmatmul.mubr.msk.f32.gmra.mxu1 %vm197_vm0, %v165_v63  ;;  %v5030_v63 = vld [vmem:[#allocation7 + $0x18] sm:$0xff] }
  0x98   :  { %577 = vmatprep.subr.mxu0 %v4985_v1  ;;  %648 = vmatprep.subr.mxu1 %v4987_v2  ;;  %7118 = vst [vmem:[#allocation50_spill] sm:$0xff] %v5030_v63 }
  0x99   :  { %578 = vmatpush1.msra.mxu0 %v4991_v3  ;;  %649 = vmatpush1.msra.mxu1 %v4993_v4 }
  0x9a   :  { %579 = vmatprep.subr.mxu0 %v4997_v5  ;;  %650 = vmatprep.subr.mxu1 %v4999_v6 }
  0x9b   :  { %328 = vmatprep.mubr.f32.mxu0 %v6890_v0  ;;  %441 = vmatprep.mubr.f32.mxu1 %v6890_v0  ;;  %v5034_v0 = vld [vmem:[#allocation7] sm:$0xff] }
  0x9c   :  { %580 = vmatpush1.msra.mxu0 %v5005_v7  ;;  %651 = vmatpush1.msra.mxu1 %v5007_v8  ;;  %7119 = vst [vmem:[#allocation51_spill] sm:$0xff] %v5034_v0  ;;  %v5038_v8 = vld [vmem:[#allocation7 + $0x10] sm:$0xff]  ;;  %v7121_v7 = vmov 0.0  }
  0x9d   :  { %3897 = vmatmul.mubr.msk.f32.gmra.mxu0 %vm197_vm0, %v166_v9  ;;  %3905 = vmatmul.mubr.msk.f32.gmra.mxu1 %vm197_vm0, %v166_v9  ;;  %7120 = vst [vmem:[#allocation52_spill] sm:$0xff] %v5038_v8  ;;  %v544_v9 = vld [vmem:[#allocation15] sm:$0xff] }
  0x9e   :  { %581 = vmatprep.subr.mxu0 %v5016_v18  ;;  %652 = vmatprep.subr.mxu1 %v5018_v27 }
  0x9f   :  { %582 = vmatpush1.msra.mxu0 %v5022_v36  ;;  %653 = vmatpush1.msra.mxu1 %v5024_v45 }
  0xa0   :  { %583 = vmatprep.subr.mxu0 %v5028_v54  ;;  %654 = vmatprep.subr.mxu1 %v5030_v63 }
  0xa1   :  { %584 = vmatpush1.msra.mxu0 %v5034_v0  ;;  %617 = vmatprep.mubr.f32.mxu0 %v7121_v7 }
  0xa2   :  { %655 = vmatpush1.msra.mxu1 %v5038_v8  ;;  %688 = vmatprep.mubr.f32.mxu1 %v7121_v7 }
  0xa3   :  { %618 = vmatmul.mubr.f32.vlgmr.msra.gmra.mxu0 %v544_v9  ;;  %689 = vmatmul.mubr.f32.vlgmr.msra.gmra.mxu1 %v544_v9  ;;  %v7122_v9 = vld [vmem:[#allocation43_spill] sm:$0xff] }
  0xa4   :  { %727 = vmatprep.subr.mxu0 %v4801_v10  ;;  %798 = vmatprep.subr.mxu1 %v4803_v11 }
  0xa5   :  { %728 = vmatpush1.msra.mxu0 %v4805_v12  ;;  %799 = vmatpush1.msra.mxu1 %v4807_v13 }
  0xa6   :  { %729 = vmatprep.subr.mxu0 %v4811_v14  ;;  %800 = vmatprep.subr.mxu1 %v4813_v15 }
  0xa7   :  { %730 = vmatpush1.msra.mxu0 %v4819_v16  ;;  %801 = vmatpush1.msra.mxu1 %v4821_v17 }
  0xa8   :  { %731 = vmatprep.subr.mxu0 %v4830_v19  ;;  %802 = vmatprep.subr.mxu1 %v4832_v20 }
  0xa9   :  { %732 = vmatpush1.msra.mxu0 %v4836_v21  ;;  %803 = vmatpush1.msra.mxu1 %v4838_v22 }
  0xaa   :  { %733 = vmatprep.subr.mxu0 %v4842_v23  ;;  %804 = vmatprep.subr.mxu1 %v4844_v24 }
  0xab   :  { %734 = vmatpush1.msra.mxu0 %v4850_v25  ;;  %805 = vmatpush1.msra.mxu1 %v4852_v26 }
  0xac   :  { %735 = vmatprep.subr.mxu0 %v4861_v28  ;;  %806 = vmatprep.subr.mxu1 %v4863_v29 }
  0xad   :  { %736 = vmatpush1.msra.mxu0 %v4867_v30  ;;  %807 = vmatpush1.msra.mxu1 %v4869_v31 }
  0xae   :  { %737 = vmatprep.subr.mxu0 %v4873_v32  ;;  %808 = vmatprep.subr.mxu1 %v4875_v33 }
  0xaf   :  { %738 = vmatpush1.msra.mxu0 %v4881_v34  ;;  %809 = vmatpush1.msra.mxu1 %v4883_v35 }
  0xb0   :  { %739 = vmatprep.subr.mxu0 %v4892_v37  ;;  %810 = vmatprep.subr.mxu1 %v4894_v38 }
  0xb1   :  { %740 = vmatpush1.msra.mxu0 %v4898_v39  ;;  %811 = vmatpush1.msra.mxu1 %v4900_v40 }
  0xb2   :  { %741 = vmatprep.subr.mxu0 %v4904_v41  ;;  %812 = vmatprep.subr.mxu1 %v4906_v42 }
  0xb3   :  { %742 = vmatpush1.msra.mxu0 %v4912_v43  ;;  %813 = vmatpush1.msra.mxu1 %v4914_v44 }
  0xb4   :  { %743 = vmatprep.subr.mxu0 %v4923_v46  ;;  %814 = vmatprep.subr.mxu1 %v4925_v47 }
  0xb5   :  { %744 = vmatpush1.msra.mxu0 %v4929_v48  ;;  %815 = vmatpush1.msra.mxu1 %v4931_v49 }
  0xb6   :  { %745 = vmatprep.subr.mxu0 %v4935_v50  ;;  %816 = vmatprep.subr.mxu1 %v4937_v51 }
  0xb7   :  { %746 = vmatpush1.msra.mxu0 %v4943_v52  ;;  %817 = vmatpush1.msra.mxu1 %v4945_v53 }
  0xb8   :  { %747 = vmatprep.subr.mxu0 %v4954_v55  ;;  %818 = vmatprep.subr.mxu1 %v4956_v56 }
  0xb9   :  { %748 = vmatpush1.msra.mxu0 %v4960_v57  ;;  %819 = vmatpush1.msra.mxu1 %v4962_v58 }
  0xba   :  { %749 = vmatprep.subr.mxu0 %v4966_v59  ;;  %820 = vmatprep.subr.mxu1 %v4968_v60  ;;  %v7123_v59 = vld [vmem:[#allocation44_spill] sm:$0xff] }
  0xbb   :  { %750 = vmatpush1.msra.mxu0 %v4974_v61  ;;  %821 = vmatpush1.msra.mxu1 %v4976_v62 }
  0xbc   :  { %751 = vmatprep.subr.mxu0 %v4985_v1  ;;  %822 = vmatprep.subr.mxu1 %v4987_v2 }
  0xbd   :  { %752 = vmatpush1.msra.mxu0 %v4991_v3  ;;  %823 = vmatpush1.msra.mxu1 %v4993_v4 }
  0xbe   :  { %753 = vmatprep.subr.mxu0 %v4997_v5  ;;  %824 = vmatprep.subr.mxu1 %v4999_v6 }
  0xbf   :  { %754 = vmatpush1.msra.mxu0 %v7122_v9  ;;  %825 = vmatpush1.msra.mxu1 %v7123_v59 }
  0xc0   :  { %755 = vmatprep.subr.mxu0 %v5016_v18  ;;  %826 = vmatprep.subr.mxu1 %v5018_v27  ;;  %v177_v27 = vlaneseq  ;;  %v175_v18 = vld [vmem:[#allocation9] sm:$0xf] }
  0xc1   :  { %756 = vmatpush1.msra.mxu0 %v5022_v36  ;;  %827 = vmatpush1.msra.mxu1 %v5024_v45 }
  0xc2   :  { %757 = vmatprep.subr.mxu0 %v5028_v54  ;;  %828 = vmatprep.subr.mxu1 %v5030_v63  ;;  %v5114_v36 = vshrl.u32 %v177_v27, 7 }
  0xc3   :  { %758 = vmatpush1.msra.mxu0 %v5034_v0  ;;  %791 = vmatprep.mubr.f32.mxu0 %v7121_v7 }
  0xc4   :  { %829 = vmatpush1.msra.mxu1 %v5038_v8  ;;  %862 = vmatprep.mubr.f32.mxu1 %v7121_v7  ;;  %7124 = vst [vmem:[#allocation53_spill] sm:$0xff] %v5114_v36  ;;  %v6929_v63 = vsub.s32 0, %v5114_v36  ;;  %v6932_v0 = vsub.s32 2, %v5114_v36 }
  0xc5   :  { %902 = vmatprep.subr.mxu0 %v4801_v10  ;;  %973 = vmatprep.subr.mxu1 %v4803_v11  ;;  %v6939_v10 = vsub.s32 1, %v5114_v36  ;;  %v6940_v11 = vsub.s32 3, %v5114_v36 }
  0xc6   :  { %v180_v27 = vrot.slane %v175_v18, %v6929_v63  ;;  %v5132_v7 = vrot.slane %v175_v18, %v6932_v0 }
  0xc7   :  { %v184_v5 = vrot.slane %v175_v18, %v6939_v10  ;;  %v5138_v4 = vrot.slane %v175_v18, %v6940_v11 }
 0x133   :  { %v5116_v45 = vpop.f32.mrf.mxu0  ;;  %v5118_v54 = vpop.f32.mrf.mxu1 }
 0x135   :  { %v5122_v59 = vpop.f32.mrf.mxu0  ;;  %v5124_v8 = vpop.f32.mrf.mxu1 }
 0x139   :  { %v294_v9 = vpop.f32.mrf.mxu0  ;;  %v407_v6 = vpop.f32.mrf.mxu1 }
 0x13a   :  { %v5140_v3 = vadd.f32 %v294_v9, %v180_v27  ;;  %v5143_v2 = vadd.f32 %v407_v6, %v5132_v7 }
 0x13b   :  { %v296_v1 = vpop.f32.mrf.mxu0  ;;  %v409_v63 = vpop.f32.mrf.mxu1 }
 0x13c   :  { %7125 = vst [vmem:[#allocation54_spill] sm:$0xff] %v5143_v2  ;;  %v5145_v62 = vadd.f32 %v296_v1, %v184_v5  ;;  %v5148_v0 = vadd.f32 %v409_v63, %v5138_v4 }
 0x13e   :  { %7126 = vst [vmem:[#allocation55_spill] sm:$0xff] %v5145_v62  ;;  %7127 = vst [vmem:[#allocation56_spill] sm:$0xff] %v5148_v0 }
 0x13f   :  { %v300_v61 = vpop.f32.mrf.mxu0  ;;  %v413_v60 = vpop.f32.mrf.mxu1 }
 0x140   :  { %v5150_v58 = vadd.f32 %v300_v61, %v180_v27  ;;  %v5153_v10 = vadd.f32 %v413_v60, %v5132_v7 }
 0x141   :  { %v302_v18 = vpop.f32.mrf.mxu0  ;;  %v415_v9 = vpop.f32.mrf.mxu1 }
 0x142   :  { %7128 = vst [vmem:[#allocation57_spill] sm:$0xff] %v5150_v58  ;;  %7129 = vst [vmem:[#allocation58_spill] sm:$0xff] %v5153_v10  ;;  %v5155_v11 = vadd.f32 %v302_v18, %v184_v5  ;;  %v5158_v6 = vadd.f32 %v415_v9, %v5138_v4 }
 0x144   :  { %7130 = vst [vmem:[#allocation59_spill] sm:$0xff] %v5155_v11  ;;  %7131 = vst [vmem:[#allocation60_spill] sm:$0xff] %v5158_v6 }
 0x145   :  { %v306_v36 = vpop.f32.mrf.mxu0  ;;  %v419_v1 = vpop.f32.mrf.mxu1 }
 0x146   :  { %v5160_v2 = vadd.f32 %v306_v36, %v180_v27  ;;  %v5163_v63 = vadd.f32 %v419_v1, %v5132_v7 }
 0x147   :  { %v308_v0 = vpop.f32.mrf.mxu0  ;;  %v421_v61 = vpop.f32.mrf.mxu1 }
 0x148   :  { %7132 = vst [vmem:[#allocation61_spill] sm:$0xff] %v5160_v2  ;;  %7133 = vst [vmem:[#allocation62_spill] sm:$0xff] %v5163_v63  ;;  %v5165_v58 = vadd.f32 %v308_v0, %v184_v5  ;;  %v5168_v60 = vadd.f32 %v421_v61, %v5138_v4 }
 0x14a   :  { %7134 = vst [vmem:[#allocation63_spill] sm:$0xff] %v5165_v58  ;;  %7135 = vst [vmem:[#allocation64_spill] sm:$0xff] %v5168_v60 }
 0x14b   :  { %v312_v10 = vpop.f32.mrf.mxu0  ;;  %v425_v18 = vpop.f32.mrf.mxu1 }
 0x14c   :  { %v5170_v11 = vadd.f32 %v312_v10, %v180_v27  ;;  %v5173_v9 = vadd.f32 %v425_v18, %v5132_v7 }
 0x14d   :  { %v314_v6 = vpop.f32.mrf.mxu0  ;;  %v427_v36 = vpop.f32.mrf.mxu1 }
 0x14e   :  { %7136 = vst [vmem:[#allocation65_spill] sm:$0xff] %v5170_v11  ;;  %7137 = vst [vmem:[#allocation66_spill] sm:$0xff] %v5173_v9  ;;  %v5175_v2 = vadd.f32 %v314_v6, %v184_v5  ;;  %v5178_v1 = vadd.f32 %v427_v36, %v5138_v4 }
 0x150   :  { %7138 = vst [vmem:[#allocation67_spill] sm:$0xff] %v5175_v2  ;;  %7139 = vst [vmem:[#allocation68_spill] sm:$0xff] %v5178_v1 }
 0x151   :  { %v318_v63 = vpop.f32.mrf.mxu0  ;;  %v431_v0 = vpop.f32.mrf.mxu1 }
 0x152   :  { %v5180_v58 = vadd.f32 %v318_v63, %v180_v27  ;;  %v5183_v61 = vadd.f32 %v431_v0, %v5132_v7 }
 0x153   :  { %v320_v60 = vpop.f32.mrf.mxu0  ;;  %v433_v10 = vpop.f32.mrf.mxu1 }
 0x154   :  { %7140 = vst [vmem:[#allocation69_spill] sm:$0xff] %v5180_v58  ;;  %7141 = vst [vmem:[#allocation70_spill] sm:$0xff] %v5183_v61  ;;  %v5185_v11 = vadd.f32 %v320_v60, %v184_v5  ;;  %v5188_v18 = vadd.f32 %v433_v10, %v5138_v4 }
 0x156   :  { %7142 = vst [vmem:[#allocation71_spill] sm:$0xff] %v5185_v11  ;;  %7143 = vst [vmem:[#allocation72_spill] sm:$0xff] %v5188_v18 }
 0x157   :  { %v324_v9 = vpop.f32.mrf.mxu0  ;;  %v437_v6 = vpop.f32.mrf.mxu1 }
 0x158   :  { %v5190_v2 = vadd.f32 %v324_v9, %v180_v27  ;;  %v5193_v36 = vadd.f32 %v437_v6, %v5132_v7 }
 0x159   :  { %v326_v1 = vpop.f32.mrf.mxu0  ;;  %v439_v63 = vpop.f32.mrf.mxu1 }
 0x15a   :  { %7144 = vst [vmem:[#allocation73_spill] sm:$0xff] %v5190_v2  ;;  %7145 = vst [vmem:[#allocation74_spill] sm:$0xff] %v5193_v36  ;;  %v5195_v58 = vadd.f32 %v326_v1, %v184_v5  ;;  %v5198_v0 = vadd.f32 %v439_v63, %v5138_v4  ;;  %v289_v1 = vadd.f32 %v5116_v45, %v180_v27 }
 0x15b   :  { %v291_v63 = vadd.f32 %v5122_v59, %v184_v5 }
 0x15c   :  { %7146 = vst [vmem:[#allocation75_spill] sm:$0xff] %v5195_v58  ;;  %7147 = vst [vmem:[#allocation76_spill] sm:$0xff] %v5198_v0 }
 0x15d   :  { %v330_v61 = vpop.f32.mrf.mxu0  ;;  %v443_v60 = vpop.f32.mrf.mxu1 }
 0x15e   :  { %v5200_v11 = vadd.f32 %v330_v61, %v180_v27  ;;  %v5203_v10 = vadd.f32 %v443_v60, %v5132_v7 }
 0x15f   :  { %v332_v18 = vpop.f32.mrf.mxu0  ;;  %v445_v9 = vpop.f32.mrf.mxu1 }
 0x160   :  { %7148 = vst [vmem:[#allocation77_spill] sm:$0xff] %v5200_v11  ;;  %7149 = vst [vmem:[#allocation78_spill] sm:$0xff] %v5203_v10  ;;  %v5205_v2 = vadd.f32 %v332_v18, %v184_v5  ;;  %v5208_v6 = vadd.f32 %v445_v9, %v5138_v4  ;;  %v402_v18 = vadd.f32 %v5118_v54, %v5132_v7 }
 0x161   :  { %v404_v9 = vadd.f32 %v5124_v8, %v5138_v4 }
 0x162   :  { %7150 = vst [vmem:[#allocation79_spill] sm:$0xff] %v5205_v2  ;;  %7151 = vst [vmem:[#allocation80_spill] sm:$0xff] %v5208_v6 }
 0x163   :  { %v619_v36 = vpop.f32.mrf.mxu0  ;;  %v690_v60 = vpop.f32.mrf.mxu1 }
 0x164   :  { %v620_v0 = vadd.f32 %v619_v36, %v289_v1  ;;  %v691_v10 = vadd.f32 %v690_v60, %v402_v18  ;;  %v545_v36 = vld [vmem:[#allocation16] sm:$0xff] }
 0x165   :  { %v621_v58 = vpop.f32.mrf.mxu0  ;;  %v692_v2 = vpop.f32.mrf.mxu1  ;;  %v7155_v60 = vld [vmem:[#allocation34_spill] sm:$0xff]  ;;  %v7156_v18 = vld [vmem:[#allocation35_spill] sm:$0xff] }
 0x166   :  { %v3906_v62 = vmul.f32 -1.442695, %v620_v0  ;;  %v622_v61 = vadd.f32 %v621_v58, %v291_v63  ;;  %v3908_v45 = vmul.f32 -1.442695, %v691_v10  ;;  %v693_v6 = vadd.f32 %v692_v2, %v404_v9  ;;  %v7153_v10 = vld [vmem:[#allocation32_spill] sm:$0xff] }
 0x167   :  { %v7157_v9 = vld [vmem:[#allocation36_spill] sm:$0xff] }
 0x168   :  { %4025 = vpow2.f32 %v3906_v62  ;;  %v3907_v11 = vmul.f32 -1.442695, %v622_v61 }
 0x16a   :  { %4027 = vpow2.f32 %v3907_v11 }
 0x16b   :  { %4029 = vpow2.f32 %v3908_v45  ;;  %v7158_v45 = vld [vmem:[#allocation37_spill] sm:$0xff] }
 0x175   :  { %v4026_v27 = vpop.eup %4025 }
 0x176   :  { %v704_v59 = vadd.f32 1.0, %v4026_v27  ;;  %v7159_v27 = vld [vmem:[#allocation38_spill] sm:$0xff] }
 0x177   :  { %v4028_v5 = vpop.eup %4027 }
 0x178   :  { %4031 = vrcp.f32 %v704_v59  ;;  %v705_v58 = vadd.f32 1.0, %v4028_v5  ;;  %v4030_v11 = vpop.eup %4029  ;;  %v7160_v59 = vld [vmem:[#allocation39_spill] sm:$0xff]  ;;  %v7161_v5 = vld [vmem:[#allocation40_spill] sm:$0xff] }
 0x179   :  { %4033 = vtanh.f32 %v693_v6  ;;  %v706_v54 = vadd.f32 1.0, %v4030_v11  ;;  %v7154_v6 = vld [vmem:[#allocation33_spill] sm:$0xff]  ;;  %v7163_v11 = vld [vmem:[#allocation42_spill] sm:$0xff] }
 0x17a   :  { %4035 = vrcp.f32 %v705_v58  ;;  %v7162_v58 = vld [vmem:[#allocation41_spill] sm:$0xff] }
 0x17b   :  { %4037 = vrcp.f32 %v706_v54  ;;  %v7168_v54 = vld [vmem:[#allocation47_spill] sm:$0xff] }
 0x185   :  { %v4032_v62 = vpop.eup %4031 }
 0x186   :  { %v4034_v0 = vpop.eup %4033 }
 0x187   :  { %v4036_v7 = vpop.eup %4035  ;;  %v715_v63 = vmul.f32 %v4034_v0, %v4032_v62  ;;  %v7164_v62 = vld [vmem:[#allocation43_spill] sm:$0xff]  ;;  %v7166_v0 = vld [vmem:[#allocation45_spill] sm:$0xff] }
 0x188   :  { %v714_v1 = vmul.f32 %v4036_v7, %v545_v36  ;;  %v4038_v2 = vpop.eup %4037  ;;  %v7165_v36 = vld [vmem:[#allocation44_spill] sm:$0xff]  ;;  %v7167_v7 = vld [vmem:[#allocation46_spill] sm:$0xff] }
 0x18a   :  { %v5216_v61 = vadd.f32 %v715_v63, %v714_v1  ;;  %v7169_v1 = vld [vmem:[#allocation48_spill] sm:$0xff]  ;;  %v7170_v63 = vld [vmem:[#allocation49_spill] sm:$0xff] }
 0x18c   :  { %4039 = vtanh.f32 %v5216_v61 }
 0x199   :  { %v4040_v4 = vpop.eup %4039 }
 0x19a   :  { %v5219_v8 = vmul.f32 %v4040_v4, %v4038_v2  ;;  %v7171_v2 = vld [vmem:[#allocation50_spill] sm:$0xff]  ;;  %v7172_v4 = vld [vmem:[#allocation51_spill] sm:$0xff] }
 0x19c   :  { %7152 = vst [vmem:[#allocation81_spill] sm:$0xff] %v5219_v8  ;;  %792 = vmatmul.mubr.f32.vlgmr.msra.gmra.mxu0 %v5219_v8  ;;  %863 = vmatmul.mubr.f32.vlgmr.msra.gmra.mxu1 %v5219_v8  ;;  %v7173_v8 = vmov 0.0  }
 0x19d   :  { %903 = vmatpush1.msra.mxu0 %v4805_v12  ;;  %974 = vmatpush1.msra.mxu1 %v4807_v13 }
 0x19e   :  { %904 = vmatprep.subr.mxu0 %v4811_v14  ;;  %975 = vmatprep.subr.mxu1 %v4813_v15 }
 0x19f   :  { %905 = vmatpush1.msra.mxu0 %v4819_v16  ;;  %976 = vmatpush1.msra.mxu1 %v4821_v17 }
 0x1a0   :  { %906 = vmatprep.subr.mxu0 %v4830_v19  ;;  %977 = vmatprep.subr.mxu1 %v4832_v20 }
 0x1a1   :  { %907 = vmatpush1.msra.mxu0 %v4836_v21  ;;  %978 = vmatpush1.msra.mxu1 %v4838_v22 }
 0x1a2   :  { %908 = vmatprep.subr.mxu0 %v4842_v23  ;;  %979 = vmatprep.subr.mxu1 %v4844_v24 }
 0x1a3   :  { %909 = vmatpush1.msra.mxu0 %v4850_v25  ;;  %980 = vmatpush1.msra.mxu1 %v4852_v26 }
 0x1a4   :  { %910 = vmatprep.subr.mxu0 %v4861_v28  ;;  %981 = vmatprep.subr.mxu1 %v4863_v29 }
 0x1a5   :  { %911 = vmatpush1.msra.mxu0 %v4867_v30  ;;  %982 = vmatpush1.msra.mxu1 %v4869_v31 }
 0x1a6   :  { %912 = vmatprep.subr.mxu0 %v4873_v32  ;;  %983 = vmatprep.subr.mxu1 %v4875_v33 }
 0x1a7   :  { %913 = vmatpush1.msra.mxu0 %v4881_v34  ;;  %984 = vmatpush1.msra.mxu1 %v4883_v35 }
 0x1a8   :  { %914 = vmatprep.subr.mxu0 %v4892_v37  ;;  %985 = vmatprep.subr.mxu1 %v4894_v38 }
 0x1a9   :  { %915 = vmatpush1.msra.mxu0 %v4898_v39  ;;  %986 = vmatpush1.msra.mxu1 %v4900_v40 }
 0x1aa   :  { %916 = vmatprep.subr.mxu0 %v4904_v41  ;;  %987 = vmatprep.subr.mxu1 %v4906_v42 }
 0x1ab   :  { %917 = vmatpush1.msra.mxu0 %v4912_v43  ;;  %988 = vmatpush1.msra.mxu1 %v4914_v44 }
 0x1ac   :  { %918 = vmatprep.subr.mxu0 %v4923_v46  ;;  %989 = vmatprep.subr.mxu1 %v4925_v47 }
 0x1ad   :  { %919 = vmatpush1.msra.mxu0 %v4929_v48  ;;  %990 = vmatpush1.msra.mxu1 %v4931_v49 }
 0x1ae   :  { %920 = vmatprep.subr.mxu0 %v4935_v50  ;;  %991 = vmatprep.subr.mxu1 %v4937_v51 }
 0x1af   :  { %921 = vmatpush1.msra.mxu0 %v4943_v52  ;;  %992 = vmatpush1.msra.mxu1 %v4945_v53 }
 0x1b0   :  { %922 = vmatprep.subr.mxu0 %v4954_v55  ;;  %993 = vmatprep.subr.mxu1 %v4956_v56 }
 0x1b1   :  { %923 = vmatpush1.msra.mxu0 %v4960_v57  ;;  %994 = vmatpush1.msra.mxu1 %v7153_v10 }
 0x1b2   :  { %924 = vmatprep.subr.mxu0 %v7154_v6  ;;  %995 = vmatprep.subr.mxu1 %v7155_v60 }
 0x1b3   :  { %925 = vmatpush1.msra.mxu0 %v7156_v18  ;;  %996 = vmatpush1.msra.mxu1 %v7157_v9 }
 0x1b4   :  { %926 = vmatprep.subr.mxu0 %v7158_v45  ;;  %997 = vmatprep.subr.mxu1 %v7159_v27 }
 0x1b5   :  { %927 = vmatpush1.msra.mxu0 %v7160_v59  ;;  %998 = vmatpush1.msra.mxu1 %v7161_v5  ;;  %v7178_v5 = vld [vmem:[#allocation54_spill] sm:$0xff] }
 0x1b6   :  { %928 = vmatprep.subr.mxu0 %v7162_v58  ;;  %999 = vmatprep.subr.mxu1 %v7163_v11  ;;  %v7174_v11 = vld [vmem:[#allocation52_spill] sm:$0xff] }
 0x1b7   :  { %929 = vmatpush1.msra.mxu0 %v7164_v62  ;;  %1000 = vmatpush1.msra.mxu1 %v7165_v36  ;;  %v7175_v36 = vld [vmem:[#allocation30_spill] sm:$0xff] }
 0x1b8   :  { %930 = vmatprep.subr.mxu0 %v7166_v0  ;;  %1001 = vmatprep.subr.mxu1 %v7167_v7  ;;  %v7176_v0 = vld [vmem:[#allocation31_spill] sm:$0xff] }
 0x1b9   :  { %931 = vmatpush1.msra.mxu0 %v7168_v54  ;;  %1002 = vmatpush1.msra.mxu1 %v7169_v1 }
 0x1ba   :  { %932 = vmatprep.subr.mxu0 %v7170_v63  ;;  %1003 = vmatprep.subr.mxu1 %v7171_v2  ;;  %v7177_v63 = vld [vmem:[#allocation55_spill] sm:$0xff] }
 0x1bb   :  { %933 = vmatpush1.msra.mxu0 %v7172_v4  ;;  %966 = vmatprep.mubr.f32.mxu0 %v7173_v8 }
 0x1bc   :  { %1004 = vmatpush1.msra.mxu1 %v7174_v11  ;;  %1037 = vmatprep.mubr.f32.mxu1 %v7173_v8  ;;  %v7179_v8 = vld [vmem:[#allocation56_spill] sm:$0xff] }
 0x1bd   :  { %1077 = vmatprep.subr.mxu0 %v7175_v36  ;;  %1148 = vmatprep.subr.mxu1 %v7176_v0 }
 0x25c   :  { %v793_v7 = vpop.f32.mrf.mxu0  ;;  %v864_v4 = vpop.f32.mrf.mxu1 }
 0x25d   :  { %v794_v54 = vadd.f32 %v793_v7, %v5140_v3  ;;  %v865_v59 = vadd.f32 %v864_v4, %v7178_v5 }
 0x25e   :  { %v795_v1 = vpop.f32.mrf.mxu0  ;;  %v866_v11 = vpop.f32.mrf.mxu1 }
 0x25f   :  { %v3909_v62 = vmul.f32 -1.442695, %v794_v54  ;;  %v796_v58 = vadd.f32 %v795_v1, %v7177_v63  ;;  %v3911_v27 = vmul.f32 -1.442695, %v865_v59  ;;  %v867_v45 = vadd.f32 %v866_v11, %v7179_v8  ;;  %v7203_v11 = vld [vmem:[#allocation58_spill] sm:$0xff] }
 0x261   :  { %4041 = vpow2.f32 %v3909_v62  ;;  %v3910_v2 = vmul.f32 -1.442695, %v796_v58 }
 0x263   :  { %4043 = vpow2.f32 %v3910_v2 }
 0x264   :  { %4045 = vpow2.f32 %v3911_v27 }
 0x265   :  { %4047 = vtanh.f32 %v867_v45 }
 0x26e   :  { %v4042_v36 = vpop.eup %4041 }
 0x26f   :  { %v878_v9 = vadd.f32 1.0, %v4042_v36 }
 0x270   :  { %v4044_v0 = vpop.eup %4043 }
 0x271   :  { %4049 = vrcp.f32 %v878_v9  ;;  %v879_v3 = vadd.f32 1.0, %v4044_v0  ;;  %v4046_v7 = vpop.eup %4045 }
 0x272   :  { %v4048_v54 = vpop.eup %4047  ;;  %v880_v63 = vadd.f32 1.0, %v4046_v7 }
 0x273   :  { %4051 = vrcp.f32 %v879_v3  ;;  %v7204_v3 = vld [vmem:[#allocation60_spill] sm:$0xff] }
 0x274   :  { %4053 = vrcp.f32 %v880_v63 }
 0x27e   :  { %v4050_v62 = vpop.eup %4049 }
 0x27f   :  { %v889_v58 = vmul.f32 %v4050_v62, %v4048_v54 }
 0x280   :  { %v4052_v1 = vpop.eup %4051 }
 0x281   :  { %v888_v5 = vmul.f32 %v4052_v1, %v5216_v61  ;;  %v4054_v8 = vpop.eup %4053 }
 0x283   :  { %v5294_v2 = vadd.f32 %v889_v58, %v888_v5 }
 0x285   :  { %4055 = vtanh.f32 %v5294_v2 }
 0x292   :  { %v4056_v27 = vpop.eup %4055 }
 0x293   :  { %v5297_v59 = vmul.f32 %v4056_v27, %v4054_v8 }
 0x295   :  { %7180 = vst [vmem:[#allocation32_spill] sm:$0xff] %v5297_v59  ;;  %967 = vmatmul.mubr.f32.vlgmr.msra.gmra.mxu0 %v5297_v59  ;;  %1038 = vmatmul.mubr.f32.vlgmr.msra.gmra.mxu1 %v5297_v59  ;;  %v5452_v59 = vld [vmem:[#allocation7 + $0x138] sm:$0xff] }
 0x296   :  { %1078 = vmatpush1.msra.mxu0 %v4805_v12  ;;  %1149 = vmatpush1.msra.mxu1 %v4807_v13  ;;  %v7181_v12 = vld [vmem:[#allocation36_spill] sm:$0xff]  ;;  %v7182_v13 = vld [vmem:[#allocation37_spill] sm:$0xff] }
 0x297   :  { %1079 = vmatprep.subr.mxu0 %v4811_v14  ;;  %1150 = vmatprep.subr.mxu1 %v4813_v15  ;;  %v7183_v14 = vld [vmem:[#allocation38_spill] sm:$0xff]  ;;  %v7184_v15 = vld [vmem:[#allocation39_spill] sm:$0xff] }
 0x298   :  { %1080 = vmatpush1.msra.mxu0 %v4819_v16  ;;  %1151 = vmatpush1.msra.mxu1 %v4821_v17  ;;  %v7185_v16 = vld [vmem:[#allocation40_spill] sm:$0xff]  ;;  %v7186_v17 = vld [vmem:[#allocation41_spill] sm:$0xff] }
 0x299   :  { %1081 = vmatprep.subr.mxu0 %v4830_v19  ;;  %1152 = vmatprep.subr.mxu1 %v4832_v20  ;;  %v7187_v19 = vld [vmem:[#allocation42_spill] sm:$0xff]  ;;  %v7188_v20 = vld [vmem:[#allocation43_spill] sm:$0xff] }
 0x29a   :  { %1082 = vmatpush1.msra.mxu0 %v4836_v21  ;;  %1153 = vmatpush1.msra.mxu1 %v4838_v22  ;;  %v7189_v21 = vld [vmem:[#allocation44_spill] sm:$0xff]  ;;  %v7190_v22 = vld [vmem:[#allocation45_spill] sm:$0xff] }
 0x29b   :  { %1083 = vmatprep.subr.mxu0 %v4842_v23  ;;  %1154 = vmatprep.subr.mxu1 %v4844_v24  ;;  %v7191_v23 = vld [vmem:[#allocation46_spill] sm:$0xff]  ;;  %v7192_v24 = vld [vmem:[#allocation47_spill] sm:$0xff] }
 0x29c   :  { %1084 = vmatpush1.msra.mxu0 %v4850_v25  ;;  %1155 = vmatpush1.msra.mxu1 %v4852_v26  ;;  %v7193_v25 = vld [vmem:[#allocation48_spill] sm:$0xff]  ;;  %v7194_v26 = vld [vmem:[#allocation49_spill] sm:$0xff] }
 0x29d   :  { %1085 = vmatprep.subr.mxu0 %v4861_v28  ;;  %1156 = vmatprep.subr.mxu1 %v4863_v29  ;;  %v7195_v28 = vld [vmem:[#allocation50_spill] sm:$0xff]  ;;  %v7196_v29 = vld [vmem:[#allocation51_spill] sm:$0xff] }
 0x29e   :  { %1086 = vmatpush1.msra.mxu0 %v4867_v30  ;;  %1157 = vmatpush1.msra.mxu1 %v4869_v31  ;;  %v7197_v30 = vmov 0.0   ;;  %v7198_v31 = vld [vmem:[#allocation52_spill] sm:$0xff] }
 0x29f   :  { %1087 = vmatprep.subr.mxu0 %v4873_v32  ;;  %1158 = vmatprep.subr.mxu1 %v4875_v33  ;;  %v5365_v32 = vld [vmem:[#allocation7 + $0x1e8] sm:$0xff]  ;;  %v5368_v33 = vld [vmem:[#allocation7 + $0x1f8] sm:$0xff] }
 0x2a0   :  { %1088 = vmatpush1.msra.mxu0 %v4881_v34  ;;  %1159 = vmatpush1.msra.mxu1 %v4883_v35  ;;  %7199 = vst [vmem:[#allocation33_spill] sm:$0xff] %v5365_v32  ;;  %7200 = vst [vmem:[#allocation34_spill] sm:$0xff] %v5368_v33  ;;  %v7201_v35 = vld [vmem:[#allocation57_spill] sm:$0xff] }
 0x2a1   :  { %1089 = vmatprep.subr.mxu0 %v4892_v37  ;;  %1160 = vmatprep.subr.mxu1 %v4894_v38 }
 0x2a2   :  { %1090 = vmatpush1.msra.mxu0 %v4898_v39  ;;  %1161 = vmatpush1.msra.mxu1 %v4900_v40  ;;  %v7202_v40 = vld [vmem:[#allocation59_spill] sm:$0xff] }
 0x2a3   :  { %1091 = vmatprep.subr.mxu0 %v4904_v41  ;;  %1162 = vmatprep.subr.mxu1 %v4906_v42 }
 0x2a4   :  { %1092 = vmatpush1.msra.mxu0 %v4912_v43  ;;  %1163 = vmatpush1.msra.mxu1 %v4914_v44 }
 0x2a5   :  { %1093 = vmatprep.subr.mxu0 %v4923_v46  ;;  %1164 = vmatprep.subr.mxu1 %v4925_v47 }
 0x2a6   :  { %1094 = vmatpush1.msra.mxu0 %v4929_v48  ;;  %1165 = vmatpush1.msra.mxu1 %v4931_v49 }
 0x2a7   :  { %1095 = vmatprep.subr.mxu0 %v4935_v50  ;;  %1166 = vmatprep.subr.mxu1 %v4937_v51 }
 0x2a8   :  { %1096 = vmatpush1.msra.mxu0 %v4943_v52  ;;  %1167 = vmatpush1.msra.mxu1 %v4945_v53 }
 0x2a9   :  { %1097 = vmatprep.subr.mxu0 %v4954_v55  ;;  %1168 = vmatprep.subr.mxu1 %v4956_v56 }
 0x2aa   :  { %1098 = vmatpush1.msra.mxu0 %v4960_v57  ;;  %1169 = vmatpush1.msra.mxu1 %v7153_v10 }
 0x2ab   :  { %1099 = vmatprep.subr.mxu0 %v7154_v6  ;;  %1170 = vmatprep.subr.mxu1 %v7155_v60 }
 0x2ac   :  { %1100 = vmatpush1.msra.mxu0 %v7156_v18  ;;  %1171 = vmatpush1.msra.mxu1 %v7181_v12 }
 0x2ad   :  { %1101 = vmatprep.subr.mxu0 %v7182_v13  ;;  %1172 = vmatprep.subr.mxu1 %v7183_v14 }
 0x2ae   :  { %1102 = vmatpush1.msra.mxu0 %v7184_v15  ;;  %1173 = vmatpush1.msra.mxu1 %v7185_v16 }
 0x2af   :  { %1103 = vmatprep.subr.mxu0 %v7186_v17  ;;  %1174 = vmatprep.subr.mxu1 %v7187_v19 }
 0x2b0   :  { %1104 = vmatpush1.msra.mxu0 %v7188_v20  ;;  %1175 = vmatpush1.msra.mxu1 %v7189_v21 }
 0x2b1   :  { %1105 = vmatprep.subr.mxu0 %v7190_v22  ;;  %1176 = vmatprep.subr.mxu1 %v7191_v23 }
 0x2b2   :  { %1106 = vmatpush1.msra.mxu0 %v7192_v24  ;;  %1177 = vmatpush1.msra.mxu1 %v7193_v25 }
 0x2b3   :  { %1107 = vmatprep.subr.mxu0 %v7194_v26  ;;  %1178 = vmatprep.subr.mxu1 %v7195_v28 }
 0x2b4   :  { %1108 = vmatpush1.msra.mxu0 %v7196_v29  ;;  %1141 = vmatprep.mubr.f32.mxu0 %v7197_v30 }
 0x2b5   :  { %1179 = vmatpush1.msra.mxu1 %v7198_v31  ;;  %1212 = vmatprep.mubr.f32.mxu1 %v7197_v30 }
 0x2b6   :  { %1252 = vmatprep.subr.mxu0 %v5365_v32  ;;  %1323 = vmatprep.subr.mxu1 %v5368_v33 }
 0x355   :  { %v968_v34 = vpop.f32.mrf.mxu0  ;;  %v1039_v45 = vpop.f32.mrf.mxu1 }
 0x356   :  { %v969_v37 = vadd.f32 %v968_v34, %v7201_v35  ;;  %v1040_v4 = vadd.f32 %v1039_v45, %v7203_v11  ;;  %v5386_v45 = vld [vmem:[#allocation7 + $0x1f0] sm:$0xff]  ;;  %v5392_v11 = vld [vmem:[#allocation7 + $0x1d8] sm:$0xff] }
 0x357   :  { %v970_v38 = vpop.f32.mrf.mxu0  ;;  %v1041_v36 = vpop.f32.mrf.mxu1 }
 0x358   :  { %v3912_v39 = vmul.f32 -1.442695, %v969_v37  ;;  %v971_v61 = vadd.f32 %v970_v38, %v7202_v40  ;;  %v3914_v0 = vmul.f32 -1.442695, %v1040_v4  ;;  %v1042_v7 = vadd.f32 %v1041_v36, %v7204_v3  ;;  %v5395_v4 = vld [vmem:[#allocation7 + $0x1c0] sm:$0xff]  ;;  %v5398_v36 = vld [vmem:[#allocation7 + $0x1d0] sm:$0xff] }
 0x359   :  { %v5404_v3 = vld [vmem:[#allocation7 + $0x1b8] sm:$0xff] }
 0x35a   :  { %4057 = vpow2.f32 %v3912_v39  ;;  %v3913_v9 = vmul.f32 -1.442695, %v971_v61 }
 0x35c   :  { %4059 = vpow2.f32 %v3913_v9  ;;  %v5383_v9 = vld [vmem:[#allocation7 + $0x1e0] sm:$0xff] }
 0x35d   :  { %4061 = vpow2.f32 %v3914_v0  ;;  %v5401_v0 = vld [vmem:[#allocation7 + $0x1a8] sm:$0xff] }
 0x35e   :  { %4063 = vtanh.f32 %v1042_v7  ;;  %v5407_v7 = vld [vmem:[#allocation7 + $0x1a0] sm:$0xff] }
 0x367   :  { %v4058_v54 = vpop.eup %4057 }
 0x368   :  { %v1053_v62 = vadd.f32 1.0, %v4058_v54  ;;  %v5410_v54 = vld [vmem:[#allocation7 + $0x1b0] sm:$0xff] }
 0x369   :  { %v4060_v58 = vpop.eup %4059 }
 0x36a   :  { %4065 = vrcp.f32 %v1053_v62  ;;  %v1054_v1 = vadd.f32 1.0, %v4060_v58  ;;  %v4062_v63 = vpop.eup %4061  ;;  %v5413_v62 = vld [vmem:[#allocation7 + $0x188] sm:$0xff]  ;;  %v5416_v58 = vld [vmem:[#allocation7 + $0x198] sm:$0xff] }
 0x36b   :  { %v4064_v5 = vpop.eup %4063  ;;  %v1055_v35 = vadd.f32 1.0, %v4062_v63  ;;  %v5422_v63 = vld [vmem:[#allocation7 + $0x190] sm:$0xff] }
 0x36c   :  { %4067 = vrcp.f32 %v1054_v1  ;;  %v5419_v1 = vld [vmem:[#allocation7 + $0x180] sm:$0xff] }
 0x36d   :  { %4069 = vrcp.f32 %v1055_v35  ;;  %v5437_v35 = vld [vmem:[#allocation7 + $0x148] sm:$0xff] }
 0x36e   :  { %7206 = vst [vmem:[#allocation30_spill] sm:$0xff] %v5437_v35 }
 0x377   :  { %v4066_v8 = vpop.eup %4065 }
 0x378   :  { %v1064_v27 = vmul.f32 %v4066_v8, %v4064_v5  ;;  %v5425_v5 = vld [vmem:[#allocation7 + $0x168] sm:$0xff]  ;;  %v5428_v8 = vld [vmem:[#allocation7 + $0x178] sm:$0xff] }
 0x379   :  { %v4068_v34 = vpop.eup %4067 }
 0x37a   :  { %v1063_v37 = vmul.f32 %v4068_v34, %v5294_v2  ;;  %v4070_v39 = vpop.eup %4069  ;;  %v5389_v2 = vld [vmem:[#allocation7 + $0x1c8] sm:$0xff]  ;;  %v5434_v34 = vld [vmem:[#allocation7 + $0x170] sm:$0xff] }
 0x37c   :  { %v5376_v38 = vadd.f32 %v1064_v27, %v1063_v37  ;;  %v5431_v27 = vld [vmem:[#allocation7 + $0x160] sm:$0xff]  ;;  %v5440_v37 = vld [vmem:[#allocation7 + $0x158] sm:$0xff] }
 0x37d   :  { %7207 = vst [vmem:[#allocation31_spill] sm:$0xff] %v5440_v37 }
 0x37e   :  { %4071 = vtanh.f32 %v5376_v38 }
 0x38b   :  { %v4072_v40 = vpop.eup %4071 }
 0x38c   :  { %v5379_v61 = vmul.f32 %v4072_v40, %v4070_v39  ;;  %v5443_v39 = vld [vmem:[#allocation7 + $0x140] sm:$0xff]  ;;  %v5446_v40 = vld [vmem:[#allocation7 + $0x150] sm:$0xff] }
 0x38e   :  { %7205 = vst [vmem:[#allocation35_spill] sm:$0xff] %v5379_v61  ;;  %1142 = vmatmul.mubr.f32.vlgmr.msra.gmra.mxu0 %v5379_v61  ;;  %1213 = vmatmul.mubr.f32.vlgmr.msra.gmra.mxu1 %v5379_v61  ;;  %v5449_v61 = vld [vmem:[#allocation7 + $0x128] sm:$0xff] }
 0x38f   :  { %1253 = vmatpush1.msra.mxu0 %v5383_v9  ;;  %1324 = vmatpush1.msra.mxu1 %v5386_v45 }
 0x390   :  { %1254 = vmatprep.subr.mxu0 %v5389_v2  ;;  %1325 = vmatprep.subr.mxu1 %v5392_v11 }
 0x391   :  { %1255 = vmatpush1.msra.mxu0 %v5395_v4  ;;  %1326 = vmatpush1.msra.mxu1 %v5398_v36 }
 0x392   :  { %1256 = vmatprep.subr.mxu0 %v5401_v0  ;;  %1327 = vmatprep.subr.mxu1 %v5404_v3 }
 0x393   :  { %1257 = vmatpush1.msra.mxu0 %v5407_v7  ;;  %1328 = vmatpush1.msra.mxu1 %v5410_v54 }
 0x394   :  { %1258 = vmatprep.subr.mxu0 %v5413_v62  ;;  %1329 = vmatprep.subr.mxu1 %v5416_v58 }
 0x395   :  { %1259 = vmatpush1.msra.mxu0 %v5419_v1  ;;  %1330 = vmatpush1.msra.mxu1 %v5422_v63 }
 0x396   :  { %1260 = vmatprep.subr.mxu0 %v5425_v5  ;;  %1331 = vmatprep.subr.mxu1 %v5428_v8 }
 0x397   :  { %1261 = vmatpush1.msra.mxu0 %v5431_v27  ;;  %1332 = vmatpush1.msra.mxu1 %v5434_v34 }
 0x398   :  { %1262 = vmatprep.subr.mxu0 %v5437_v35  ;;  %1333 = vmatprep.subr.mxu1 %v5440_v37  ;;  %v5455_v35 = vld [vmem:[#allocation7 + $0x120] sm:$0xff]  ;;  %v5458_v37 = vld [vmem:[#allocation7 + $0x130] sm:$0xff] }
 0x399   :  { %1263 = vmatpush1.msra.mxu0 %v5443_v39  ;;  %1334 = vmatpush1.msra.mxu1 %v5446_v40 }
 0x39a   :  { %1264 = vmatprep.subr.mxu0 %v5449_v61  ;;  %1335 = vmatprep.subr.mxu1 %v5452_v59 }
 0x39b   :  { %1265 = vmatpush1.msra.mxu0 %v5455_v35  ;;  %1336 = vmatpush1.msra.mxu1 %v5458_v37 }
 0x39c   :  { %1266 = vmatprep.subr.mxu0 %v4904_v41  ;;  %1337 = vmatprep.subr.mxu1 %v4906_v42  ;;  %v7208_v42 = vld [vmem:[#allocation61_spill] sm:$0xff] }
 0x39d   :  { %1267 = vmatpush1.msra.mxu0 %v4912_v43  ;;  %1338 = vmatpush1.msra.mxu1 %v4914_v44 }
 0x39e   :  { %1268 = vmatprep.subr.mxu0 %v4923_v46  ;;  %1339 = vmatprep.subr.mxu1 %v4925_v47  ;;  %v7209_v47 = vld [vmem:[#allocation63_spill] sm:$0xff] }
 0x39f   :  { %1269 = vmatpush1.msra.mxu0 %v4929_v48  ;;  %1340 = vmatpush1.msra.mxu1 %v4931_v49 }
 0x3a0   :  { %1270 = vmatprep.subr.mxu0 %v4935_v50  ;;  %1341 = vmatprep.subr.mxu1 %v4937_v51  ;;  %v7210_v51 = vld [vmem:[#allocation62_spill] sm:$0xff] }
 0x3a1   :  { %1271 = vmatpush1.msra.mxu0 %v4943_v52  ;;  %1342 = vmatpush1.msra.mxu1 %v4945_v53 }
 0x3a2   :  { %1272 = vmatprep.subr.mxu0 %v4954_v55  ;;  %1343 = vmatprep.subr.mxu1 %v4956_v56  ;;  %v7211_v56 = vld [vmem:[#allocation64_spill] sm:$0xff] }
 0x3a3   :  { %1273 = vmatpush1.msra.mxu0 %v4960_v57  ;;  %1344 = vmatpush1.msra.mxu1 %v7153_v10 }
 0x3a4   :  { %1274 = vmatprep.subr.mxu0 %v7154_v6  ;;  %1345 = vmatprep.subr.mxu1 %v7155_v60 }
 0x3a5   :  { %1275 = vmatpush1.msra.mxu0 %v7156_v18  ;;  %1346 = vmatpush1.msra.mxu1 %v7181_v12 }
 0x3a6   :  { %1276 = vmatprep.subr.mxu0 %v7182_v13  ;;  %1347 = vmatprep.subr.mxu1 %v7183_v14 }
 0x3a7   :  { %1277 = vmatpush1.msra.mxu0 %v7184_v15  ;;  %1348 = vmatpush1.msra.mxu1 %v7185_v16 }
 0x3a8   :  { %1278 = vmatprep.subr.mxu0 %v7186_v17  ;;  %1349 = vmatprep.subr.mxu1 %v7187_v19 }
 0x3a9   :  { %1279 = vmatpush1.msra.mxu0 %v7188_v20  ;;  %1350 = vmatpush1.msra.mxu1 %v7189_v21 }
 0x3aa   :  { %1280 = vmatprep.subr.mxu0 %v7190_v22  ;;  %1351 = vmatprep.subr.mxu1 %v7191_v23 }
 0x3ab   :  { %1281 = vmatpush1.msra.mxu0 %v7192_v24  ;;  %1352 = vmatpush1.msra.mxu1 %v7193_v25  ;;  %v7213_v24 = vld [vmem:[#allocation30_spill] sm:$0xff]  ;;  %v7214_v25 = vld [vmem:[#allocation31_spill] sm:$0xff] }
 0x3ac   :  { %1282 = vmatprep.subr.mxu0 %v7194_v26  ;;  %1353 = vmatprep.subr.mxu1 %v7195_v28  ;;  %v5539_v26 = vld [vmem:[#allocation7 + $0x108] sm:$0xff]  ;;  %v5542_v28 = vld [vmem:[#allocation7 + $0x118] sm:$0xff] }
 0x3ad   :  { %1283 = vmatpush1.msra.mxu0 %v7196_v29  ;;  %1316 = vmatprep.mubr.f32.mxu0 %v7197_v30  ;;  %v5545_v29 = vld [vmem:[#allocation7 + $0x100] sm:$0xff] }
 0x3ae   :  { %1354 = vmatpush1.msra.mxu1 %v7198_v31  ;;  %1387 = vmatprep.mubr.f32.mxu1 %v7197_v30  ;;  %v5548_v31 = vld [vmem:[#allocation7 + $0x110] sm:$0xff] }
 0x3af   :  { %1427 = vmatprep.subr.mxu0 %v5365_v32  ;;  %1498 = vmatprep.subr.mxu1 %v5368_v33 }
 0x44e   :  { %v1143_v41 = vpop.f32.mrf.mxu0  ;;  %v1214_v50 = vpop.f32.mrf.mxu1 }
 0x44f   :  { %v1144_v43 = vadd.f32 %v1143_v41, %v7208_v42  ;;  %v1215_v52 = vadd.f32 %v1214_v50, %v7210_v51  ;;  %v5554_v41 = vld [vmem:[#allocation7 + $0xf8] sm:$0xff]  ;;  %v5557_v42 = vld [vmem:[#allocation7 + $0xe0] sm:$0xff] }
 0x450   :  { %v1145_v44 = vpop.f32.mrf.mxu0  ;;  %v1216_v53 = vpop.f32.mrf.mxu1  ;;  %v5578_v50 = vld [vmem:[#allocation7 + $0xb8] sm:$0xff]  ;;  %v5581_v51 = vld [vmem:[#allocation7 + $0xa0] sm:$0xff] }
 0x451   :  { %v3915_v46 = vmul.f32 -1.442695, %v1144_v43  ;;  %v1146_v48 = vadd.f32 %v1145_v44, %v7209_v47  ;;  %v3917_v55 = vmul.f32 -1.442695, %v1215_v52  ;;  %v1217_v57 = vadd.f32 %v1216_v53, %v7211_v56  ;;  %v5560_v43 = vld [vmem:[#allocation7 + $0xf0] sm:$0xff]  ;;  %v5563_v44 = vld [vmem:[#allocation7 + $0xc8] sm:$0xff] }
 0x452   :  { %v5569_v47 = vld [vmem:[#allocation7 + $0xc0] sm:$0xff]  ;;  %v5584_v52 = vld [vmem:[#allocation7 + $0xb0] sm:$0xff]  ;;  %v5587_v53 = vld [vmem:[#allocation7 + $0x88] sm:$0xff] }
 0x453   :  { %4073 = vpow2.f32 %v3915_v46  ;;  %v3916_v49 = vmul.f32 -1.442695, %v1146_v48  ;;  %v5566_v46 = vld [vmem:[#allocation7 + $0xd8] sm:$0xff]  ;;  %v5572_v48 = vld [vmem:[#allocation7 + $0xd0] sm:$0xff]  ;;  %v5593_v56 = vld [vmem:[#allocation7 + $0x80] sm:$0xff] }
 0x455   :  { %4075 = vpow2.f32 %v3916_v49  ;;  %v5575_v49 = vld [vmem:[#allocation7 + $0xa8] sm:$0xff] }
 0x456   :  { %4077 = vpow2.f32 %v3917_v55  ;;  %v5590_v55 = vld [vmem:[#allocation7 + $0x98] sm:$0xff] }
 0x457   :  { %4079 = vtanh.f32 %v1217_v57  ;;  %v5596_v57 = vld [vmem:[#allocation7 + $0x90] sm:$0xff] }
 0x458   :  { %7215 = vst [vmem:[#allocation54_spill] sm:$0xff] %v5596_v57 }
 0x460   :  { %v4074_v10 = vpop.eup %4073 }
 0x461   :  { %v1228_v6 = vadd.f32 1.0, %v4074_v10  ;;  %v5599_v10 = vld [vmem:[#allocation7 + $0x68] sm:$0xff] }
 0x462   :  { %v4076_v60 = vpop.eup %4075  ;;  %7216 = vst [vmem:[#allocation56_spill] sm:$0xff] %v5599_v10 }
 0x463   :  { %4081 = vrcp.f32 %v1228_v6  ;;  %v1229_v18 = vadd.f32 1.0, %v4076_v60  ;;  %v4078_v12 = vpop.eup %4077  ;;  %v5602_v6 = vld [vmem:[#allocation7 + $0x78] sm:$0xff]  ;;  %v5605_v60 = vld [vmem:[#allocation7 + $0x60] sm:$0xff] }
 0x464   :  { %v4080_v13 = vpop.eup %4079  ;;  %v1230_v17 = vadd.f32 1.0, %v4078_v12  ;;  %7217 = vst [vmem:[#allocation36_spill] sm:$0xff] %v5602_v6  ;;  %7218 = vst [vmem:[#allocation37_spill] sm:$0xff] %v5605_v60  ;;  %v5611_v12 = vld [vmem:[#allocation7 + $0x48] sm:$0xff] }
 0x465   :  { %4083 = vrcp.f32 %v1229_v18  ;;  %v5608_v18 = vld [vmem:[#allocation7 + $0x70] sm:$0xff]  ;;  %7220 = vst [vmem:[#allocation39_spill] sm:$0xff] %v5611_v12 }
 0x466   :  { %4085 = vrcp.f32 %v1230_v17  ;;  %7219 = vst [vmem:[#allocation38_spill] sm:$0xff] %v5608_v18  ;;  %v5626_v17 = vld [vmem:[#allocation7 + $0x38] sm:$0xff] }
 0x467   :  { %7225 = vst [vmem:[#allocation44_spill] sm:$0xff] %v5626_v17 }
 0x470   :  { %v4082_v14 = vpop.eup %4081 }
 0x471   :  { %v1239_v15 = vmul.f32 %v4082_v14, %v4080_v13  ;;  %v5614_v13 = vld [vmem:[#allocation7 + $0x58] sm:$0xff]  ;;  %v5617_v14 = vld [vmem:[#allocation7 + $0x40] sm:$0xff] }
 0x472   :  { %v4084_v16 = vpop.eup %4083  ;;  %7221 = vst [vmem:[#allocation40_spill] sm:$0xff] %v5614_v13  ;;  %7222 = vst [vmem:[#allocation41_spill] sm:$0xff] %v5617_v14 }
 0x473   :  { %v1238_v19 = vmul.f32 %v4084_v16, %v5376_v38  ;;  %v4086_v21 = vpop.eup %4085  ;;  %v5551_v38 = vld [vmem:[#allocation7 + $0xe8] sm:$0xff] }
 0x474   :  { %v5623_v16 = vld [vmem:[#allocation7 + $0x28] sm:$0xff] }
 0x475   :  { %v5506_v20 = vadd.f32 %v1239_v15, %v1238_v19  ;;  %v5620_v15 = vld [vmem:[#allocation7 + $0x50] sm:$0xff]  ;;  %7224 = vst [vmem:[#allocation43_spill] sm:$0xff] %v5623_v16  ;;  %v5629_v19 = vld [vmem:[#allocation7 + $0x20] sm:$0xff] }
 0x476   :  { %7223 = vst [vmem:[#allocation42_spill] sm:$0xff] %v5620_v15  ;;  %7226 = vst [vmem:[#allocation45_spill] sm:$0xff] %v5629_v19 }
 0x477   :  { %4087 = vtanh.f32 %v5506_v20 }
 0x484   :  { %v4088_v22 = vpop.eup %4087 }
 0x485   :  { %v5509_v23 = vmul.f32 %v4088_v22, %v4086_v21  ;;  %v5632_v21 = vld [vmem:[#allocation7 + $0x30] sm:$0xff]  ;;  %v5635_v22 = vld [vmem:[#allocation7 + $0x8] sm:$0xff] }
 0x486   :  { %7227 = vst [vmem:[#allocation46_spill] sm:$0xff] %v5632_v21  ;;  %7228 = vst [vmem:[#allocation47_spill] sm:$0xff] %v5635_v22 }
 0x487   :  { %7212 = vst [vmem:[#allocation55_spill] sm:$0xff] %v5509_v23  ;;  %1317 = vmatmul.mubr.f32.vlgmr.msra.gmra.mxu0 %v5509_v23  ;;  %1388 = vmatmul.mubr.f32.vlgmr.msra.gmra.mxu1 %v5509_v23  ;;  %v5638_v23 = vld [vmem:[#allocation7 + $0x18] sm:$0xff] }
 0x488   :  { %1428 = vmatpush1.msra.mxu0 %v5383_v9  ;;  %1499 = vmatpush1.msra.mxu1 %v5386_v45  ;;  %7229 = vst [vmem:[#allocation48_spill] sm:$0xff] %v5638_v23 }
 0x489   :  { %1429 = vmatprep.subr.mxu0 %v5389_v2  ;;  %1500 = vmatprep.subr.mxu1 %v5392_v11 }
 0x48a   :  { %1430 = vmatpush1.msra.mxu0 %v5395_v4  ;;  %1501 = vmatpush1.msra.mxu1 %v5398_v36 }
 0x48b   :  { %1431 = vmatprep.subr.mxu0 %v5401_v0  ;;  %1502 = vmatprep.subr.mxu1 %v5404_v3 }
 0x48c   :  { %1432 = vmatpush1.msra.mxu0 %v5407_v7  ;;  %1503 = vmatpush1.msra.mxu1 %v5410_v54 }
 0x48d   :  { %1433 = vmatprep.subr.mxu0 %v5413_v62  ;;  %1504 = vmatprep.subr.mxu1 %v5416_v58 }
 0x48e   :  { %1434 = vmatpush1.msra.mxu0 %v5419_v1  ;;  %1505 = vmatpush1.msra.mxu1 %v5422_v63 }
 0x48f   :  { %1435 = vmatprep.subr.mxu0 %v5425_v5  ;;  %1506 = vmatprep.subr.mxu1 %v5428_v8 }
 0x490   :  { %1436 = vmatpush1.msra.mxu0 %v5431_v27  ;;  %1507 = vmatpush1.msra.mxu1 %v5434_v34 }
 0x491   :  { %1437 = vmatprep.subr.mxu0 %v7213_v24  ;;  %1508 = vmatprep.subr.mxu1 %v7214_v25 }
 0x492   :  { %1438 = vmatpush1.msra.mxu0 %v5443_v39  ;;  %1509 = vmatpush1.msra.mxu1 %v5446_v40 }
 0x493   :  { %1439 = vmatprep.subr.mxu0 %v5449_v61  ;;  %1510 = vmatprep.subr.mxu1 %v5452_v59 }
 0x494   :  { %1440 = vmatpush1.msra.mxu0 %v5455_v35  ;;  %1511 = vmatpush1.msra.mxu1 %v5458_v37 }
 0x495   :  { %1441 = vmatprep.subr.mxu0 %v5539_v26  ;;  %1512 = vmatprep.subr.mxu1 %v5542_v28 }
 0x496   :  { %1442 = vmatpush1.msra.mxu0 %v5545_v29  ;;  %1513 = vmatpush1.msra.mxu1 %v5548_v31 }
 0x497   :  { %1443 = vmatprep.subr.mxu0 %v5551_v38  ;;  %1514 = vmatprep.subr.mxu1 %v5554_v41 }
 0x498   :  { %1444 = vmatpush1.msra.mxu0 %v5557_v42  ;;  %1515 = vmatpush1.msra.mxu1 %v5560_v43 }
 0x499   :  { %1445 = vmatprep.subr.mxu0 %v5563_v44  ;;  %1516 = vmatprep.subr.mxu1 %v5566_v46 }
 0x49a   :  { %1446 = vmatpush1.msra.mxu0 %v5569_v47  ;;  %1517 = vmatpush1.msra.mxu1 %v5572_v48 }
 0x49b   :  { %1447 = vmatprep.subr.mxu0 %v5575_v49  ;;  %1518 = vmatprep.subr.mxu1 %v5578_v50 }
 0x49c   :  { %1448 = vmatpush1.msra.mxu0 %v5581_v51  ;;  %1519 = vmatpush1.msra.mxu1 %v5584_v52 }
 0x49d   :  { %1449 = vmatprep.subr.mxu0 %v5587_v53  ;;  %1520 = vmatprep.subr.mxu1 %v5590_v55 }
 0x49e   :  { %1450 = vmatpush1.msra.mxu0 %v5593_v56  ;;  %1521 = vmatpush1.msra.mxu1 %v5596_v57 }
 0x49f   :  { %1451 = vmatprep.subr.mxu0 %v5599_v10  ;;  %1522 = vmatprep.subr.mxu1 %v5602_v6 }
 0x4a0   :  { %1452 = vmatpush1.msra.mxu0 %v5605_v60  ;;  %1523 = vmatpush1.msra.mxu1 %v5608_v18  ;;  %v7234_v18 = vld [vmem:[#allocation66_spill] sm:$0xff] }
 0x4a1   :  { %1453 = vmatprep.subr.mxu0 %v5611_v12  ;;  %1524 = vmatprep.subr.mxu1 %v5614_v13 }
 0x4a2   :  { %1454 = vmatpush1.msra.mxu0 %v5617_v14  ;;  %1525 = vmatpush1.msra.mxu1 %v5620_v15  ;;  %v7233_v14 = vld [vmem:[#allocation67_spill] sm:$0xff] }
 0x4a3   :  { %1455 = vmatprep.subr.mxu0 %v5623_v16  ;;  %1526 = vmatprep.subr.mxu1 %v5626_v17  ;;  %v5641_v16 = vld [vmem:[#allocation7] sm:$0xff]  ;;  %v5645_v17 = vld [vmem:[#allocation7 + $0x10] sm:$0xff] }
 0x4a4   :  { %1456 = vmatpush1.msra.mxu0 %v5629_v19  ;;  %1527 = vmatpush1.msra.mxu1 %v5632_v21  ;;  %7230 = vst [vmem:[#allocation49_spill] sm:$0xff] %v5641_v16  ;;  %7231 = vst [vmem:[#allocation50_spill] sm:$0xff] %v5645_v17  ;;  %v7232_v21 = vld [vmem:[#allocation65_spill] sm:$0xff] }
 0x4a5   :  { %1457 = vmatprep.subr.mxu0 %v5635_v22  ;;  %1528 = vmatprep.subr.mxu1 %v5638_v23 }
 0x4a6   :  { %1458 = vmatpush1.msra.mxu0 %v5641_v16  ;;  %1491 = vmatprep.mubr.f32.mxu0 %v7197_v30 }
 0x4a7   :  { %1529 = vmatpush1.msra.mxu1 %v5645_v17  ;;  %1562 = vmatprep.mubr.f32.mxu1 %v7197_v30  ;;  %v7235_v30 = vld [vmem:[#allocation68_spill] sm:$0xff] }
 0x4a8   :  { %1602 = vmatprep.subr.mxu0 %v5365_v32  ;;  %1673 = vmatprep.subr.mxu1 %v5368_v33 }
 0x547   :  { %v1318_v22 = vpop.f32.mrf.mxu0  ;;  %v1389_v12 = vpop.f32.mrf.mxu1 }
 0x548   :  { %v1319_v19 = vadd.f32 %v1318_v22, %v7232_v21  ;;  %v1390_v60 = vadd.f32 %v1389_v12, %v7234_v18  ;;  %v7243_v22 = vld [vmem:[#allocation40_spill] sm:$0xff] }
 0x549   :  { %v1320_v23 = vpop.f32.mrf.mxu0  ;;  %v1391_v17 = vpop.f32.mrf.mxu1 }
 0x54a   :  { %v3918_v15 = vmul.f32 -1.442695, %v1319_v19  ;;  %v1321_v13 = vadd.f32 %v1320_v23, %v7233_v14  ;;  %v3920_v6 = vmul.f32 -1.442695, %v1390_v60  ;;  %v1392_v10 = vadd.f32 %v1391_v17, %v7235_v30  ;;  %v7241_v60 = vld [vmem:[#allocation38_spill] sm:$0xff]  ;;  %v7242_v17 = vld [vmem:[#allocation39_spill] sm:$0xff] }
 0x54c   :  { %4089 = vpow2.f32 %v3918_v15  ;;  %v3919_v16 = vmul.f32 -1.442695, %v1321_v13 }
 0x54e   :  { %4091 = vpow2.f32 %v3919_v16 }
 0x54f   :  { %4093 = vpow2.f32 %v3920_v6 }
 0x550   :  { %4095 = vtanh.f32 %v1392_v10  ;;  %v7240_v10 = vld [vmem:[#allocation37_spill] sm:$0xff] }
 0x559   :  { %v4090_v32 = vpop.eup %4089 }
 0x55a   :  { %v1403_v57 = vadd.f32 1.0, %v4090_v32 }
 0x55b   :  { %v4092_v33 = vpop.eup %4091 }
 0x55c   :  { %4097 = vrcp.f32 %v1403_v57  ;;  %v1404_v21 = vadd.f32 1.0, %v4092_v33  ;;  %v4094_v19 = vpop.eup %4093  ;;  %v7237_v33 = vld [vmem:[#allocation54_spill] sm:$0xff]  ;;  %v7239_v57 = vld [vmem:[#allocation36_spill] sm:$0xff] }
 0x55d   :  { %v4096_v23 = vpop.eup %4095  ;;  %v1405_v16 = vadd.f32 1.0, %v4094_v19  ;;  %v7245_v19 = vld [vmem:[#allocation42_spill] sm:$0xff] }
 0x55e   :  { %4099 = vrcp.f32 %v1404_v21  ;;  %v7244_v21 = vld [vmem:[#allocation41_spill] sm:$0xff] }
 0x55f   :  { %4101 = vrcp.f32 %v1405_v16  ;;  %v7250_v16 = vld [vmem:[#allocation47_spill] sm:$0xff] }
 0x569   :  { %v4098_v14 = vpop.eup %4097 }
 0x56a   :  { %v1414_v13 = vmul.f32 %v4098_v14, %v4096_v23  ;;  %v7246_v23 = vld [vmem:[#allocation43_spill] sm:$0xff]  ;;  %v7247_v14 = vld [vmem:[#allocation44_spill] sm:$0xff] }
 0x56b   :  { %v4100_v15 = vpop.eup %4099 }
 0x56c   :  { %v1413_v18 = vmul.f32 %v4100_v15, %v5506_v20  ;;  %v4102_v30 = vpop.eup %4101  ;;  %v7238_v20 = vld [vmem:[#allocation56_spill] sm:$0xff]  ;;  %v7249_v15 = vld [vmem:[#allocation46_spill] sm:$0xff] }
 0x56e   :  { %v5656_v12 = vadd.f32 %v1414_v13, %v1413_v18  ;;  %v7248_v13 = vld [vmem:[#allocation45_spill] sm:$0xff]  ;;  %v7251_v18 = vld [vmem:[#allocation48_spill] sm:$0xff] }
 0x570   :  { %4103 = vtanh.f32 %v5656_v12 }
 0x57d   :  { %v4104_v32 = vpop.eup %4103 }
 0x57e   :  { %v5659_v6 = vmul.f32 %v4104_v32, %v4102_v30  ;;  %v7252_v30 = vld [vmem:[#allocation49_spill] sm:$0xff]  ;;  %v7253_v32 = vmov 0.0  }
 0x580   :  { %7236 = vst [vmem:[#allocation51_spill] sm:$0xff] %v5659_v6  ;;  %1492 = vmatmul.mubr.f32.vlgmr.msra.gmra.mxu0 %v5659_v6  ;;  %1563 = vmatmul.mubr.f32.vlgmr.msra.gmra.mxu1 %v5659_v6  ;;  %v7254_v6 = vld [vmem:[#allocation50_spill] sm:$0xff] }
 0x581   :  { %1603 = vmatpush1.msra.mxu0 %v5383_v9  ;;  %1674 = vmatpush1.msra.mxu1 %v5386_v45 }
 0x582   :  { %1604 = vmatprep.subr.mxu0 %v5389_v2  ;;  %1675 = vmatprep.subr.mxu1 %v5392_v11 }
 0x583   :  { %1605 = vmatpush1.msra.mxu0 %v5395_v4  ;;  %1676 = vmatpush1.msra.mxu1 %v5398_v36 }
 0x584   :  { %1606 = vmatprep.subr.mxu0 %v5401_v0  ;;  %1677 = vmatprep.subr.mxu1 %v5404_v3 }
 0x585   :  { %1607 = vmatpush1.msra.mxu0 %v5407_v7  ;;  %1678 = vmatpush1.msra.mxu1 %v5410_v54 }
 0x586   :  { %1608 = vmatprep.subr.mxu0 %v5413_v62  ;;  %1679 = vmatprep.subr.mxu1 %v5416_v58 }
 0x587   :  { %1609 = vmatpush1.msra.mxu0 %v5419_v1  ;;  %1680 = vmatpush1.msra.mxu1 %v5422_v63 }
 0x588   :  { %1610 = vmatprep.subr.mxu0 %v5425_v5  ;;  %1681 = vmatprep.subr.mxu1 %v5428_v8 }
 0x589   :  { %1611 = vmatpush1.msra.mxu0 %v5431_v27  ;;  %1682 = vmatpush1.msra.mxu1 %v5434_v34 }
 0x58a   :  { %1612 = vmatprep.subr.mxu0 %v7213_v24  ;;  %1683 = vmatprep.subr.mxu1 %v7214_v25 }
 0x58b   :  { %1613 = vmatpush1.msra.mxu0 %v5443_v39  ;;  %1684 = vmatpush1.msra.mxu1 %v5446_v40 }
 0x58c   :  { %1614 = vmatprep.subr.mxu0 %v5449_v61  ;;  %1685 = vmatprep.subr.mxu1 %v5452_v59 }
 0x58d   :  { %1615 = vmatpush1.msra.mxu0 %v5455_v35  ;;  %1686 = vmatpush1.msra.mxu1 %v5458_v37 }
 0x58e   :  { %1616 = vmatprep.subr.mxu0 %v5539_v26  ;;  %1687 = vmatprep.subr.mxu1 %v5542_v28 }
 0x58f   :  { %1617 = vmatpush1.msra.mxu0 %v5545_v29  ;;  %1688 = vmatpush1.msra.mxu1 %v5548_v31 }
 0x590   :  { %1618 = vmatprep.subr.mxu0 %v5551_v38  ;;  %1689 = vmatprep.subr.mxu1 %v5554_v41 }
 0x591   :  { %1619 = vmatpush1.msra.mxu0 %v5557_v42  ;;  %1690 = vmatpush1.msra.mxu1 %v5560_v43 }
 0x592   :  { %1620 = vmatprep.subr.mxu0 %v5563_v44  ;;  %1691 = vmatprep.subr.mxu1 %v5566_v46 }
 0x593   :  { %1621 = vmatpush1.msra.mxu0 %v5569_v47  ;;  %1692 = vmatpush1.msra.mxu1 %v5572_v48 }
 0x594   :  { %1622 = vmatprep.subr.mxu0 %v5575_v49  ;;  %1693 = vmatprep.subr.mxu1 %v5578_v50 }
 0x595   :  { %1623 = vmatpush1.msra.mxu0 %v5581_v51  ;;  %1694 = vmatpush1.msra.mxu1 %v5584_v52 }
 0x596   :  { %1624 = vmatprep.subr.mxu0 %v5587_v53  ;;  %1695 = vmatprep.subr.mxu1 %v5590_v55 }
 0x597   :  { %1625 = vmatpush1.msra.mxu0 %v5593_v56  ;;  %1696 = vmatpush1.msra.mxu1 %v7237_v33 }
 0x598   :  { %1626 = vmatprep.subr.mxu0 %v7238_v20  ;;  %1697 = vmatprep.subr.mxu1 %v7239_v57 }
 0x599   :  { %1627 = vmatpush1.msra.mxu0 %v7240_v10  ;;  %1698 = vmatpush1.msra.mxu1 %v7241_v60  ;;  %v7259_v60 = vld [vmem:[#allocation70_spill] sm:$0xff] }
 0x59a   :  { %1628 = vmatprep.subr.mxu0 %v7242_v17  ;;  %1699 = vmatprep.subr.mxu1 %v7243_v22 }
 0x59b   :  { %1629 = vmatpush1.msra.mxu0 %v7244_v21  ;;  %1700 = vmatpush1.msra.mxu1 %v7245_v19  ;;  %v7255_v19 = vld [vmem:[#allocation33_spill] sm:$0xff] }
 0x59c   :  { %1630 = vmatprep.subr.mxu0 %v7246_v23  ;;  %1701 = vmatprep.subr.mxu1 %v7247_v14  ;;  %v7256_v23 = vld [vmem:[#allocation34_spill] sm:$0xff] }
 0x59d   :  { %1631 = vmatpush1.msra.mxu0 %v7248_v13  ;;  %1702 = vmatpush1.msra.mxu1 %v7249_v15  ;;  %v7257_v13 = vld [vmem:[#allocation69_spill] sm:$0xff] }
 0x59e   :  { %1632 = vmatprep.subr.mxu0 %v7250_v16  ;;  %1703 = vmatprep.subr.mxu1 %v7251_v18  ;;  %v7258_v16 = vld [vmem:[#allocation71_spill] sm:$0xff] }
 0x59f   :  { %1633 = vmatpush1.msra.mxu0 %v7252_v30  ;;  %1666 = vmatprep.mubr.f32.mxu0 %v7253_v32 }
 0x5a0   :  { %1704 = vmatpush1.msra.mxu1 %v7254_v6  ;;  %1737 = vmatprep.mubr.f32.mxu1 %v7253_v32  ;;  %v7260_v32 = vld [vmem:[#allocation72_spill] sm:$0xff] }
 0x5a1   :  { %1777 = vmatprep.subr.mxu0 %v7255_v19  ;;  %1848 = vmatprep.subr.mxu1 %v7256_v23 }
 0x640   :  { %v1493_v14 = vpop.f32.mrf.mxu0  ;;  %v1564_v30 = vpop.f32.mrf.mxu1 }
 0x641   :  { %v1494_v21 = vadd.f32 %v1493_v14, %v7257_v13  ;;  %v1565_v10 = vadd.f32 %v1564_v30, %v7259_v60 }
 0x642   :  { %v1495_v15 = vpop.f32.mrf.mxu0  ;;  %v1566_v6 = vpop.f32.mrf.mxu1 }
 0x643   :  { %v3921_v22 = vmul.f32 -1.442695, %v1494_v21  ;;  %v1496_v17 = vadd.f32 %v1495_v15, %v7258_v16  ;;  %v3923_v57 = vmul.f32 -1.442695, %v1565_v10  ;;  %v1567_v20 = vadd.f32 %v1566_v6, %v7260_v32 }
 0x645   :  { %4105 = vpow2.f32 %v3921_v22  ;;  %v3922_v18 = vmul.f32 -1.442695, %v1496_v17 }
 0x647   :  { %4107 = vpow2.f32 %v3922_v18 }
 0x648   :  { %4109 = vpow2.f32 %v3923_v57 }
 0x649   :  { %4111 = vtanh.f32 %v1567_v20 }
 0x652   :  { %v4106_v19 = vpop.eup %4105 }
 0x653   :  { %v1578_v33 = vadd.f32 1.0, %v4106_v19  ;;  %v2015_v19 = vld [vmem:[#allocation10 + $0x1e0] sm:$0xff] }
 0x654   :  { %v4108_v23 = vpop.eup %4107 }
 0x655   :  { %4113 = vrcp.f32 %v1578_v33  ;;  %v1579_v14 = vadd.f32 1.0, %v4108_v23  ;;  %v4110_v21 = vpop.eup %4109  ;;  %v2017_v23 = vld [vmem:[#allocation10 + $0x1f0] sm:$0xff] }
 0x656   :  { %v4112_v13 = vpop.eup %4111  ;;  %v1580_v16 = vadd.f32 1.0, %v4110_v21  ;;  %v2014_v21 = vld [vmem:[#allocation10 + $0x1d8] sm:$0xff] }
 0x657   :  { %4115 = vrcp.f32 %v1579_v14  ;;  %v2012_v14 = vld [vmem:[#allocation10 + $0x1c8] sm:$0xff] }
 0x658   :  { %4117 = vrcp.f32 %v1580_v16  ;;  %v2007_v16 = vld [vmem:[#allocation10 + $0x1a0] sm:$0xff] }
 0x662   :  { %v4114_v22 = vpop.eup %4113 }
 0x663   :  { %v1589_v17 = vmul.f32 %v4114_v22, %v4112_v13  ;;  %v2011_v13 = vld [vmem:[#allocation10 + $0x1c0] sm:$0xff]  ;;  %v2013_v22 = vld [vmem:[#allocation10 + $0x1d0] sm:$0xff] }
 0x664   :  { %v4116_v15 = vpop.eup %4115 }
 0x665   :  { %v1588_v60 = vmul.f32 %v4116_v15, %v5656_v12  ;;  %v4118_v6 = vpop.eup %4117  ;;  %v2010_v15 = vld [vmem:[#allocation10 + $0x1b8] sm:$0xff] }
 0x667   :  { %v5734_v18 = vadd.f32 %v1589_v17, %v1588_v60  ;;  %v2008_v17 = vld [vmem:[#allocation10 + $0x1a8] sm:$0xff]  ;;  %v2009_v60 = vld [vmem:[#allocation10 + $0x1b0] sm:$0xff] }
 0x669   :  { %4119 = vtanh.f32 %v5734_v18 }
 0x676   :  { %v4120_v57 = vpop.eup %4119 }
 0x677   :  { %v5737_v10 = vmul.f32 %v4120_v57, %v4118_v6  ;;  %v2006_v6 = vld [vmem:[#allocation10 + $0x198] sm:$0xff]  ;;  %v2003_v57 = vld [vmem:[#allocation10 + $0x180] sm:$0xff] }
 0x679   :  { %1667 = vmatmul.mubr.f32.vlgmr.msra.gmra.mxu0 %v5737_v10  ;;  %1738 = vmatmul.mubr.f32.vlgmr.msra.gmra.mxu1 %v5737_v10 }
 0x67a   :  { %1778 = vmatpush1.msra.mxu0 %v5383_v9  ;;  %1849 = vmatpush1.msra.mxu1 %v5386_v45  ;;  %v7263_v9 = vld [vmem:[#allocation36_spill] sm:$0xff]  ;;  %v7264_v45 = vld [vmem:[#allocation37_spill] sm:$0xff] }
 0x67b   :  { %1779 = vmatprep.subr.mxu0 %v5389_v2  ;;  %1850 = vmatprep.subr.mxu1 %v5392_v11  ;;  %v7265_v2 = vld [vmem:[#allocation38_spill] sm:$0xff]  ;;  %v7266_v11 = vld [vmem:[#allocation39_spill] sm:$0xff] }
 0x67c   :  { %1780 = vmatpush1.msra.mxu0 %v5395_v4  ;;  %1851 = vmatpush1.msra.mxu1 %v5398_v36  ;;  %v7267_v4 = vld [vmem:[#allocation40_spill] sm:$0xff]  ;;  %v7268_v36 = vld [vmem:[#allocation41_spill] sm:$0xff] }
 0x67d   :  { %1781 = vmatprep.subr.mxu0 %v5401_v0  ;;  %1852 = vmatprep.subr.mxu1 %v5404_v3  ;;  %v7269_v0 = vld [vmem:[#allocation42_spill] sm:$0xff]  ;;  %v7270_v3 = vld [vmem:[#allocation43_spill] sm:$0xff] }
 0x67e   :  { %1782 = vmatpush1.msra.mxu0 %v5407_v7  ;;  %1853 = vmatpush1.msra.mxu1 %v5410_v54  ;;  %v7271_v7 = vld [vmem:[#allocation44_spill] sm:$0xff]  ;;  %v7272_v54 = vld [vmem:[#allocation45_spill] sm:$0xff] }
 0x67f   :  { %1783 = vmatprep.subr.mxu0 %v5413_v62  ;;  %1854 = vmatprep.subr.mxu1 %v5416_v58  ;;  %v7273_v62 = vld [vmem:[#allocation46_spill] sm:$0xff]  ;;  %v7274_v58 = vld [vmem:[#allocation47_spill] sm:$0xff] }
 0x680   :  { %1784 = vmatpush1.msra.mxu0 %v5419_v1  ;;  %1855 = vmatpush1.msra.mxu1 %v5422_v63  ;;  %v7275_v1 = vld [vmem:[#allocation48_spill] sm:$0xff]  ;;  %v7276_v63 = vld [vmem:[#allocation49_spill] sm:$0xff] }
 0x681   :  { %1785 = vmatprep.subr.mxu0 %v5425_v5  ;;  %1856 = vmatprep.subr.mxu1 %v5428_v8  ;;  %v7277_v5 = vld [vmem:[#allocation50_spill] sm:$0xff]  ;;  %v7278_v8 = vmov 0.0  }
 0x682   :  { %1786 = vmatpush1.msra.mxu0 %v5431_v27  ;;  %1857 = vmatpush1.msra.mxu1 %v5434_v34  ;;  %v2016_v27 = vld [vmem:[#allocation10 + $0x1e8] sm:$0xff]  ;;  %v2018_v34 = vld [vmem:[#allocation10 + $0x1f8] sm:$0xff] }
 0x683   :  { %1787 = vmatprep.subr.mxu0 %v7213_v24  ;;  %1858 = vmatprep.subr.mxu1 %v7214_v25  ;;  %v7280_v25 = vld [vmem:[#allocation75_spill] sm:$0xff] }
 0x684   :  { %1788 = vmatpush1.msra.mxu0 %v5443_v39  ;;  %1859 = vmatpush1.msra.mxu1 %v5446_v40 }
 0x685   :  { %1789 = vmatprep.subr.mxu0 %v5449_v61  ;;  %1860 = vmatprep.subr.mxu1 %v5452_v59  ;;  %v7261_v59 = vld [vmem:[#allocation54_spill] sm:$0xff]  ;;  %v7262_v61 = vld [vmem:[#allocation56_spill] sm:$0xff] }
 0x686   :  { %1790 = vmatpush1.msra.mxu0 %v5455_v35  ;;  %1861 = vmatpush1.msra.mxu1 %v5458_v37  ;;  %v7279_v37 = vld [vmem:[#allocation73_spill] sm:$0xff] }
 0x687   :  { %1791 = vmatprep.subr.mxu0 %v5539_v26  ;;  %1862 = vmatprep.subr.mxu1 %v5542_v28 }
 0x688   :  { %1792 = vmatpush1.msra.mxu0 %v5545_v29  ;;  %1863 = vmatpush1.msra.mxu1 %v5548_v31  ;;  %v7281_v31 = vld [vmem:[#allocation74_spill] sm:$0xff] }
 0x689   :  { %1793 = vmatprep.subr.mxu0 %v5551_v38  ;;  %1864 = vmatprep.subr.mxu1 %v5554_v41 }
 0x68a   :  { %1794 = vmatpush1.msra.mxu0 %v5557_v42  ;;  %1865 = vmatpush1.msra.mxu1 %v5560_v43  ;;  %v7282_v43 = vld [vmem:[#allocation76_spill] sm:$0xff] }
 0x68b   :  { %1795 = vmatprep.subr.mxu0 %v5563_v44  ;;  %1866 = vmatprep.subr.mxu1 %v5566_v46 }
 0x68c   :  { %1796 = vmatpush1.msra.mxu0 %v5569_v47  ;;  %1867 = vmatpush1.msra.mxu1 %v5572_v48 }
 0x68d   :  { %1797 = vmatprep.subr.mxu0 %v5575_v49  ;;  %1868 = vmatprep.subr.mxu1 %v5578_v50 }
 0x68e   :  { %1798 = vmatpush1.msra.mxu0 %v5581_v51  ;;  %1869 = vmatpush1.msra.mxu1 %v5584_v52 }
 0x68f   :  { %1799 = vmatprep.subr.mxu0 %v5587_v53  ;;  %1870 = vmatprep.subr.mxu1 %v5590_v55 }
 0x690   :  { %1800 = vmatpush1.msra.mxu0 %v5593_v56  ;;  %1871 = vmatpush1.msra.mxu1 %v7261_v59  ;;  %v2005_v59 = vld [vmem:[#allocation10 + $0x190] sm:$0xff] }
 0x691   :  { %1801 = vmatprep.subr.mxu0 %v7262_v61  ;;  %1872 = vmatprep.subr.mxu1 %v7263_v9  ;;  %v2000_v61 = vld [vmem:[#allocation10 + $0x168] sm:$0xff]  ;;  %v2002_v9 = vld [vmem:[#allocation10 + $0x178] sm:$0xff] }
 0x692   :  { %1802 = vmatpush1.msra.mxu0 %v7264_v45  ;;  %1873 = vmatpush1.msra.mxu1 %v7265_v2  ;;  %v1999_v45 = vld [vmem:[#allocation10 + $0x160] sm:$0xff]  ;;  %v2001_v2 = vld [vmem:[#allocation10 + $0x170] sm:$0xff] }
 0x693   :  { %1803 = vmatprep.subr.mxu0 %v7266_v11  ;;  %1874 = vmatprep.subr.mxu1 %v7267_v4  ;;  %v1996_v11 = vld [vmem:[#allocation10 + $0x148] sm:$0xff]  ;;  %v1998_v4 = vld [vmem:[#allocation10 + $0x158] sm:$0xff] }
 0x694   :  { %1804 = vmatpush1.msra.mxu0 %v7268_v36  ;;  %1875 = vmatpush1.msra.mxu1 %v7269_v0  ;;  %v1995_v36 = vld [vmem:[#allocation10 + $0x140] sm:$0xff]  ;;  %v1997_v0 = vld [vmem:[#allocation10 + $0x150] sm:$0xff] }
 0x695   :  { %1805 = vmatprep.subr.mxu0 %v7270_v3  ;;  %1876 = vmatprep.subr.mxu1 %v7271_v7  ;;  %v1992_v3 = vld [vmem:[#allocation10 + $0x128] sm:$0xff]  ;;  %v1994_v7 = vld [vmem:[#allocation10 + $0x138] sm:$0xff] }
 0x696   :  { %1806 = vmatpush1.msra.mxu0 %v7272_v54  ;;  %1877 = vmatpush1.msra.mxu1 %v7273_v62  ;;  %v1991_v54 = vld [vmem:[#allocation10 + $0x120] sm:$0xff]  ;;  %v1993_v62 = vld [vmem:[#allocation10 + $0x130] sm:$0xff] }
 0x697   :  { %1807 = vmatprep.subr.mxu0 %v7274_v58  ;;  %1878 = vmatprep.subr.mxu1 %v7275_v1  ;;  %v1988_v58 = vld [vmem:[#allocation10 + $0x108] sm:$0xff]  ;;  %v1990_v1 = vld [vmem:[#allocation10 + $0x118] sm:$0xff] }
 0x698   :  { %1808 = vmatpush1.msra.mxu0 %v7276_v63  ;;  %1879 = vmatpush1.msra.mxu1 %v7277_v5  ;;  %v1987_v63 = vld [vmem:[#allocation10 + $0x100] sm:$0xff]  ;;  %v1989_v5 = vld [vmem:[#allocation10 + $0x110] sm:$0xff] }
 0x699   :  { %1841 = vmatprep.mubr.f32.mxu0 %v7278_v8  ;;  %1912 = vmatprep.mubr.f32.mxu1 %v7278_v8 }
 0x69a   :  { %2041 = vmatprep.subr.mxu0 %v2016_v27  ;;  %2154 = vmatprep.subr.mxu1 %v2018_v34  ;;  %v1984_v27 = vld [vmem:[#allocation10 + $0xe8] sm:$0xff]  ;;  %v1986_v34 = vld [vmem:[#allocation10 + $0xf8] sm:$0xff] }
 0x739   :  { %v1668_v35 = vpop.f32.mrf.mxu0  ;;  %v1739_v29 = vpop.f32.mrf.mxu1 }
 0x73a   :  { %v1669_v39 = vadd.f32 %v1668_v35, %v7279_v37  ;;  %v1740_v38 = vadd.f32 %v1739_v29, %v7281_v31  ;;  %v1983_v35 = vld [vmem:[#allocation10 + $0xe0] sm:$0xff]  ;;  %v1985_v37 = vld [vmem:[#allocation10 + $0xf0] sm:$0xff] }
 0x73b   :  { %v1670_v40 = vpop.f32.mrf.mxu0  ;;  %v1741_v41 = vpop.f32.mrf.mxu1  ;;  %v1975_v29 = vld [vmem:[#allocation10 + $0xa0] sm:$0xff]  ;;  %v1977_v31 = vld [vmem:[#allocation10 + $0xb0] sm:$0xff] }
 0x73c   :  { %v3924_v24 = vmul.f32 -1.442695, %v1669_v39  ;;  %v1671_v26 = vadd.f32 %v1670_v40, %v7280_v25  ;;  %v3926_v42 = vmul.f32 -1.442695, %v1740_v38  ;;  %v1742_v44 = vadd.f32 %v1741_v41, %v7282_v43  ;;  %v1980_v39 = vld [vmem:[#allocation10 + $0xc8] sm:$0xff]  ;;  %v1982_v40 = vld [vmem:[#allocation10 + $0xd8] sm:$0xff] }
 0x73d   :  { %v1981_v25 = vld [vmem:[#allocation10 + $0xd0] sm:$0xff]  ;;  %v1972_v38 = vld [vmem:[#allocation10 + $0x88] sm:$0xff]  ;;  %v1974_v41 = vld [vmem:[#allocation10 + $0x98] sm:$0xff] }
 0x73e   :  { %4121 = vpow2.f32 %v3924_v24  ;;  %v3925_v28 = vmul.f32 -1.442695, %v1671_v26  ;;  %v1979_v24 = vld [vmem:[#allocation10 + $0xc0] sm:$0xff]  ;;  %v1976_v26 = vld [vmem:[#allocation10 + $0xa8] sm:$0xff]  ;;  %v1973_v43 = vld [vmem:[#allocation10 + $0x90] sm:$0xff] }
 0x740   :  { %4123 = vpow2.f32 %v3925_v28  ;;  %v1978_v28 = vld [vmem:[#allocation10 + $0xb8] sm:$0xff] }
 0x741   :  { %4125 = vpow2.f32 %v3926_v42  ;;  %v1971_v42 = vld [vmem:[#allocation10 + $0x80] sm:$0xff] }
 0x742   :  { %4127 = vtanh.f32 %v1742_v44  ;;  %v1968_v44 = vld [vmem:[#allocation10 + $0x68] sm:$0xff] }
 0x74b   :  { %v4122_v46 = vpop.eup %4121 }
 0x74c   :  { %v1753_v47 = vadd.f32 1.0, %v4122_v46  ;;  %v1970_v46 = vld [vmem:[#allocation10 + $0x78] sm:$0xff] }
 0x74d   :  { %v4124_v48 = vpop.eup %4123 }
 0x74e   :  { %4129 = vrcp.f32 %v1753_v47  ;;  %v1754_v49 = vadd.f32 1.0, %v4124_v48  ;;  %v4126_v50 = vpop.eup %4125  ;;  %v1967_v47 = vld [vmem:[#allocation10 + $0x60] sm:$0xff]  ;;  %v1969_v48 = vld [vmem:[#allocation10 + $0x70] sm:$0xff] }
 0x74f   :  { %v4128_v51 = vpop.eup %4127  ;;  %v1755_v56 = vadd.f32 1.0, %v4126_v50  ;;  %v1966_v50 = vld [vmem:[#allocation10 + $0x58] sm:$0xff] }
 0x750   :  { %4131 = vrcp.f32 %v1754_v49  ;;  %v1964_v49 = vld [vmem:[#allocation10 + $0x48] sm:$0xff] }
 0x751   :  { %4133 = vrcp.f32 %v1755_v56  ;;  %v1959_v56 = vld [vmem:[#allocation10 + $0x20] sm:$0xff] }
 0x75b   :  { %v4130_v52 = vpop.eup %4129 }
 0x75c   :  { %v1764_v53 = vmul.f32 %v4130_v52, %v4128_v51  ;;  %v1963_v51 = vld [vmem:[#allocation10 + $0x40] sm:$0xff]  ;;  %v1965_v52 = vld [vmem:[#allocation10 + $0x50] sm:$0xff] }
 0x75d   :  { %v4132_v55 = vpop.eup %4131 }
 0x75e   :  { %v1763_v12 = vmul.f32 %v4132_v55, %v5734_v18  ;;  %v4134_v20 = vpop.eup %4133  ;;  %v2004_v18 = vld [vmem:[#allocation10 + $0x188] sm:$0xff]  ;;  %v1962_v55 = vld [vmem:[#allocation10 + $0x38] sm:$0xff] }
 0x760   :  { %v5810_v33 = vadd.f32 %v1764_v53, %v1763_v12  ;;  %v1960_v53 = vld [vmem:[#allocation10 + $0x28] sm:$0xff]  ;;  %v1961_v12 = vld [vmem:[#allocation10 + $0x30] sm:$0xff] }
 0x762   :  { %4135 = vtanh.f32 %v5810_v33 }
 0x76f   :  { %v4136_v30 = vpop.eup %4135 }
 0x770   :  { %v5813_v32 = vmul.f32 %v4136_v30, %v4134_v20  ;;  %v1956_v20 = vld [vmem:[#allocation10 + $0x8] sm:$0xff]  ;;  %v1958_v30 = vld [vmem:[#allocation10 + $0x18] sm:$0xff] }
 0x772   :  { %1842 = vmatmul.mubr.f32.vlgmr.msra.gmra.mxu0 %v5813_v32  ;;  %1913 = vmatmul.mubr.f32.vlgmr.msra.gmra.mxu1 %v5813_v32 }
 0x773   :  { %2042 = vmatpush1.msra.mxu0 %v2015_v19  ;;  %2155 = vmatpush1.msra.mxu1 %v2017_v23  ;;  %v1955_v19 = vld [vmem:[#allocation10] sm:$0xff]  ;;  %v1957_v23 = vld [vmem:[#allocation10 + $0x10] sm:$0xff] }
 0x774   :  { %2043 = vmatprep.subr.mxu0 %v2012_v14  ;;  %2156 = vmatprep.subr.mxu1 %v2014_v21  ;;  %v7283_v14 = vld [vmem:[#allocation81_spill] sm:$0xff]  ;;  %v7284_v21 = vld [vmem:[#allocation32_spill] sm:$0xff] }
 0x775   :  { %2044 = vmatpush1.msra.mxu0 %v2011_v13  ;;  %2157 = vmatpush1.msra.mxu1 %v2013_v22  ;;  %v7285_v13 = vld [vmem:[#allocation35_spill] sm:$0xff] }
 0x776   :  { %2045 = vmatprep.subr.mxu0 %v2008_v17  ;;  %2158 = vmatprep.subr.mxu1 %v2010_v15  ;;  %v7286_v22 = vld [vmem:[#allocation55_spill] sm:$0xff]  ;;  %v5847_v15 = vld [vmem:[#allocation12 + $0x1e8] sm:$0xff] }
 0x777   :  { %2046 = vmatpush1.msra.mxu0 %v2007_v16  ;;  %2159 = vmatpush1.msra.mxu1 %v2009_v60  ;;  %v7287_v17 = vld [vmem:[#allocation51_spill] sm:$0xff]  ;;  %7288 = vst [vmem:[#allocation52_spill] sm:$0xff] %v5847_v15 }
 0x778   :  { %2047 = vmatprep.subr.mxu0 %v2004_v18  ;;  %2160 = vmatprep.subr.mxu1 %v2006_v6  ;;  %v5849_v16 = vld [vmem:[#allocation12 + $0x1f8] sm:$0xff]  ;;  %v5855_v60 = vld [vmem:[#allocation12 + $0x1f0] sm:$0xff]  ;;  %v5865_v6 = vld [vmem:[#allocation12 + $0x1c0] sm:$0xff] }
 0x779   :  { %2048 = vmatpush1.msra.mxu0 %v2003_v57  ;;  %2161 = vmatpush1.msra.mxu1 %v2005_v59  ;;  %7289 = vst [vmem:[#allocation57_spill] sm:$0xff] %v5849_v16  ;;  %v5861_v18 = vld [vmem:[#allocation12 + $0x1d8] sm:$0xff]  ;;  %v5867_v57 = vld [vmem:[#allocation12 + $0x1d0] sm:$0xff]  ;;  %v5871_v59 = vld [vmem:[#allocation12 + $0x1a8] sm:$0xff] }
 0x77a   :  { %2049 = vmatprep.subr.mxu0 %v2000_v61  ;;  %2162 = vmatprep.subr.mxu1 %v2002_v9  ;;  %v5873_v61 = vld [vmem:[#allocation12 + $0x1b8] sm:$0xff]  ;;  %v5877_v9 = vld [vmem:[#allocation12 + $0x1a0] sm:$0xff] }
 0x77b   :  { %2050 = vmatpush1.msra.mxu0 %v1999_v45  ;;  %2163 = vmatpush1.msra.mxu1 %v2001_v2  ;;  %v5879_v45 = vld [vmem:[#allocation12 + $0x1b0] sm:$0xff]  ;;  %v5883_v2 = vld [vmem:[#allocation12 + $0x188] sm:$0xff] }
 0x77c   :  { %2051 = vmatprep.subr.mxu0 %v1996_v11  ;;  %2164 = vmatprep.subr.mxu1 %v1998_v4  ;;  %v5885_v11 = vld [vmem:[#allocation12 + $0x198] sm:$0xff]  ;;  %v5889_v4 = vld [vmem:[#allocation12 + $0x180] sm:$0xff] }
 0x77d   :  { %2052 = vmatpush1.msra.mxu0 %v1995_v36  ;;  %2165 = vmatpush1.msra.mxu1 %v1997_v0  ;;  %v5891_v36 = vld [vmem:[#allocation12 + $0x190] sm:$0xff]  ;;  %v5895_v0 = vld [vmem:[#allocation12 + $0x168] sm:$0xff] }
 0x77e   :  { %2053 = vmatprep.subr.mxu0 %v1992_v3  ;;  %2166 = vmatprep.subr.mxu1 %v1994_v7  ;;  %v5897_v3 = vld [vmem:[#allocation12 + $0x178] sm:$0xff]  ;;  %v5901_v7 = vld [vmem:[#allocation12 + $0x160] sm:$0xff] }
 0x77f   :  { %2054 = vmatpush1.msra.mxu0 %v1991_v54  ;;  %2167 = vmatpush1.msra.mxu1 %v1993_v62  ;;  %v5903_v54 = vld [vmem:[#allocation12 + $0x170] sm:$0xff]  ;;  %v5907_v62 = vld [vmem:[#allocation12 + $0x148] sm:$0xff] }
 0x780   :  { %2055 = vmatprep.subr.mxu0 %v1988_v58  ;;  %2168 = vmatprep.subr.mxu1 %v1990_v1  ;;  %v5909_v58 = vld [vmem:[#allocation12 + $0x158] sm:$0xff]  ;;  %v5913_v1 = vld [vmem:[#allocation12 + $0x140] sm:$0xff] }
 0x781   :  { %2056 = vmatpush1.msra.mxu0 %v1987_v63  ;;  %2169 = vmatpush1.msra.mxu1 %v1989_v5  ;;  %v5915_v63 = vld [vmem:[#allocation12 + $0x150] sm:$0xff]  ;;  %v5919_v5 = vld [vmem:[#allocation12 + $0x128] sm:$0xff] }
 0x782   :  { %2057 = vmatprep.subr.mxu0 %v1984_v27  ;;  %2170 = vmatprep.subr.mxu1 %v1986_v34  ;;  %v5921_v27 = vld [vmem:[#allocation12 + $0x138] sm:$0xff]  ;;  %v5925_v34 = vld [vmem:[#allocation12 + $0x120] sm:$0xff] }
 0x783   :  { %2058 = vmatpush1.msra.mxu0 %v1983_v35  ;;  %2171 = vmatpush1.msra.mxu1 %v1985_v37  ;;  %v5927_v35 = vld [vmem:[#allocation12 + $0x130] sm:$0xff]  ;;  %v5931_v37 = vld [vmem:[#allocation12 + $0x108] sm:$0xff] }
 0x784   :  { %2059 = vmatprep.subr.mxu0 %v1980_v39  ;;  %2172 = vmatprep.subr.mxu1 %v1982_v40  ;;  %v5933_v39 = vld [vmem:[#allocation12 + $0x118] sm:$0xff]  ;;  %v5937_v40 = vld [vmem:[#allocation12 + $0x100] sm:$0xff] }
 0x785   :  { %2060 = vmatpush1.msra.mxu0 %v1979_v24  ;;  %2173 = vmatpush1.msra.mxu1 %v1981_v25  ;;  %v5939_v24 = vld [vmem:[#allocation12 + $0x110] sm:$0xff]  ;;  %v5943_v25 = vld [vmem:[#allocation12 + $0xe8] sm:$0xff] }
 0x786   :  { %2061 = vmatprep.subr.mxu0 %v1976_v26  ;;  %2174 = vmatprep.subr.mxu1 %v1978_v28  ;;  %v5945_v26 = vld [vmem:[#allocation12 + $0xf8] sm:$0xff]  ;;  %v5949_v28 = vld [vmem:[#allocation12 + $0xe0] sm:$0xff] }
 0x787   :  { %2062 = vmatpush1.msra.mxu0 %v1975_v29  ;;  %2175 = vmatpush1.msra.mxu1 %v1977_v31  ;;  %v5951_v29 = vld [vmem:[#allocation12 + $0xf0] sm:$0xff]  ;;  %v5955_v31 = vld [vmem:[#allocation12 + $0xc8] sm:$0xff] }
 0x788   :  { %2063 = vmatprep.subr.mxu0 %v1972_v38  ;;  %2176 = vmatprep.subr.mxu1 %v1974_v41  ;;  %v5957_v38 = vld [vmem:[#allocation12 + $0xd8] sm:$0xff]  ;;  %v5961_v41 = vld [vmem:[#allocation12 + $0xc0] sm:$0xff] }
 0x789   :  { %2064 = vmatpush1.msra.mxu0 %v1971_v42  ;;  %2177 = vmatpush1.msra.mxu1 %v1973_v43  ;;  %v5963_v42 = vld [vmem:[#allocation12 + $0xd0] sm:$0xff]  ;;  %v5967_v43 = vld [vmem:[#allocation12 + $0xa8] sm:$0xff] }
 0x78a   :  { %2065 = vmatprep.subr.mxu0 %v1968_v44  ;;  %2178 = vmatprep.subr.mxu1 %v1970_v46  ;;  %v5969_v44 = vld [vmem:[#allocation12 + $0xb8] sm:$0xff]  ;;  %v5973_v46 = vld [vmem:[#allocation12 + $0xa0] sm:$0xff] }
 0x78b   :  { %2066 = vmatpush1.msra.mxu0 %v1967_v47  ;;  %2179 = vmatpush1.msra.mxu1 %v1969_v48  ;;  %v5975_v47 = vld [vmem:[#allocation12 + $0xb0] sm:$0xff]  ;;  %v5979_v48 = vld [vmem:[#allocation12 + $0x88] sm:$0xff] }
 0x78c   :  { %2067 = vmatprep.subr.mxu0 %v1964_v49  ;;  %2180 = vmatprep.subr.mxu1 %v1966_v50  ;;  %7290 = vst [vmem:[#allocation59_spill] sm:$0xff] %v5975_v47  ;;  %7291 = vst [vmem:[#allocation58_spill] sm:$0xff] %v5979_v48  ;;  %v5981_v49 = vld [vmem:[#allocation12 + $0x98] sm:$0xff]  ;;  %v5985_v50 = vld [vmem:[#allocation12 + $0x80] sm:$0xff] }
 0x78d   :  { %2068 = vmatpush1.msra.mxu0 %v1963_v51  ;;  %2181 = vmatpush1.msra.mxu1 %v1965_v52  ;;  %7292 = vst [vmem:[#allocation60_spill] sm:$0xff] %v5981_v49  ;;  %7293 = vst [vmem:[#allocation61_spill] sm:$0xff] %v5985_v50  ;;  %v5987_v51 = vld [vmem:[#allocation12 + $0x90] sm:$0xff]  ;;  %v5991_v52 = vld [vmem:[#allocation12 + $0x68] sm:$0xff] }
 0x78e   :  { %2069 = vmatprep.subr.mxu0 %v1960_v53  ;;  %2182 = vmatprep.subr.mxu1 %v1962_v55  ;;  %7294 = vst [vmem:[#allocation63_spill] sm:$0xff] %v5987_v51  ;;  %7295 = vst [vmem:[#allocation62_spill] sm:$0xff] %v5991_v52  ;;  %v5993_v53 = vld [vmem:[#allocation12 + $0x78] sm:$0xff]  ;;  %v5997_v55 = vld [vmem:[#allocation12 + $0x60] sm:$0xff] }
 0x78f   :  { %2070 = vmatpush1.msra.mxu0 %v1959_v56  ;;  %2183 = vmatpush1.msra.mxu1 %v1961_v12  ;;  %7296 = vst [vmem:[#allocation64_spill] sm:$0xff] %v5993_v53  ;;  %7297 = vst [vmem:[#allocation30_spill] sm:$0xff] %v5997_v55  ;;  %v5999_v56 = vld [vmem:[#allocation12 + $0x70] sm:$0xff]  ;;  %v6003_v12 = vld [vmem:[#allocation12 + $0x48] sm:$0xff] }
 0x790   :  { %2071 = vmatprep.subr.mxu0 %v1956_v20  ;;  %2184 = vmatprep.subr.mxu1 %v1958_v30  ;;  %7298 = vst [vmem:[#allocation31_spill] sm:$0xff] %v5999_v56  ;;  %7299 = vst [vmem:[#allocation65_spill] sm:$0xff] %v6003_v12  ;;  %v6005_v20 = vld [vmem:[#allocation12 + $0x58] sm:$0xff]  ;;  %v6009_v30 = vld [vmem:[#allocation12 + $0x40] sm:$0xff] }
 0x791   :  { %2072 = vmatpush1.msra.mxu0 %v1955_v19  ;;  %2105 = vmatprep.mubr.f32.mxu0 %v7278_v8  ;;  %7300 = vst [vmem:[#allocation67_spill] sm:$0xff] %v6005_v20  ;;  %7301 = vst [vmem:[#allocation66_spill] sm:$0xff] %v6009_v30  ;;  %v6011_v19 = vld [vmem:[#allocation12 + $0x50] sm:$0xff] }
 0x792   :  { %2185 = vmatpush1.msra.mxu1 %v1957_v23  ;;  %2218 = vmatprep.mubr.f32.mxu1 %v7278_v8  ;;  %7302 = vst [vmem:[#allocation68_spill] sm:$0xff] %v6011_v19  ;;  %v6015_v23 = vld [vmem:[#allocation12 + $0x28] sm:$0xff] }
 0x793   :  { %2106 = vmatmul.mubr.f32.vlgmr.msra.gmra.mxu0 %v7283_v14  ;;  %2219 = vmatmul.mubr.f32.vlgmr.msra.gmra.mxu1 %v7283_v14  ;;  %7303 = vst [vmem:[#allocation33_spill] sm:$0xff] %v6015_v23  ;;  %v6017_v14 = vld [vmem:[#allocation12 + $0x38] sm:$0xff] }
 0x794   :  { %2111 = vmatprep.mubr.f32.mxu0 %v7278_v8  ;;  %2224 = vmatprep.mubr.f32.mxu1 %v7278_v8  ;;  %7304 = vst [vmem:[#allocation34_spill] sm:$0xff] %v6017_v14 }
 0x795   :  { %2371 = vmatprep.subr.mxu0 %v5847_v15  ;;  %2442 = vmatprep.subr.mxu1 %v5849_v16 }
 0x796   :  { %2443 = vmatpush1.msra.mxu1 %v5855_v60 }
 0x797   :  { %2112 = vmatmul.mubr.f32.gmra.mxu0 %v7284_v21  ;;  %2225 = vmatmul.mubr.f32.gmra.mxu1 %v7284_v21  ;;  %v6021_v21 = vld [vmem:[#allocation12 + $0x20] sm:$0xff] }
 0x798   :  { %2117 = vmatprep.mubr.f32.mxu0 %v7278_v8  ;;  %2230 = vmatprep.mubr.f32.mxu1 %v7278_v8  ;;  %7305 = vst [vmem:[#allocation69_spill] sm:$0xff] %v6021_v21 }
 0x799   :  { %2444 = vmatprep.subr.mxu1 %v5861_v18 }
 0x79a   :  { %2445 = vmatpush1.msra.mxu1 %v5867_v57 }
 0x79b   :  { %2118 = vmatmul.mubr.f32.gmra.mxu0 %v7285_v13  ;;  %2231 = vmatmul.mubr.f32.gmra.mxu1 %v7285_v13  ;;  %v6023_v13 = vld [vmem:[#allocation12 + $0x30] sm:$0xff] }
 0x79c   :  { %2123 = vmatprep.mubr.f32.mxu0 %v7278_v8  ;;  %2236 = vmatprep.mubr.f32.mxu1 %v7278_v8  ;;  %7306 = vst [vmem:[#allocation71_spill] sm:$0xff] %v6023_v13 }
 0x79d   :  { %2446 = vmatprep.subr.mxu1 %v5873_v61 }
 0x79e   :  { %2447 = vmatpush1.msra.mxu1 %v5879_v45 }
 0x79f   :  { %2124 = vmatmul.mubr.f32.gmra.mxu0 %v7286_v22  ;;  %2237 = vmatmul.mubr.f32.gmra.mxu1 %v7286_v22  ;;  %v6025_v22 = vld [vmem:[#allocation12 + $0x8] sm:$0xff] }
 0x7a0   :  { %2129 = vmatprep.mubr.f32.mxu0 %v7278_v8  ;;  %2242 = vmatprep.mubr.f32.mxu1 %v7278_v8  ;;  %7307 = vst [vmem:[#allocation70_spill] sm:$0xff] %v6025_v22 }
 0x7a1   :  { %2448 = vmatprep.subr.mxu1 %v5885_v11 }
 0x7a2   :  { %2449 = vmatpush1.msra.mxu1 %v5891_v36 }
 0x7a3   :  { %2130 = vmatmul.mubr.f32.gmra.mxu0 %v7287_v17  ;;  %2243 = vmatmul.mubr.f32.gmra.mxu1 %v7287_v17  ;;  %v6029_v17 = vld [vmem:[#allocation12 + $0x18] sm:$0xff] }
 0x7a4   :  { %2135 = vmatprep.mubr.f32.mxu0 %v7278_v8  ;;  %2248 = vmatprep.mubr.f32.mxu1 %v7278_v8  ;;  %7308 = vst [vmem:[#allocation72_spill] sm:$0xff] %v6029_v17 }
 0x7a5   :  { %2450 = vmatprep.subr.mxu1 %v5897_v3 }
 0x7a6   :  { %2451 = vmatpush1.msra.mxu1 %v5903_v54 }
 0x7a7   :  { %2136 = vmatmul.mubr.f32.gmra.mxu0 %v5737_v10  ;;  %2249 = vmatmul.mubr.f32.gmra.mxu1 %v5737_v10  ;;  %v5853_v10 = vld [vmem:[#allocation12 + $0x1e0] sm:$0xff] }
 0x7a8   :  { %2141 = vmatprep.mubr.f32.mxu0 %v7278_v8  ;;  %2254 = vmatprep.mubr.f32.mxu1 %v7278_v8 }
 0x7a9   :  { %2372 = vmatpush1.msra.mxu0 %v5853_v10  ;;  %2452 = vmatprep.subr.mxu1 %v5909_v58 }
 0x7aa   :  { %2453 = vmatpush1.msra.mxu1 %v5915_v63 }
 0x7ab   :  { %2142 = vmatmul.mubr.f32.gmra.mxu0 %v5813_v32  ;;  %2255 = vmatmul.mubr.f32.gmra.mxu1 %v5813_v32  ;;  %v5859_v32 = vld [vmem:[#allocation12 + $0x1c8] sm:$0xff] }
 0x7ac   :  { %2147 = vmatprep.mubr.f32.mxu0 %v7278_v8  ;;  %2260 = vmatprep.mubr.f32.mxu1 %v7278_v8 }
 0x7ad   :  { %2373 = vmatprep.subr.mxu0 %v5859_v32  ;;  %2454 = vmatprep.subr.mxu1 %v5921_v27 }
 0x7ae   :  { %2374 = vmatpush1.msra.mxu0 %v5865_v6  ;;  %2455 = vmatpush1.msra.mxu1 %v5927_v35 }
 0x7af   :  { %2375 = vmatprep.subr.mxu0 %v5871_v59  ;;  %2456 = vmatprep.subr.mxu1 %v5933_v39 }
 0x7b0   :  { %2376 = vmatpush1.msra.mxu0 %v5877_v9  ;;  %2457 = vmatpush1.msra.mxu1 %v5939_v24 }
 0x7b1   :  { %2377 = vmatprep.subr.mxu0 %v5883_v2  ;;  %2458 = vmatprep.subr.mxu1 %v5945_v26 }
 0x7b2   :  { %2378 = vmatpush1.msra.mxu0 %v5889_v4  ;;  %2459 = vmatpush1.msra.mxu1 %v5951_v29 }
 0x7b3   :  { %2379 = vmatprep.subr.mxu0 %v5895_v0  ;;  %2460 = vmatprep.subr.mxu1 %v5957_v38 }
 0x7b4   :  { %2380 = vmatpush1.msra.mxu0 %v5901_v7  ;;  %2461 = vmatpush1.msra.mxu1 %v5963_v42 }
 0x7b5   :  { %2381 = vmatprep.subr.mxu0 %v5907_v62  ;;  %2462 = vmatprep.subr.mxu1 %v5969_v44 }
 0x7b6   :  { %2382 = vmatpush1.msra.mxu0 %v5913_v1  ;;  %2463 = vmatpush1.msra.mxu1 %v5975_v47 }
 0x7b7   :  { %2383 = vmatprep.subr.mxu0 %v5919_v5  ;;  %2464 = vmatprep.subr.mxu1 %v5981_v49 }
 0x7b8   :  { %2384 = vmatpush1.msra.mxu0 %v5925_v34  ;;  %2465 = vmatpush1.msra.mxu1 %v5987_v51 }
 0x7b9   :  { %2385 = vmatprep.subr.mxu0 %v5931_v37  ;;  %2466 = vmatprep.subr.mxu1 %v5993_v53 }
 0x7ba   :  { %2386 = vmatpush1.msra.mxu0 %v5937_v40  ;;  %2467 = vmatpush1.msra.mxu1 %v5999_v56 }
 0x7bb   :  { %2387 = vmatprep.subr.mxu0 %v5943_v25  ;;  %2468 = vmatprep.subr.mxu1 %v6005_v20 }
 0x7bc   :  { %2388 = vmatpush1.msra.mxu0 %v5949_v28  ;;  %2469 = vmatpush1.msra.mxu1 %v6011_v19  ;;  %v6031_v19 = vld [vmem:[#allocation12] sm:$0xff] }
 0x7bd   :  { %2389 = vmatprep.subr.mxu0 %v5955_v31  ;;  %2470 = vmatprep.subr.mxu1 %v6017_v14  ;;  %7309 = vst [vmem:[#allocation54_spill] sm:$0xff] %v6031_v19 }
 0x7be   :  { %2390 = vmatpush1.msra.mxu0 %v5961_v41  ;;  %2471 = vmatpush1.msra.mxu1 %v6023_v13  ;;  %v7311_v13 = vld [vmem:[#allocation77_spill] sm:$0xff] }
 0x7bf   :  { %2391 = vmatprep.subr.mxu0 %v5967_v43  ;;  %2472 = vmatprep.subr.mxu1 %v6029_v17  ;;  %v7313_v17 = vld [vmem:[#allocation78_spill] sm:$0xff] }
 0x7c0   :  { %2392 = vmatpush1.msra.mxu0 %v5973_v46 }
 0x7c1   :  { %2393 = vmatprep.subr.mxu0 %v5979_v48 }
 0x7c2   :  { %2394 = vmatpush1.msra.mxu0 %v5985_v50 }
 0x7c3   :  { %2395 = vmatprep.subr.mxu0 %v5991_v52 }
 0x7c4   :  { %2396 = vmatpush1.msra.mxu0 %v5997_v55 }
 0x7c5   :  { %2397 = vmatprep.subr.mxu0 %v6003_v12  ;;  %v7312_v12 = vld [vmem:[#allocation79_spill] sm:$0xff] }
 0x7c6   :  { %2398 = vmatpush1.msra.mxu0 %v6009_v30  ;;  %v6033_v30 = vld [vmem:[#allocation12 + $0x10] sm:$0xff] }
 0x7c7   :  { %2399 = vmatprep.subr.mxu0 %v6015_v23  ;;  %7310 = vst [vmem:[#allocation56_spill] sm:$0xff] %v6033_v30  ;;  %2473 = vmatpush1.msra.mxu1 %v6033_v30  ;;  %v7314_v30 = vld [vmem:[#allocation80_spill] sm:$0xff] }
 0x7c8   :  { %2400 = vmatpush1.msra.mxu0 %v6021_v21  ;;  %2613 = vmatprep.subr.mxu1 %v5849_v16 }
 0x7c9   :  { %2401 = vmatprep.subr.mxu0 %v6025_v22 }
 0x7ca   :  { %2402 = vmatpush1.msra.mxu0 %v6031_v19 }
 0x7cb   :  { %2542 = vmatprep.subr.mxu0 %v5847_v15 }
 0x832   :  { %v1843_v21 = vpop.f32.mrf.mxu0  ;;  %v1914_v22 = vpop.f32.mrf.mxu1 }
 0x833   :  { %v1844_v14 = vadd.f32 %v1843_v21, %v7311_v13  ;;  %v1915_v53 = vadd.f32 %v1914_v22, %v7313_v17  ;;  %v7320_v17 = vld [vmem:[#allocation31_spill] sm:$0xff] }
 0x834   :  { %v1845_v23 = vpop.f32.mrf.mxu0  ;;  %v1916_v19 = vpop.f32.mrf.mxu1 }
 0x835   :  { %v3927_v20 = vmul.f32 -1.442695, %v1844_v14  ;;  %v1846_v56 = vadd.f32 %v1845_v23, %v7312_v12  ;;  %v3929_v52 = vmul.f32 -1.442695, %v1915_v53  ;;  %v1917_v51 = vadd.f32 %v1916_v19, %v7314_v30  ;;  %v7318_v30 = vld [vmem:[#allocation64_spill] sm:$0xff]  ;;  %v7319_v19 = vld [vmem:[#allocation30_spill] sm:$0xff] }
 0x837   :  { %4137 = vpow2.f32 %v3927_v20  ;;  %v3928_v55 = vmul.f32 -1.442695, %v1846_v56 }
 0x839   :  { %4139 = vpow2.f32 %v3928_v55 }
 0x83a   :  { %4141 = vpow2.f32 %v3929_v52 }
 0x83b   :  { %4143 = vtanh.f32 %v1917_v51  ;;  %v7317_v51 = vld [vmem:[#allocation62_spill] sm:$0xff] }
 0x844   :  { %v4138_v15 = vpop.eup %4137 }
 0x845   :  { %v1928_v50 = vadd.f32 1.0, %v4138_v15 }
 0x846   :  { %v4140_v16 = vpop.eup %4139 }
 0x847   :  { %4145 = vrcp.f32 %v1928_v50  ;;  %v1929_v21 = vadd.f32 1.0, %v4140_v16  ;;  %v4142_v14 = vpop.eup %4141  ;;  %v2364_v16 = vld [vmem:[#allocation15 + $0x8] sm:$0xff]  ;;  %v7316_v50 = vld [vmem:[#allocation63_spill] sm:$0xff] }
 0x848   :  { %v4144_v12 = vpop.eup %4143  ;;  %v1930_v23 = vadd.f32 1.0, %v4142_v14  ;;  %v7322_v14 = vld [vmem:[#allocation67_spill] sm:$0xff] }
 0x849   :  { %4147 = vrcp.f32 %v1929_v21  ;;  %v7321_v21 = vld [vmem:[#allocation65_spill] sm:$0xff] }
 0x84a   :  { %4149 = vrcp.f32 %v1930_v23  ;;  %v7327_v23 = vld [vmem:[#allocation69_spill] sm:$0xff] }
 0x854   :  { %v4146_v20 = vpop.eup %4145 }
 0x855   :  { %v1939_v56 = vmul.f32 %v4146_v20, %v4144_v12  ;;  %v7323_v12 = vld [vmem:[#allocation66_spill] sm:$0xff]  ;;  %v7324_v20 = vld [vmem:[#allocation68_spill] sm:$0xff] }
 0x856   :  { %v4148_v55 = vpop.eup %4147 }
 0x857   :  { %v1938_v13 = vmul.f32 %v4148_v55, %v5810_v33  ;;  %v4150_v53 = vpop.eup %4149  ;;  %v7315_v33 = vld [vmem:[#allocation61_spill] sm:$0xff]  ;;  %v7326_v55 = vld [vmem:[#allocation34_spill] sm:$0xff] }
 0x859   :  { %v1940_v22 = vadd.f32 %v1939_v56, %v1938_v13  ;;  %v7325_v56 = vld [vmem:[#allocation33_spill] sm:$0xff]  ;;  %v7328_v13 = vld [vmem:[#allocation71_spill] sm:$0xff] }
 0x85b   :  { %1946 = vst [vmem:[#allocation22] sm:$0xff] %v1940_v22  ;;  %4151 = vtanh.f32 %v1940_v22  ;;  %v7329_v22 = vld [vmem:[#allocation70_spill] sm:$0xff] }
 0x868   :  { %v4152_v15 = vpop.eup %4151 }
 0x869   :  { %v1942_v52 = vmul.f32 %v4152_v15, %v4150_v53  ;;  %v7330_v53 = vld [vmem:[#allocation72_spill] sm:$0xff]  ;;  %v7331_v15 = vld [vmem:[#allocation54_spill] sm:$0xff] }
 0x86b   :  { %2148 = vmatmul.mubr.f32.gmra.mxu0 %v1942_v52  ;;  %1945 = vst [vmem:[#allocation20] sm:$0xff] %v1942_v52  ;;  %2261 = vmatmul.mubr.f32.gmra.mxu1 %v1942_v52  ;;  %v7332_v52 = vld [vmem:[#allocation56_spill] sm:$0xff] }
 0x86c   :  { %2435 = vmatprep.mubr.f32.mxu0 %v7278_v8  ;;  %2506 = vmatprep.mubr.f32.mxu1 %v7278_v8 }
 0x86f   :  { %2436 = vmatmul.mubr.f32.vlgmr.msra.gmra.mxu0 %v2364_v16  ;;  %2507 = vmatmul.mubr.f32.vlgmr.msra.gmra.mxu1 %v2364_v16  ;;  %v7333_v16 = vld [vmem:[#allocation52_spill] sm:$0xff] }
 0x870   :  { %2543 = vmatpush1.msra.mxu0 %v5853_v10  ;;  %2614 = vmatpush1.msra.mxu1 %v5855_v60 }
 0x871   :  { %2544 = vmatprep.subr.mxu0 %v5859_v32  ;;  %2615 = vmatprep.subr.mxu1 %v5861_v18 }
 0x872   :  { %2545 = vmatpush1.msra.mxu0 %v5865_v6  ;;  %2616 = vmatpush1.msra.mxu1 %v5867_v57 }
 0x873   :  { %2546 = vmatprep.subr.mxu0 %v5871_v59  ;;  %2617 = vmatprep.subr.mxu1 %v5873_v61 }
 0x874   :  { %2547 = vmatpush1.msra.mxu0 %v5877_v9  ;;  %2618 = vmatpush1.msra.mxu1 %v5879_v45 }
 0x875   :  { %2548 = vmatprep.subr.mxu0 %v5883_v2  ;;  %2619 = vmatprep.subr.mxu1 %v5885_v11 }
 0x876   :  { %2549 = vmatpush1.msra.mxu0 %v5889_v4  ;;  %2620 = vmatpush1.msra.mxu1 %v5891_v36 }
 0x877   :  { %2550 = vmatprep.subr.mxu0 %v5895_v0  ;;  %2621 = vmatprep.subr.mxu1 %v5897_v3 }
 0x878   :  { %2551 = vmatpush1.msra.mxu0 %v5901_v7  ;;  %2622 = vmatpush1.msra.mxu1 %v5903_v54 }
 0x879   :  { %2552 = vmatprep.subr.mxu0 %v5907_v62  ;;  %2623 = vmatprep.subr.mxu1 %v5909_v58 }
 0x87a   :  { %2553 = vmatpush1.msra.mxu0 %v5913_v1  ;;  %2624 = vmatpush1.msra.mxu1 %v5915_v63 }
 0x87b   :  { %2554 = vmatprep.subr.mxu0 %v5919_v5  ;;  %2625 = vmatprep.subr.mxu1 %v5921_v27 }
 0x87c   :  { %2555 = vmatpush1.msra.mxu0 %v5925_v34  ;;  %2626 = vmatpush1.msra.mxu1 %v5927_v35 }
 0x87d   :  { %2556 = vmatprep.subr.mxu0 %v5931_v37  ;;  %2627 = vmatprep.subr.mxu1 %v5933_v39 }
 0x87e   :  { %2557 = vmatpush1.msra.mxu0 %v5937_v40  ;;  %2628 = vmatpush1.msra.mxu1 %v5939_v24 }
 0x87f   :  { %2558 = vmatprep.subr.mxu0 %v5943_v25  ;;  %2629 = vmatprep.subr.mxu1 %v5945_v26 }
 0x880   :  { %2559 = vmatpush1.msra.mxu0 %v5949_v28  ;;  %2630 = vmatpush1.msra.mxu1 %v5951_v29 }
 0x881   :  { %2560 = vmatprep.subr.mxu0 %v5955_v31  ;;  %2631 = vmatprep.subr.mxu1 %v5957_v38 }
 0x882   :  { %2561 = vmatpush1.msra.mxu0 %v5961_v41  ;;  %2632 = vmatpush1.msra.mxu1 %v5963_v42 }
 0x883   :  { %2562 = vmatprep.subr.mxu0 %v5967_v43  ;;  %2633 = vmatprep.subr.mxu1 %v5969_v44 }
 0x884   :  { %2563 = vmatpush1.msra.mxu0 %v5973_v46  ;;  %2634 = vmatpush1.msra.mxu1 %v5975_v47 }
 0x885   :  { %2564 = vmatprep.subr.mxu0 %v5979_v48  ;;  %2635 = vmatprep.subr.mxu1 %v5981_v49 }
 0x886   :  { %2565 = vmatpush1.msra.mxu0 %v7315_v33  ;;  %2636 = vmatpush1.msra.mxu1 %v7316_v50 }
 0x887   :  { %2566 = vmatprep.subr.mxu0 %v7317_v51  ;;  %2637 = vmatprep.subr.mxu1 %v7318_v30 }
 0x888   :  { %2567 = vmatpush1.msra.mxu0 %v7319_v19  ;;  %2638 = vmatpush1.msra.mxu1 %v7320_v17 }
 0x889   :  { %2568 = vmatprep.subr.mxu0 %v7321_v21  ;;  %2639 = vmatprep.subr.mxu1 %v7322_v14 }
 0x88a   :  { %2569 = vmatpush1.msra.mxu0 %v7323_v12  ;;  %2640 = vmatpush1.msra.mxu1 %v7324_v20  ;;  %v2220_v20 = vpop.f32.mrf.mxu1 }
 0x88b   :  { %2570 = vmatprep.subr.mxu0 %v7325_v56  ;;  %2641 = vmatprep.subr.mxu1 %v7326_v55  ;;  %v7334_v56 = vld [vmem:[#allocation57_spill] sm:$0xff]  ;;  %v2107_v55 = vpop.f32.mrf.mxu0 }
 0x88c   :  { %2571 = vmatpush1.msra.mxu0 %v7327_v23  ;;  %2642 = vmatpush1.msra.mxu1 %v7328_v13 }
 0x88d   :  { %2572 = vmatprep.subr.mxu0 %v7329_v22  ;;  %2643 = vmatprep.subr.mxu1 %v7330_v53  ;;  %v2109_v23 = vpop.f32.mrf.mxu0  ;;  %v2222_v22 = vpop.f32.mrf.mxu1 }
 0x88e   :  { %2573 = vmatpush1.msra.mxu0 %v7331_v15  ;;  %2606 = vmatprep.mubr.f32.mxu0 %v7278_v8 }
 0x88f   :  { %2644 = vmatpush1.msra.mxu1 %v7332_v52  ;;  %2677 = vmatprep.mubr.f32.mxu1 %v7278_v8  ;;  %v6114_v13 = vpop.f32.mrf.mxu0  ;;  %v6118_v53 = vpop.f32.mrf.mxu1 }
 0x890   :  { %2713 = vmatprep.subr.mxu0 %v7333_v16  ;;  %2784 = vmatprep.subr.mxu1 %v7334_v56  ;;  %7335 = vst [vmem:[#allocation36_spill] sm:$0xff] %v6114_v13  ;;  %7337 = vst [vmem:[#allocation38_spill] sm:$0xff] %v6118_v53 }
 0x891   :  { %v6116_v12 = vpop.f32.mrf.mxu0  ;;  %v6122_v14 = vpop.f32.mrf.mxu1 }
 0x892   :  { %7336 = vst [vmem:[#allocation37_spill] sm:$0xff] %v6116_v12  ;;  %7339 = vst [vmem:[#allocation40_spill] sm:$0xff] %v6122_v14 }
 0x893   :  { %v6120_v15 = vpop.f32.mrf.mxu0  ;;  %v6126_v8 = vpop.f32.mrf.mxu1 }
 0x894   :  { %7338 = vst [vmem:[#allocation39_spill] sm:$0xff] %v6120_v15  ;;  %7341 = vst [vmem:[#allocation42_spill] sm:$0xff] %v6126_v8 }
 0x895   :  { %v6124_v52 = vpop.f32.mrf.mxu0  ;;  %v6130_v56 = vpop.f32.mrf.mxu1 }
 0x896   :  { %7340 = vst [vmem:[#allocation41_spill] sm:$0xff] %v6124_v52  ;;  %7343 = vst [vmem:[#allocation44_spill] sm:$0xff] %v6130_v56 }
 0x897   :  { %v6128_v16 = vpop.f32.mrf.mxu0  ;;  %v6134_v13 = vpop.f32.mrf.mxu1 }
 0x898   :  { %7342 = vst [vmem:[#allocation43_spill] sm:$0xff] %v6128_v16  ;;  %7345 = vst [vmem:[#allocation46_spill] sm:$0xff] %v6134_v13  ;;  %v2019_v13 = vld [vmem:[#allocation13] sm:$0xf] }
 0x899   :  { %v6132_v21 = vpop.f32.mrf.mxu0  ;;  %v6138_v12 = vpop.f32.mrf.mxu1 }
 0x89a   :  { %7344 = vst [vmem:[#allocation45_spill] sm:$0xff] %v6132_v21  ;;  %7347 = vst [vmem:[#allocation48_spill] sm:$0xff] %v6138_v12  ;;  %v7357_v12 = vld [vmem:[#allocation53_spill] sm:$0xff] }
 0x89b   :  { %v6136_v17 = vpop.f32.mrf.mxu0  ;;  %v6142_v15 = vpop.f32.mrf.mxu1  ;;  %v7358_v19 = vsub.s32 0, %v7357_v12  ;;  %v7368_v49 = vsub.s32 2, %v7357_v12 }
 0x89c   :  { %7346 = vst [vmem:[#allocation47_spill] sm:$0xff] %v6136_v17  ;;  %7349 = vst [vmem:[#allocation50_spill] sm:$0xff] %v6142_v15 }
 0x89d   :  { %v6140_v53 = vpop.f32.mrf.mxu0  ;;  %v6146_v52 = vpop.f32.mrf.mxu1 }
 0x89e   :  { %7348 = vst [vmem:[#allocation49_spill] sm:$0xff] %v6140_v53  ;;  %7351 = vst [vmem:[#allocation75_spill] sm:$0xff] %v6146_v52  ;;  %v6160_v53 = vrot.slane %v2019_v13, %v7358_v19  ;;  %v7362_v52 = vsub.s32 1, %v7357_v12 }
 0x89f   :  { %v6144_v14 = vpop.f32.mrf.mxu0  ;;  %v6150_v16 = vpop.f32.mrf.mxu1 }
 0x8a0   :  { %7350 = vst [vmem:[#allocation73_spill] sm:$0xff] %v6144_v14  ;;  %7353 = vst [vmem:[#allocation76_spill] sm:$0xff] %v6150_v16 }
 0x8a1   :  { %v6148_v8 = vpop.f32.mrf.mxu0  ;;  %v6154_v21 = vpop.f32.mrf.mxu1  ;;  %7359 = vst [vmem:[#allocation55_spill] sm:$0xff] %v6160_v53 }
 0x8a2   :  { %7352 = vst [vmem:[#allocation74_spill] sm:$0xff] %v6148_v8  ;;  %7355 = vst [vmem:[#allocation32_spill] sm:$0xff] %v6154_v21  ;;  %v6168_v8 = vrot.slane %v2019_v13, %v7362_v52 }
 0x8a3   :  { %v6152_v56 = vpop.f32.mrf.mxu0  ;;  %v6162_v15 = vpop.f32.mrf.mxu1 }
 0x8a4   :  { %7354 = vst [vmem:[#allocation81_spill] sm:$0xff] %v6152_v56  ;;  %7360 = vst [vmem:[#allocation51_spill] sm:$0xff] %v6162_v15  ;;  %v2108_v56 = vadd.f32 %v2107_v55, %v6160_v53 }
 0x8a5   :  { %v6156_v17 = vpop.f32.mrf.mxu0  ;;  %7363 = vst [vmem:[#allocation79_spill] sm:$0xff] %v6168_v8  ;;  %v6173_v21 = vpop.f32.mrf.mxu1 }
 0x8a6   :  { %7356 = vst [vmem:[#allocation35_spill] sm:$0xff] %v6156_v17  ;;  %7365 = vst [vmem:[#allocation80_spill] sm:$0xff] %v6173_v21  ;;  %v2110_v17 = vadd.f32 %v2109_v23, %v6168_v8  ;;  %v7370_v23 = vsub.s32 3, %v7357_v12 }
 0x8a8   :  { %v6187_v8 = vrot.slane %v2019_v13, %v7370_v23 }
 0x92b   :  { %v6164_v14 = vpop.f32.mrf.mxu0  ;;  %v6176_v51 = vpop.f32.mrf.mxu1 }
 0x92c   :  { %7361 = vst [vmem:[#allocation77_spill] sm:$0xff] %v6164_v14  ;;  %7366 = vst [vmem:[#allocation53_spill] sm:$0xff] %v6176_v51  ;;  %v2366_v51 = vld [vmem:[#allocation16 + $0x8] sm:$0xff] }
 0x92d   :  { %v6170_v16 = vpop.f32.mrf.mxu0  ;;  %v6178_v14 = vpop.f32.mrf.mxu1 }
 0x92e   :  { %7364 = vst [vmem:[#allocation78_spill] sm:$0xff] %v6170_v16  ;;  %7367 = vst [vmem:[#allocation82_spill] sm:$0xff] %v6178_v14  ;;  %v6182_v16 = vrot.slane %v2019_v13, %v7368_v49 }
 0x92f   :  { %v2437_v30 = vpop.f32.mrf.mxu0  ;;  %v2508_v55 = vpop.f32.mrf.mxu1 }
 0x930   :  { %v2438_v19 = vadd.f32 %v2437_v30, %v2108_v56  ;;  %7369 = vst [vmem:[#allocation83_spill] sm:$0xff] %v6182_v16  ;;  %v2221_v21 = vadd.f32 %v2220_v20, %v6182_v16 }
 0x931   :  { %v2439_v50 = vpop.f32.mrf.mxu0  ;;  %v2510_v56 = vpop.f32.mrf.mxu1 }
 0x932   :  { %v3930_v15 = vmul.f32 -1.442695, %v2438_v19  ;;  %v2440_v33 = vadd.f32 %v2439_v50, %v2110_v17  ;;  %v2509_v30 = vadd.f32 %v2508_v55, %v2221_v21  ;;  %v2223_v50 = vadd.f32 %v2222_v22, %v6187_v8 }
 0x934   :  { %4153 = vpow2.f32 %v3930_v15  ;;  %v3931_v52 = vmul.f32 -1.442695, %v2440_v33  ;;  %v3932_v17 = vmul.f32 -1.442695, %v2509_v30  ;;  %v2511_v15 = vadd.f32 %v2510_v56, %v2223_v50  ;;  %v7373_v50 = vld [vmem:[#allocation63_spill] sm:$0xff] }
 0x936   :  { %4155 = vpow2.f32 %v3931_v52 }
 0x937   :  { %4157 = vpow2.f32 %v3932_v17  ;;  %v7374_v17 = vld [vmem:[#allocation62_spill] sm:$0xff] }
 0x941   :  { %v4154_v19 = vpop.eup %4153 }
 0x942   :  { %v2522_v33 = vadd.f32 1.0, %v4154_v19  ;;  %v7375_v19 = vld [vmem:[#allocation64_spill] sm:$0xff] }
 0x943   :  { %v4156_v14 = vpop.eup %4155 }
 0x944   :  { %4159 = vrcp.f32 %v2522_v33  ;;  %v2523_v49 = vadd.f32 1.0, %v4156_v14  ;;  %v4158_v52 = vpop.eup %4157  ;;  %v7372_v14 = vld [vmem:[#allocation61_spill] sm:$0xff]  ;;  %v7377_v33 = vld [vmem:[#allocation31_spill] sm:$0xff] }
 0x945   :  { %4161 = vtanh.f32 %v2511_v15  ;;  %v2524_v23 = vadd.f32 1.0, %v4158_v52  ;;  %v7376_v15 = vld [vmem:[#allocation30_spill] sm:$0xff]  ;;  %v7379_v52 = vld [vmem:[#allocation67_spill] sm:$0xff] }
 0x946   :  { %4163 = vrcp.f32 %v2523_v49  ;;  %v7378_v49 = vld [vmem:[#allocation65_spill] sm:$0xff] }
 0x947   :  { %4165 = vrcp.f32 %v2524_v23  ;;  %v7383_v23 = vld [vmem:[#allocation34_spill] sm:$0xff] }
 0x951   :  { %v4160_v20 = vpop.eup %4159 }
 0x952   :  { %v4162_v12 = vpop.eup %4161 }
 0x953   :  { %v4164_v13 = vpop.eup %4163  ;;  %v2533_v55 = vmul.f32 %v4162_v12, %v4160_v20  ;;  %v7380_v20 = vld [vmem:[#allocation66_spill] sm:$0xff]  ;;  %v7381_v12 = vld [vmem:[#allocation68_spill] sm:$0xff] }
 0x954   :  { %v2532_v21 = vmul.f32 %v4164_v13, %v2366_v51  ;;  %v4166_v22 = vpop.eup %4165  ;;  %v7371_v51 = vld [vmem:[#allocation60_spill] sm:$0xff]  ;;  %v7382_v13 = vld [vmem:[#allocation33_spill] sm:$0xff] }
 0x956   :  { %v6190_v16 = vadd.f32 %v2533_v55, %v2532_v21  ;;  %v7384_v21 = vld [vmem:[#allocation69_spill] sm:$0xff]  ;;  %v7385_v55 = vld [vmem:[#allocation71_spill] sm:$0xff] }
 0x958   :  { %4167 = vtanh.f32 %v6190_v16 }
 0x965   :  { %v4168_v30 = vpop.eup %4167 }
 0x966   :  { %v2536_v56 = vmul.f32 %v4168_v30, %v4166_v22  ;;  %v7386_v22 = vld [vmem:[#allocation70_spill] sm:$0xff]  ;;  %v7387_v30 = vld [vmem:[#allocation72_spill] sm:$0xff] }
 0x968   :  { %2607 = vmatmul.mubr.f32.vlgmr.msra.gmra.mxu0 %v2536_v56  ;;  %2678 = vmatmul.mubr.f32.vlgmr.msra.gmra.mxu1 %v2536_v56  ;;  %v7388_v56 = vld [vmem:[#allocation54_spill] sm:$0xff] }
 0x969   :  { %2714 = vmatpush1.msra.mxu0 %v5853_v10  ;;  %2785 = vmatpush1.msra.mxu1 %v5855_v60 }
 0x96a   :  { %2715 = vmatprep.subr.mxu0 %v5859_v32  ;;  %2786 = vmatprep.subr.mxu1 %v5861_v18 }
 0x96b   :  { %2716 = vmatpush1.msra.mxu0 %v5865_v6  ;;  %2787 = vmatpush1.msra.mxu1 %v5867_v57 }
 0x96c   :  { %2717 = vmatprep.subr.mxu0 %v5871_v59  ;;  %2788 = vmatprep.subr.mxu1 %v5873_v61 }
 0x96d   :  { %2718 = vmatpush1.msra.mxu0 %v5877_v9  ;;  %2789 = vmatpush1.msra.mxu1 %v5879_v45 }
 0x96e   :  { %2719 = vmatprep.subr.mxu0 %v5883_v2  ;;  %2790 = vmatprep.subr.mxu1 %v5885_v11 }
 0x96f   :  { %2720 = vmatpush1.msra.mxu0 %v5889_v4  ;;  %2791 = vmatpush1.msra.mxu1 %v5891_v36 }
 0x970   :  { %2721 = vmatprep.subr.mxu0 %v5895_v0  ;;  %2792 = vmatprep.subr.mxu1 %v5897_v3 }
 0x971   :  { %2722 = vmatpush1.msra.mxu0 %v5901_v7  ;;  %2793 = vmatpush1.msra.mxu1 %v5903_v54 }
 0x972   :  { %2723 = vmatprep.subr.mxu0 %v5907_v62  ;;  %2794 = vmatprep.subr.mxu1 %v5909_v58 }
 0x973   :  { %2724 = vmatpush1.msra.mxu0 %v5913_v1  ;;  %2795 = vmatpush1.msra.mxu1 %v5915_v63 }
 0x974   :  { %2725 = vmatprep.subr.mxu0 %v5919_v5  ;;  %2796 = vmatprep.subr.mxu1 %v5921_v27 }
 0x975   :  { %2726 = vmatpush1.msra.mxu0 %v5925_v34  ;;  %2797 = vmatpush1.msra.mxu1 %v5927_v35 }
 0x976   :  { %2727 = vmatprep.subr.mxu0 %v5931_v37  ;;  %2798 = vmatprep.subr.mxu1 %v5933_v39 }
 0x977   :  { %2728 = vmatpush1.msra.mxu0 %v5937_v40  ;;  %2799 = vmatpush1.msra.mxu1 %v5939_v24 }
 0x978   :  { %2729 = vmatprep.subr.mxu0 %v5943_v25  ;;  %2800 = vmatprep.subr.mxu1 %v5945_v26 }
 0x979   :  { %2730 = vmatpush1.msra.mxu0 %v5949_v28  ;;  %2801 = vmatpush1.msra.mxu1 %v5951_v29 }
 0x97a   :  { %2731 = vmatprep.subr.mxu0 %v5955_v31  ;;  %2802 = vmatprep.subr.mxu1 %v5957_v38 }
 0x97b   :  { %2732 = vmatpush1.msra.mxu0 %v5961_v41  ;;  %2803 = vmatpush1.msra.mxu1 %v5963_v42 }
 0x97c   :  { %2733 = vmatprep.subr.mxu0 %v5967_v43  ;;  %2804 = vmatprep.subr.mxu1 %v5969_v44 }
 0x97d   :  { %2734 = vmatpush1.msra.mxu0 %v5973_v46  ;;  %2805 = vmatpush1.msra.mxu1 %v5975_v47 }
 0x97e   :  { %2735 = vmatprep.subr.mxu0 %v5979_v48  ;;  %2806 = vmatprep.subr.mxu1 %v7371_v51  ;;  %v7398_v51 = vld [vmem:[#allocation40_spill] sm:$0xff] }
 0x97f   :  { %2736 = vmatpush1.msra.mxu0 %v7372_v14  ;;  %2807 = vmatpush1.msra.mxu1 %v7373_v50  ;;  %v7397_v50 = vld [vmem:[#allocation38_spill] sm:$0xff] }
 0x980   :  { %2737 = vmatprep.subr.mxu0 %v7374_v17  ;;  %2808 = vmatprep.subr.mxu1 %v7375_v19 }
 0x981   :  { %2738 = vmatpush1.msra.mxu0 %v7376_v15  ;;  %2809 = vmatpush1.msra.mxu1 %v7377_v33 }
 0x982   :  { %2739 = vmatprep.subr.mxu0 %v7378_v49  ;;  %2810 = vmatprep.subr.mxu1 %v7379_v52  ;;  %v7389_v49 = vmov 0.0   ;;  %v7390_v52 = vld [vmem:[#allocation56_spill] sm:$0xff] }
 0x983   :  { %2740 = vmatpush1.msra.mxu0 %v7380_v20  ;;  %2811 = vmatpush1.msra.mxu1 %v7381_v12  ;;  %v7391_v12 = vld [vmem:[#allocation52_spill] sm:$0xff]  ;;  %v7394_v20 = vld [vmem:[#allocation79_spill] sm:$0xff] }
 0x984   :  { %2741 = vmatprep.subr.mxu0 %v7382_v13  ;;  %2812 = vmatprep.subr.mxu1 %v7383_v23  ;;  %v7392_v13 = vld [vmem:[#allocation57_spill] sm:$0xff] }
 0x985   :  { %2742 = vmatpush1.msra.mxu0 %v7384_v21  ;;  %2813 = vmatpush1.msra.mxu1 %v7385_v55  ;;  %v7393_v21 = vld [vmem:[#allocation36_spill] sm:$0xff] }
 0x986   :  { %2743 = vmatprep.subr.mxu0 %v7386_v22  ;;  %2814 = vmatprep.subr.mxu1 %v7387_v30  ;;  %v2114_v23 = vadd.f32 %v7393_v21, %v6160_v53  ;;  %v7395_v22 = vld [vmem:[#allocation37_spill] sm:$0xff]  ;;  %v2229_v21 = vadd.f32 %v7398_v51, %v6187_v8 }
 0x987   :  { %2744 = vmatpush1.msra.mxu0 %v7388_v56  ;;  %2777 = vmatprep.mubr.f32.mxu0 %v7389_v49  ;;  %v2116_v33 = vadd.f32 %v7395_v22, %v7394_v20 }
 0x988   :  { %2815 = vmatpush1.msra.mxu1 %v7390_v52  ;;  %2848 = vmatprep.mubr.f32.mxu1 %v7389_v49  ;;  %v7396_v49 = vld [vmem:[#allocation83_spill] sm:$0xff] }
 0x989   :  { %2884 = vmatprep.subr.mxu0 %v7391_v12  ;;  %2955 = vmatprep.subr.mxu1 %v7392_v13  ;;  %v2227_v12 = vadd.f32 %v7397_v50, %v7396_v49 }
 0xa28   :  { %v2608_v55 = vpop.f32.mrf.mxu0  ;;  %v2679_v52 = vpop.f32.mrf.mxu1 }
 0xa29   :  { %v2609_v30 = vadd.f32 %v2608_v55, %v2114_v23  ;;  %v2680_v14 = vadd.f32 %v2679_v52, %v2227_v12 }
 0xa2a   :  { %v2610_v15 = vpop.f32.mrf.mxu0  ;;  %v2681_v13 = vpop.f32.mrf.mxu1 }
 0xa2b   :  { %v3933_v56 = vmul.f32 -1.442695, %v2609_v30  ;;  %v2611_v19 = vadd.f32 %v2610_v15, %v2116_v33  ;;  %v3935_v53 = vmul.f32 -1.442695, %v2680_v14  ;;  %v2682_v48 = vadd.f32 %v2681_v13, %v2229_v21  ;;  %v7415_v14 = vld [vmem:[#allocation71_spill] sm:$0xff]  ;;  %v7416_v13 = vld [vmem:[#allocation70_spill] sm:$0xff] }
 0xa2c   :  { %v7418_v21 = vld [vmem:[#allocation54_spill] sm:$0xff] }
 0xa2d   :  { %4169 = vpow2.f32 %v3933_v56  ;;  %v3934_v17 = vmul.f32 -1.442695, %v2611_v19  ;;  %v7417_v56 = vld [vmem:[#allocation72_spill] sm:$0xff] }
 0xa2f   :  { %4171 = vpow2.f32 %v3934_v17 }
 0xa30   :  { %4173 = vpow2.f32 %v3935_v53 }
 0xa31   :  { %4175 = vtanh.f32 %v2682_v48  ;;  %v7413_v48 = vld [vmem:[#allocation34_spill] sm:$0xff] }
 0xa3a   :  { %v4170_v47 = vpop.eup %4169 }
 0xa3b   :  { %v2693_v22 = vadd.f32 1.0, %v4170_v47 }
 0xa3c   :  { %v4172_v23 = vpop.eup %4171 }
 0xa3d   :  { %4177 = vrcp.f32 %v2693_v22  ;;  %v2694_v15 = vadd.f32 1.0, %v4172_v23  ;;  %v4174_v17 = vpop.eup %4173  ;;  %v7419_v22 = vmov 0.0   ;;  %v7420_v23 = vld [vmem:[#allocation56_spill] sm:$0xff] }
 0xa3e   :  { %v4176_v19 = vpop.eup %4175  ;;  %v2695_v52 = vadd.f32 1.0, %v4174_v17  ;;  %v7422_v17 = vld [vmem:[#allocation57_spill] sm:$0xff] }
 0xa3f   :  { %4179 = vrcp.f32 %v2694_v15  ;;  %v7421_v15 = vld [vmem:[#allocation52_spill] sm:$0xff] }
 0xa40   :  { %4181 = vrcp.f32 %v2695_v52  ;;  %v7425_v52 = vld [vmem:[#allocation41_spill] sm:$0xff] }
 0xa4a   :  { %v4178_v33 = vpop.eup %4177 }
 0xa4b   :  { %v2704_v55 = vmul.f32 %v4178_v33, %v4176_v19  ;;  %v7423_v19 = vld [vmem:[#allocation55_spill] sm:$0xff] }
 0xa4c   :  { %v4180_v50 = vpop.eup %4179  ;;  %v7424_v33 = vld [vmem:[#allocation39_spill] sm:$0xff] }
 0xa4d   :  { %v2703_v12 = vmul.f32 %v4180_v50, %v6190_v16  ;;  %v4182_v47 = vpop.eup %4181  ;;  %v7414_v16 = vld [vmem:[#allocation69_spill] sm:$0xff] }
 0xa4f   :  { %v6268_v30 = vadd.f32 %v2704_v55, %v2703_v12  ;;  %v2120_v55 = vadd.f32 %v7424_v33, %v7423_v19  ;;  %v2122_v12 = vadd.f32 %v7425_v52, %v7394_v20 }
 0xa51   :  { %4183 = vtanh.f32 %v6268_v30 }
 0xa5e   :  { %v4184_v53 = vpop.eup %4183 }
 0xa5f   :  { %v2707_v51 = vmul.f32 %v4184_v53, %v4182_v47 }
 0xa61   :  { %2778 = vmatmul.mubr.f32.vlgmr.msra.gmra.mxu0 %v2707_v51  ;;  %2849 = vmatmul.mubr.f32.vlgmr.msra.gmra.mxu1 %v2707_v51 }
 0xa62   :  { %2885 = vmatpush1.msra.mxu0 %v5853_v10  ;;  %2956 = vmatpush1.msra.mxu1 %v5855_v60  ;;  %v7399_v10 = vld [vmem:[#allocation59_spill] sm:$0xff]  ;;  %v7400_v60 = vld [vmem:[#allocation58_spill] sm:$0xff] }
 0xa63   :  { %2886 = vmatprep.subr.mxu0 %v5859_v32  ;;  %2957 = vmatprep.subr.mxu1 %v5861_v18  ;;  %v7401_v32 = vld [vmem:[#allocation60_spill] sm:$0xff]  ;;  %v7402_v18 = vld [vmem:[#allocation61_spill] sm:$0xff] }
 0xa64   :  { %2887 = vmatpush1.msra.mxu0 %v5865_v6  ;;  %2958 = vmatpush1.msra.mxu1 %v5867_v57  ;;  %v7403_v6 = vld [vmem:[#allocation63_spill] sm:$0xff]  ;;  %v7404_v57 = vld [vmem:[#allocation62_spill] sm:$0xff] }
 0xa65   :  { %2888 = vmatprep.subr.mxu0 %v5871_v59  ;;  %2959 = vmatprep.subr.mxu1 %v5873_v61  ;;  %v7405_v59 = vld [vmem:[#allocation64_spill] sm:$0xff]  ;;  %v7406_v61 = vld [vmem:[#allocation30_spill] sm:$0xff] }
 0xa66   :  { %2889 = vmatpush1.msra.mxu0 %v5877_v9  ;;  %2960 = vmatpush1.msra.mxu1 %v5879_v45  ;;  %v7407_v9 = vld [vmem:[#allocation31_spill] sm:$0xff]  ;;  %v7408_v45 = vld [vmem:[#allocation65_spill] sm:$0xff] }
 0xa67   :  { %2890 = vmatprep.subr.mxu0 %v5883_v2  ;;  %2961 = vmatprep.subr.mxu1 %v5885_v11  ;;  %v7409_v2 = vld [vmem:[#allocation67_spill] sm:$0xff]  ;;  %v7410_v11 = vld [vmem:[#allocation66_spill] sm:$0xff] }
 0xa68   :  { %2891 = vmatpush1.msra.mxu0 %v5889_v4  ;;  %2962 = vmatpush1.msra.mxu1 %v5891_v36  ;;  %v7411_v4 = vld [vmem:[#allocation68_spill] sm:$0xff]  ;;  %v7412_v36 = vld [vmem:[#allocation33_spill] sm:$0xff] }
 0xa69   :  { %2892 = vmatprep.subr.mxu0 %v5895_v0  ;;  %2963 = vmatprep.subr.mxu1 %v5897_v3 }
 0xa6a   :  { %2893 = vmatpush1.msra.mxu0 %v5901_v7  ;;  %2964 = vmatpush1.msra.mxu1 %v5903_v54 }
 0xa6b   :  { %2894 = vmatprep.subr.mxu0 %v5907_v62  ;;  %2965 = vmatprep.subr.mxu1 %v5909_v58 }
 0xa6c   :  { %2895 = vmatpush1.msra.mxu0 %v5913_v1  ;;  %2966 = vmatpush1.msra.mxu1 %v5915_v63 }
 0xa6d   :  { %2896 = vmatprep.subr.mxu0 %v5919_v5  ;;  %2967 = vmatprep.subr.mxu1 %v5921_v27 }
 0xa6e   :  { %2897 = vmatpush1.msra.mxu0 %v5925_v34  ;;  %2968 = vmatpush1.msra.mxu1 %v5927_v35 }
 0xa6f   :  { %2898 = vmatprep.subr.mxu0 %v5931_v37  ;;  %2969 = vmatprep.subr.mxu1 %v5933_v39 }
 0xa70   :  { %2899 = vmatpush1.msra.mxu0 %v5937_v40  ;;  %2970 = vmatpush1.msra.mxu1 %v5939_v24 }
 0xa71   :  { %2900 = vmatprep.subr.mxu0 %v5943_v25  ;;  %2971 = vmatprep.subr.mxu1 %v5945_v26 }
 0xa72   :  { %2901 = vmatpush1.msra.mxu0 %v5949_v28  ;;  %2972 = vmatpush1.msra.mxu1 %v5951_v29 }
 0xa73   :  { %2902 = vmatprep.subr.mxu0 %v5955_v31  ;;  %2973 = vmatprep.subr.mxu1 %v5957_v38 }
 0xa74   :  { %2903 = vmatpush1.msra.mxu0 %v5961_v41  ;;  %2974 = vmatpush1.msra.mxu1 %v5963_v42 }
 0xa75   :  { %2904 = vmatprep.subr.mxu0 %v5967_v43  ;;  %2975 = vmatprep.subr.mxu1 %v5969_v44 }
 0xa76   :  { %2905 = vmatpush1.msra.mxu0 %v5973_v46  ;;  %2976 = vmatpush1.msra.mxu1 %v7399_v10 }
 0xa77   :  { %2906 = vmatprep.subr.mxu0 %v7400_v60  ;;  %2977 = vmatprep.subr.mxu1 %v7401_v32 }
 0xa78   :  { %2907 = vmatpush1.msra.mxu0 %v7402_v18  ;;  %2978 = vmatpush1.msra.mxu1 %v7403_v6 }
 0xa79   :  { %2908 = vmatprep.subr.mxu0 %v7404_v57  ;;  %2979 = vmatprep.subr.mxu1 %v7405_v59 }
 0xa7a   :  { %2909 = vmatpush1.msra.mxu0 %v7406_v61  ;;  %2980 = vmatpush1.msra.mxu1 %v7407_v9 }
 0xa7b   :  { %2910 = vmatprep.subr.mxu0 %v7408_v45  ;;  %2981 = vmatprep.subr.mxu1 %v7409_v2 }
 0xa7c   :  { %2911 = vmatpush1.msra.mxu0 %v7410_v11  ;;  %2982 = vmatpush1.msra.mxu1 %v7411_v4 }
 0xa7d   :  { %2912 = vmatprep.subr.mxu0 %v7412_v36  ;;  %2983 = vmatprep.subr.mxu1 %v7413_v48 }
 0xa7e   :  { %2913 = vmatpush1.msra.mxu0 %v7414_v16  ;;  %2984 = vmatpush1.msra.mxu1 %v7415_v14  ;;  %v7427_v14 = vld [vmem:[#allocation44_spill] sm:$0xff] }
 0xa7f   :  { %2914 = vmatprep.subr.mxu0 %v7416_v13  ;;  %2985 = vmatprep.subr.mxu1 %v7417_v56  ;;  %v2235_v33 = vadd.f32 %v7427_v14, %v6187_v8 }
 0xa80   :  { %2915 = vmatpush1.msra.mxu0 %v7418_v21  ;;  %2948 = vmatprep.mubr.f32.mxu0 %v7419_v22 }
 0xa81   :  { %2986 = vmatpush1.msra.mxu1 %v7420_v23  ;;  %3019 = vmatprep.mubr.f32.mxu1 %v7419_v22  ;;  %v7426_v22 = vld [vmem:[#allocation42_spill] sm:$0xff] }
 0xa82   :  { %3055 = vmatprep.subr.mxu0 %v7421_v15  ;;  %3126 = vmatprep.subr.mxu1 %v7422_v17  ;;  %v2233_v15 = vadd.f32 %v7426_v22, %v7396_v49 }
 0xb21   :  { %v2779_v50 = vpop.f32.mrf.mxu0  ;;  %v2850_v23 = vpop.f32.mrf.mxu1 }
 0xb22   :  { %v2780_v47 = vadd.f32 %v2779_v50, %v2120_v55  ;;  %v2851_v13 = vadd.f32 %v2850_v23, %v2233_v15  ;;  %v6355_v15 = vld [vmem:[#allocation12 + $0x1c8] sm:$0xff] }
 0xb23   :  { %v2781_v53 = vpop.f32.mrf.mxu0  ;;  %v2852_v17 = vpop.f32.mrf.mxu1 }
 0xb24   :  { %v3936_v51 = vmul.f32 -1.442695, %v2780_v47  ;;  %v2782_v21 = vadd.f32 %v2781_v53, %v2122_v12  ;;  %v3938_v19 = vmul.f32 -1.442695, %v2851_v13  ;;  %v2853_v16 = vadd.f32 %v2852_v17, %v2235_v33  ;;  %v6361_v17 = vld [vmem:[#allocation12 + $0x1c0] sm:$0xff]  ;;  %v6364_v33 = vld [vmem:[#allocation12 + $0x1d0] sm:$0xff] }
 0xb26   :  { %4185 = vpow2.f32 %v3936_v51  ;;  %v3937_v56 = vmul.f32 -1.442695, %v2782_v21 }
 0xb28   :  { %4187 = vpow2.f32 %v3937_v56 }
 0xb29   :  { %4189 = vpow2.f32 %v3938_v19  ;;  %v6352_v19 = vld [vmem:[#allocation12 + $0x1f0] sm:$0xff] }
 0xb2a   :  { %4191 = vtanh.f32 %v2853_v16  ;;  %v6349_v16 = vld [vmem:[#allocation12 + $0x1e0] sm:$0xff] }
 0xb33   :  { %v4186_v48 = vpop.eup %4185 }
 0xb34   :  { %v2864_v52 = vadd.f32 1.0, %v4186_v48 }
 0xb35   :  { %v4188_v55 = vpop.eup %4187 }
 0xb36   :  { %4193 = vrcp.f32 %v2864_v52  ;;  %v2865_v50 = vadd.f32 1.0, %v4188_v55  ;;  %v4190_v56 = vpop.eup %4189  ;;  %v6367_v52 = vld [vmem:[#allocation12 + $0x1a8] sm:$0xff]  ;;  %v6370_v55 = vld [vmem:[#allocation12 + $0x1b8] sm:$0xff] }
 0xb37   :  { %v4192_v21 = vpop.eup %4191  ;;  %v2866_v23 = vadd.f32 1.0, %v4190_v56  ;;  %v6376_v56 = vld [vmem:[#allocation12 + $0x1b0] sm:$0xff] }
 0xb38   :  { %4195 = vrcp.f32 %v2865_v50  ;;  %v6373_v50 = vld [vmem:[#allocation12 + $0x1a0] sm:$0xff] }
 0xb39   :  { %4197 = vrcp.f32 %v2866_v23 }
 0xb43   :  { %v4194_v12 = vpop.eup %4193 }
 0xb44   :  { %v2875_v47 = vmul.f32 %v4194_v12, %v4192_v21  ;;  %v6379_v21 = vld [vmem:[#allocation12 + $0x188] sm:$0xff]  ;;  %v6382_v12 = vld [vmem:[#allocation12 + $0x198] sm:$0xff] }
 0xb45   :  { %v4196_v22 = vpop.eup %4195 }
 0xb46   :  { %v2874_v53 = vmul.f32 %v4196_v22, %v6268_v30  ;;  %v4198_v48 = vpop.eup %4197  ;;  %v6358_v30 = vld [vmem:[#allocation12 + $0x1d8] sm:$0xff]  ;;  %v6388_v22 = vld [vmem:[#allocation12 + $0x190] sm:$0xff] }
 0xb48   :  { %v6346_v51 = vadd.f32 %v2875_v47, %v2874_v53  ;;  %v6385_v47 = vld [vmem:[#allocation12 + $0x180] sm:$0xff] }
 0xb4a   :  { %4199 = vtanh.f32 %v6346_v51 }
 0xb57   :  { %v4200_v14 = vpop.eup %4199 }
 0xb58   :  { %v2878_v13 = vmul.f32 %v4200_v14, %v4198_v48 }
 0xb5a   :  { %2949 = vmatmul.mubr.f32.vlgmr.msra.gmra.mxu0 %v2878_v13  ;;  %3020 = vmatmul.mubr.f32.vlgmr.msra.gmra.mxu1 %v2878_v13  ;;  %v6476_v13 = vld [vmem:[#allocation12 + $0x178] sm:$0xff] }
 0xb5b   :  { %3056 = vmatpush1.msra.mxu0 %v6349_v16  ;;  %3127 = vmatpush1.msra.mxu1 %v6352_v19 }
 0xb5c   :  { %3057 = vmatprep.subr.mxu0 %v6355_v15  ;;  %3128 = vmatprep.subr.mxu1 %v6358_v30 }
 0xb5d   :  { %3058 = vmatpush1.msra.mxu0 %v6361_v17  ;;  %3129 = vmatpush1.msra.mxu1 %v6364_v33 }
 0xb5e   :  { %3059 = vmatprep.subr.mxu0 %v6367_v52  ;;  %3130 = vmatprep.subr.mxu1 %v6370_v55 }
 0xb5f   :  { %3060 = vmatpush1.msra.mxu0 %v6373_v50  ;;  %3131 = vmatpush1.msra.mxu1 %v6376_v56 }
 0xb60   :  { %3061 = vmatprep.subr.mxu0 %v6379_v21  ;;  %3132 = vmatprep.subr.mxu1 %v6382_v12 }
 0xb61   :  { %3062 = vmatpush1.msra.mxu0 %v6385_v47  ;;  %3133 = vmatpush1.msra.mxu1 %v6388_v22 }
 0xb62   :  { %3063 = vmatprep.subr.mxu0 %v5895_v0  ;;  %3134 = vmatprep.subr.mxu1 %v5897_v3  ;;  %v7428_v0 = vld [vmem:[#allocation34_spill] sm:$0xff]  ;;  %v7429_v3 = vld [vmem:[#allocation69_spill] sm:$0xff] }
 0xb63   :  { %3064 = vmatpush1.msra.mxu0 %v5901_v7  ;;  %3135 = vmatpush1.msra.mxu1 %v5903_v54  ;;  %v7430_v7 = vld [vmem:[#allocation71_spill] sm:$0xff]  ;;  %v7431_v54 = vld [vmem:[#allocation70_spill] sm:$0xff] }
 0xb64   :  { %3065 = vmatprep.subr.mxu0 %v5907_v62  ;;  %3136 = vmatprep.subr.mxu1 %v5909_v58  ;;  %v7432_v62 = vld [vmem:[#allocation72_spill] sm:$0xff]  ;;  %v7433_v58 = vld [vmem:[#allocation54_spill] sm:$0xff] }
 0xb65   :  { %3066 = vmatpush1.msra.mxu0 %v5913_v1  ;;  %3137 = vmatpush1.msra.mxu1 %v5915_v63  ;;  %v7434_v1 = vmov 0.0   ;;  %v7435_v63 = vld [vmem:[#allocation56_spill] sm:$0xff] }
 0xb66   :  { %3067 = vmatprep.subr.mxu0 %v5919_v5  ;;  %3138 = vmatprep.subr.mxu1 %v5921_v27  ;;  %v6441_v5 = vld [vmem:[#allocation12 + $0x1e8] sm:$0xff]  ;;  %v6444_v27 = vld [vmem:[#allocation12 + $0x1f8] sm:$0xff] }
 0xb67   :  { %3068 = vmatpush1.msra.mxu0 %v5925_v34  ;;  %3139 = vmatpush1.msra.mxu1 %v5927_v35  ;;  %7436 = vst [vmem:[#allocation36_spill] sm:$0xff] %v6441_v5  ;;  %7437 = vst [vmem:[#allocation79_spill] sm:$0xff] %v6444_v27  ;;  %v7438_v34 = vld [vmem:[#allocation55_spill] sm:$0xff] }
 0xb68   :  { %3069 = vmatprep.subr.mxu0 %v5931_v37  ;;  %3140 = vmatprep.subr.mxu1 %v5933_v39  ;;  %v7439_v35 = vld [vmem:[#allocation43_spill] sm:$0xff] }
 0xb69   :  { %3070 = vmatpush1.msra.mxu0 %v5937_v40  ;;  %3141 = vmatpush1.msra.mxu1 %v5939_v24  ;;  %v2126_v37 = vadd.f32 %v7439_v35, %v7438_v34  ;;  %v7440_v40 = vld [vmem:[#allocation45_spill] sm:$0xff]  ;;  %v6500_v35 = vld [vmem:[#allocation12 + $0x138] sm:$0xff] }
 0xb6a   :  { %3071 = vmatprep.subr.mxu0 %v5943_v25  ;;  %3142 = vmatprep.subr.mxu1 %v5945_v26  ;;  %v2128_v24 = vadd.f32 %v7440_v40, %v7394_v20  ;;  %v6509_v40 = vld [vmem:[#allocation12 + $0x108] sm:$0xff] }
 0xb6b   :  { %3072 = vmatpush1.msra.mxu0 %v5949_v28  ;;  %3143 = vmatpush1.msra.mxu1 %v5951_v29 }
 0xb6c   :  { %3073 = vmatprep.subr.mxu0 %v5955_v31  ;;  %3144 = vmatprep.subr.mxu1 %v5957_v38 }
 0xb6d   :  { %3074 = vmatpush1.msra.mxu0 %v5961_v41  ;;  %3145 = vmatpush1.msra.mxu1 %v5963_v42  ;;  %v7441_v41 = vld [vmem:[#allocation46_spill] sm:$0xff] }
 0xb6e   :  { %3075 = vmatprep.subr.mxu0 %v5967_v43  ;;  %3146 = vmatprep.subr.mxu1 %v5969_v44  ;;  %v2239_v42 = vadd.f32 %v7441_v41, %v7396_v49  ;;  %v6533_v41 = vld [vmem:[#allocation12 + $0xc8] sm:$0xff] }
 0xb6f   :  { %3076 = vmatpush1.msra.mxu0 %v5973_v46  ;;  %3147 = vmatpush1.msra.mxu1 %v7399_v10  ;;  %v7442_v46 = vld [vmem:[#allocation48_spill] sm:$0xff] }
 0xb70   :  { %3077 = vmatprep.subr.mxu0 %v7400_v60  ;;  %3148 = vmatprep.subr.mxu1 %v7401_v32  ;;  %v2241_v10 = vadd.f32 %v7442_v46, %v6187_v8  ;;  %v6545_v46 = vld [vmem:[#allocation12 + $0xa8] sm:$0xff] }
 0xb71   :  { %3078 = vmatpush1.msra.mxu0 %v7402_v18  ;;  %3149 = vmatpush1.msra.mxu1 %v7403_v6 }
 0xb72   :  { %3079 = vmatprep.subr.mxu0 %v7404_v57  ;;  %3150 = vmatprep.subr.mxu1 %v7405_v59 }
 0xb73   :  { %3080 = vmatpush1.msra.mxu0 %v7406_v61  ;;  %3151 = vmatpush1.msra.mxu1 %v7407_v9 }
 0xb74   :  { %3081 = vmatprep.subr.mxu0 %v7408_v45  ;;  %3152 = vmatprep.subr.mxu1 %v7409_v2 }
 0xb75   :  { %3082 = vmatpush1.msra.mxu0 %v7410_v11  ;;  %3153 = vmatpush1.msra.mxu1 %v7411_v4 }
 0xb76   :  { %3083 = vmatprep.subr.mxu0 %v7412_v36  ;;  %3154 = vmatprep.subr.mxu1 %v7428_v0  ;;  %v6479_v0 = vld [vmem:[#allocation12 + $0x160] sm:$0xff] }
 0xb77   :  { %3084 = vmatpush1.msra.mxu0 %v7429_v3  ;;  %3155 = vmatpush1.msra.mxu1 %v7430_v7  ;;  %v6482_v3 = vld [vmem:[#allocation12 + $0x170] sm:$0xff]  ;;  %v6485_v7 = vld [vmem:[#allocation12 + $0x148] sm:$0xff] }
 0xb78   :  { %3085 = vmatprep.subr.mxu0 %v7431_v54  ;;  %3156 = vmatprep.subr.mxu1 %v7432_v62  ;;  %v6488_v54 = vld [vmem:[#allocation12 + $0x158] sm:$0xff]  ;;  %v6491_v62 = vld [vmem:[#allocation12 + $0x140] sm:$0xff] }
 0xb79   :  { %3086 = vmatpush1.msra.mxu0 %v7433_v58  ;;  %3119 = vmatprep.mubr.f32.mxu0 %v7434_v1  ;;  %v6494_v58 = vld [vmem:[#allocation12 + $0x150] sm:$0xff] }
 0xb7a   :  { %3157 = vmatpush1.msra.mxu1 %v7435_v63  ;;  %3190 = vmatprep.mubr.f32.mxu1 %v7434_v1  ;;  %v6497_v63 = vld [vmem:[#allocation12 + $0x128] sm:$0xff] }
 0xb7b   :  { %3226 = vmatprep.subr.mxu0 %v6441_v5  ;;  %3297 = vmatprep.subr.mxu1 %v6444_v27 }
 0xc1a   :  { %v2950_v39 = vpop.f32.mrf.mxu0  ;;  %v3021_v38 = vpop.f32.mrf.mxu1 }
 0xc1b   :  { %v2951_v25 = vadd.f32 %v2950_v39, %v2126_v37  ;;  %v3022_v43 = vadd.f32 %v3021_v38, %v2239_v42  ;;  %v6503_v37 = vld [vmem:[#allocation12 + $0x120] sm:$0xff]  ;;  %v6506_v39 = vld [vmem:[#allocation12 + $0x130] sm:$0xff]  ;;  %v6536_v42 = vld [vmem:[#allocation12 + $0xd8] sm:$0xff] }
 0xc1c   :  { %v2952_v26 = vpop.f32.mrf.mxu0  ;;  %v3023_v44 = vpop.f32.mrf.mxu1  ;;  %v6530_v38 = vld [vmem:[#allocation12 + $0xf0] sm:$0xff] }
 0xc1d   :  { %v3939_v28 = vmul.f32 -1.442695, %v2951_v25  ;;  %v2953_v29 = vadd.f32 %v2952_v26, %v2128_v24  ;;  %v3941_v60 = vmul.f32 -1.442695, %v3022_v43  ;;  %v3024_v32 = vadd.f32 %v3023_v44, %v2241_v10  ;;  %v6512_v24 = vld [vmem:[#allocation12 + $0x118] sm:$0xff]  ;;  %v6515_v25 = vld [vmem:[#allocation12 + $0x100] sm:$0xff] }
 0xc1e   :  { %v6518_v26 = vld [vmem:[#allocation12 + $0x110] sm:$0xff]  ;;  %v6539_v43 = vld [vmem:[#allocation12 + $0xc0] sm:$0xff]  ;;  %v6548_v10 = vld [vmem:[#allocation12 + $0xb8] sm:$0xff] }
 0xc1f   :  { %4201 = vpow2.f32 %v3939_v28  ;;  %v3940_v31 = vmul.f32 -1.442695, %v2953_v29  ;;  %v6521_v28 = vld [vmem:[#allocation12 + $0xe8] sm:$0xff]  ;;  %v6524_v29 = vld [vmem:[#allocation12 + $0xf8] sm:$0xff]  ;;  %v6542_v44 = vld [vmem:[#allocation12 + $0xd0] sm:$0xff] }
 0xc21   :  { %4203 = vpow2.f32 %v3940_v31  ;;  %v6527_v31 = vld [vmem:[#allocation12 + $0xe0] sm:$0xff] }
 0xc22   :  { %4205 = vpow2.f32 %v3941_v60  ;;  %v6551_v60 = vld [vmem:[#allocation12 + $0xa0] sm:$0xff] }
 0xc23   :  { %4207 = vtanh.f32 %v3024_v32  ;;  %v6554_v32 = vld [vmem:[#allocation12 + $0xb0] sm:$0xff] }
 0xc24   :  { %7443 = vst [vmem:[#allocation37_spill] sm:$0xff] %v6554_v32 }
 0xc2c   :  { %v4202_v18 = vpop.eup %4201 }
 0xc2d   :  { %v3035_v6 = vadd.f32 1.0, %v4202_v18  ;;  %v6557_v18 = vld [vmem:[#allocation12 + $0x88] sm:$0xff] }
 0xc2e   :  { %v4204_v57 = vpop.eup %4203  ;;  %7444 = vst [vmem:[#allocation83_spill] sm:$0xff] %v6557_v18 }
 0xc2f   :  { %4209 = vrcp.f32 %v3035_v6  ;;  %v3036_v59 = vadd.f32 1.0, %v4204_v57  ;;  %v4206_v61 = vpop.eup %4205  ;;  %v6560_v6 = vld [vmem:[#allocation12 + $0x98] sm:$0xff]  ;;  %v6563_v57 = vld [vmem:[#allocation12 + $0x80] sm:$0xff] }
 0xc30   :  { %v4208_v9 = vpop.eup %4207  ;;  %v3037_v4 = vadd.f32 1.0, %v4206_v61  ;;  %7445 = vst [vmem:[#allocation38_spill] sm:$0xff] %v6560_v6  ;;  %7446 = vst [vmem:[#allocation40_spill] sm:$0xff] %v6563_v57  ;;  %v6569_v61 = vld [vmem:[#allocation12 + $0x68] sm:$0xff] }
 0xc31   :  { %4211 = vrcp.f32 %v3036_v59  ;;  %v6566_v59 = vld [vmem:[#allocation12 + $0x90] sm:$0xff]  ;;  %7448 = vst [vmem:[#allocation58_spill] sm:$0xff] %v6569_v61 }
 0xc32   :  { %4213 = vrcp.f32 %v3037_v4  ;;  %7447 = vst [vmem:[#allocation59_spill] sm:$0xff] %v6566_v59  ;;  %v6584_v4 = vld [vmem:[#allocation12 + $0x58] sm:$0xff] }
 0xc33   :  { %7453 = vst [vmem:[#allocation64_spill] sm:$0xff] %v6584_v4 }
 0xc3c   :  { %v4210_v45 = vpop.eup %4209 }
 0xc3d   :  { %v3046_v2 = vmul.f32 %v4210_v45, %v4208_v9  ;;  %v6572_v9 = vld [vmem:[#allocation12 + $0x78] sm:$0xff]  ;;  %v6575_v45 = vld [vmem:[#allocation12 + $0x60] sm:$0xff] }
 0xc3e   :  { %v4212_v11 = vpop.eup %4211  ;;  %7449 = vst [vmem:[#allocation60_spill] sm:$0xff] %v6572_v9  ;;  %7450 = vst [vmem:[#allocation61_spill] sm:$0xff] %v6575_v45 }
 0xc3f   :  { %v3045_v36 = vmul.f32 %v4212_v11, %v6346_v51  ;;  %v4214_v53 = vpop.eup %4213  ;;  %v6473_v51 = vld [vmem:[#allocation12 + $0x168] sm:$0xff] }
 0xc40   :  { %v6581_v11 = vld [vmem:[#allocation12 + $0x48] sm:$0xff] }
 0xc41   :  { %v6456_v23 = vadd.f32 %v3046_v2, %v3045_v36  ;;  %v6578_v2 = vld [vmem:[#allocation12 + $0x70] sm:$0xff]  ;;  %7452 = vst [vmem:[#allocation62_spill] sm:$0xff] %v6581_v11  ;;  %v6587_v36 = vld [vmem:[#allocation12 + $0x40] sm:$0xff] }
 0xc42   :  { %7451 = vst [vmem:[#allocation63_spill] sm:$0xff] %v6578_v2  ;;  %7454 = vst [vmem:[#allocation30_spill] sm:$0xff] %v6587_v36 }
 0xc43   :  { %4215 = vtanh.f32 %v6456_v23 }
 0xc50   :  { %v4216_v48 = vpop.eup %4215 }
 0xc51   :  { %v3049_v14 = vmul.f32 %v4216_v48, %v4214_v53  ;;  %v6590_v53 = vld [vmem:[#allocation12 + $0x50] sm:$0xff]  ;;  %v6593_v48 = vld [vmem:[#allocation12 + $0x28] sm:$0xff] }
 0xc52   :  { %7455 = vst [vmem:[#allocation31_spill] sm:$0xff] %v6590_v53  ;;  %7456 = vst [vmem:[#allocation65_spill] sm:$0xff] %v6593_v48 }
 0xc53   :  { %3120 = vmatmul.mubr.f32.vlgmr.msra.gmra.mxu0 %v3049_v14  ;;  %3191 = vmatmul.mubr.f32.vlgmr.msra.gmra.mxu1 %v3049_v14  ;;  %v6596_v14 = vld [vmem:[#allocation12 + $0x38] sm:$0xff] }
 0xc54   :  { %3227 = vmatpush1.msra.mxu0 %v6349_v16  ;;  %3298 = vmatpush1.msra.mxu1 %v6352_v19  ;;  %7457 = vst [vmem:[#allocation67_spill] sm:$0xff] %v6596_v14 }
 0xc55   :  { %3228 = vmatprep.subr.mxu0 %v6355_v15  ;;  %3299 = vmatprep.subr.mxu1 %v6358_v30 }
 0xc56   :  { %3229 = vmatpush1.msra.mxu0 %v6361_v17  ;;  %3300 = vmatpush1.msra.mxu1 %v6364_v33 }
 0xc57   :  { %3230 = vmatprep.subr.mxu0 %v6367_v52  ;;  %3301 = vmatprep.subr.mxu1 %v6370_v55 }
 0xc58   :  { %3231 = vmatpush1.msra.mxu0 %v6373_v50  ;;  %3302 = vmatpush1.msra.mxu1 %v6376_v56 }
 0xc59   :  { %3232 = vmatprep.subr.mxu0 %v6379_v21  ;;  %3303 = vmatprep.subr.mxu1 %v6382_v12 }
 0xc5a   :  { %3233 = vmatpush1.msra.mxu0 %v6385_v47  ;;  %3304 = vmatpush1.msra.mxu1 %v6388_v22 }
 0xc5b   :  { %3234 = vmatprep.subr.mxu0 %v6473_v51  ;;  %3305 = vmatprep.subr.mxu1 %v6476_v13 }
 0xc5c   :  { %3235 = vmatpush1.msra.mxu0 %v6479_v0  ;;  %3306 = vmatpush1.msra.mxu1 %v6482_v3 }
 0xc5d   :  { %3236 = vmatprep.subr.mxu0 %v6485_v7  ;;  %3307 = vmatprep.subr.mxu1 %v6488_v54 }
 0xc5e   :  { %3237 = vmatpush1.msra.mxu0 %v6491_v62  ;;  %3308 = vmatpush1.msra.mxu1 %v6494_v58 }
 0xc5f   :  { %3238 = vmatprep.subr.mxu0 %v6497_v63  ;;  %3309 = vmatprep.subr.mxu1 %v6500_v35 }
 0xc60   :  { %3239 = vmatpush1.msra.mxu0 %v6503_v37  ;;  %3310 = vmatpush1.msra.mxu1 %v6506_v39 }
 0xc61   :  { %3240 = vmatprep.subr.mxu0 %v6509_v40  ;;  %3311 = vmatprep.subr.mxu1 %v6512_v24 }
 0xc62   :  { %3241 = vmatpush1.msra.mxu0 %v6515_v25  ;;  %3312 = vmatpush1.msra.mxu1 %v6518_v26 }
 0xc63   :  { %3242 = vmatprep.subr.mxu0 %v6521_v28  ;;  %3313 = vmatprep.subr.mxu1 %v6524_v29 }
 0xc64   :  { %3243 = vmatpush1.msra.mxu0 %v6527_v31  ;;  %3314 = vmatpush1.msra.mxu1 %v6530_v38 }
 0xc65   :  { %3244 = vmatprep.subr.mxu0 %v6533_v41  ;;  %3315 = vmatprep.subr.mxu1 %v6536_v42 }
 0xc66   :  { %3245 = vmatpush1.msra.mxu0 %v6539_v43  ;;  %3316 = vmatpush1.msra.mxu1 %v6542_v44 }
 0xc67   :  { %3246 = vmatprep.subr.mxu0 %v6545_v46  ;;  %3317 = vmatprep.subr.mxu1 %v6548_v10 }
 0xc68   :  { %3247 = vmatpush1.msra.mxu0 %v6551_v60  ;;  %3318 = vmatpush1.msra.mxu1 %v6554_v32 }
 0xc69   :  { %3248 = vmatprep.subr.mxu0 %v6557_v18  ;;  %3319 = vmatprep.subr.mxu1 %v6560_v6  ;;  %v7467_v6 = vld [vmem:[#allocation75_spill] sm:$0xff] }
 0xc6a   :  { %3249 = vmatpush1.msra.mxu0 %v6563_v57  ;;  %3320 = vmatpush1.msra.mxu1 %v6566_v59 }
 0xc6b   :  { %3250 = vmatprep.subr.mxu0 %v6569_v61  ;;  %3321 = vmatprep.subr.mxu1 %v6572_v9 }
 0xc6c   :  { %3251 = vmatpush1.msra.mxu0 %v6575_v45  ;;  %3322 = vmatpush1.msra.mxu1 %v6578_v2 }
 0xc6d   :  { %3252 = vmatprep.subr.mxu0 %v6581_v11  ;;  %3323 = vmatprep.subr.mxu1 %v6584_v4  ;;  %v6599_v11 = vld [vmem:[#allocation12 + $0x20] sm:$0xff]  ;;  %v6602_v4 = vld [vmem:[#allocation12 + $0x30] sm:$0xff] }
 0xc6e   :  { %3253 = vmatpush1.msra.mxu0 %v6587_v36  ;;  %3324 = vmatpush1.msra.mxu1 %v6590_v53  ;;  %7458 = vst [vmem:[#allocation66_spill] sm:$0xff] %v6599_v11  ;;  %7459 = vst [vmem:[#allocation68_spill] sm:$0xff] %v6602_v4  ;;  %v6605_v36 = vld [vmem:[#allocation12 + $0x8] sm:$0xff]  ;;  %v6608_v53 = vld [vmem:[#allocation12 + $0x18] sm:$0xff] }
 0xc6f   :  { %3254 = vmatprep.subr.mxu0 %v6593_v48  ;;  %3325 = vmatprep.subr.mxu1 %v6596_v14  ;;  %7460 = vst [vmem:[#allocation33_spill] sm:$0xff] %v6605_v36  ;;  %7461 = vst [vmem:[#allocation52_spill] sm:$0xff] %v6608_v53  ;;  %v6611_v48 = vld [vmem:[#allocation12] sm:$0xff]  ;;  %v6615_v14 = vld [vmem:[#allocation12 + $0x10] sm:$0xff] }
 0xc70   :  { %3255 = vmatpush1.msra.mxu0 %v6599_v11  ;;  %3326 = vmatpush1.msra.mxu1 %v6602_v4  ;;  %7462 = vst [vmem:[#allocation57_spill] sm:$0xff] %v6611_v48  ;;  %7463 = vst [vmem:[#allocation39_spill] sm:$0xff] %v6615_v14  ;;  %v7465_v11 = vld [vmem:[#allocation49_spill] sm:$0xff] }
 0xc71   :  { %3256 = vmatprep.subr.mxu0 %v6605_v36  ;;  %3327 = vmatprep.subr.mxu1 %v6608_v53  ;;  %v7464_v36 = vld [vmem:[#allocation47_spill] sm:$0xff]  ;;  %v2134_v2 = vadd.f32 %v7465_v11, %v7394_v20 }
 0xc72   :  { %3257 = vmatpush1.msra.mxu0 %v6611_v48  ;;  %3290 = vmatprep.mubr.f32.mxu0 %v7434_v1  ;;  %v2132_v4 = vadd.f32 %v7464_v36, %v7438_v34  ;;  %v2247_v36 = vadd.f32 %v7467_v6, %v6187_v8  ;;  %v7470_v6 = vld [vmem:[#allocation38_spill] sm:$0xff] }
 0xc73   :  { %3328 = vmatpush1.msra.mxu1 %v6615_v14  ;;  %3361 = vmatprep.mubr.f32.mxu1 %v7434_v1  ;;  %v7466_v1 = vld [vmem:[#allocation50_spill] sm:$0xff] }
 0xc74   :  { %3397 = vmatprep.subr.mxu0 %v6441_v5  ;;  %3468 = vmatprep.subr.mxu1 %v6444_v27  ;;  %v2245_v5 = vadd.f32 %v7466_v1, %v7396_v49 }
 0xd13   :  { %v3121_v53 = vpop.f32.mrf.mxu0  ;;  %v3192_v14 = vpop.f32.mrf.mxu1 }
 0xd14   :  { %v3122_v48 = vadd.f32 %v3121_v53, %v2132_v4  ;;  %v3193_v57 = vadd.f32 %v3192_v14, %v2245_v5  ;;  %v7472_v14 = vld [vmem:[#allocation59_spill] sm:$0xff] }
 0xd15   :  { %v3123_v45 = vpop.f32.mrf.mxu0  ;;  %v3194_v27 = vpop.f32.mrf.mxu1 }
 0xd16   :  { %v3942_v9 = vmul.f32 -1.442695, %v3122_v48  ;;  %v3124_v61 = vadd.f32 %v3123_v45, %v2134_v2  ;;  %v3944_v34 = vmul.f32 -1.442695, %v3193_v57  ;;  %v3195_v18 = vadd.f32 %v3194_v27, %v2247_v36  ;;  %v7471_v57 = vld [vmem:[#allocation40_spill] sm:$0xff]  ;;  %v7473_v36 = vld [vmem:[#allocation58_spill] sm:$0xff] }
 0xd18   :  { %4217 = vpow2.f32 %v3942_v9  ;;  %v3943_v59 = vmul.f32 -1.442695, %v3124_v61 }
 0xd1a   :  { %4219 = vpow2.f32 %v3943_v59 }
 0xd1b   :  { %4221 = vpow2.f32 %v3944_v34 }
 0xd1c   :  { %4223 = vtanh.f32 %v3195_v18  ;;  %v7469_v18 = vld [vmem:[#allocation83_spill] sm:$0xff] }
 0xd25   :  { %v4218_v32 = vpop.eup %4217 }
 0xd26   :  { %v3206_v11 = vadd.f32 1.0, %v4218_v32 }
 0xd27   :  { %v4220_v4 = vpop.eup %4219 }
 0xd28   :  { %4225 = vrcp.f32 %v3206_v11  ;;  %v3207_v9 = vadd.f32 1.0, %v4220_v4  ;;  %v4222_v59 = vpop.eup %4221  ;;  %v7474_v11 = vld [vmem:[#allocation60_spill] sm:$0xff]  ;;  %v7475_v4 = vld [vmem:[#allocation61_spill] sm:$0xff] }
 0xd29   :  { %v4224_v61 = vpop.eup %4223  ;;  %v3208_v5 = vadd.f32 1.0, %v4222_v59  ;;  %v7477_v59 = vld [vmem:[#allocation62_spill] sm:$0xff] }
 0xd2a   :  { %4227 = vrcp.f32 %v3207_v9  ;;  %v7476_v9 = vld [vmem:[#allocation63_spill] sm:$0xff] }
 0xd2b   :  { %4229 = vrcp.f32 %v3208_v5  ;;  %v7482_v5 = vld [vmem:[#allocation67_spill] sm:$0xff] }
 0xd35   :  { %v4226_v45 = vpop.eup %4225 }
 0xd36   :  { %v3217_v2 = vmul.f32 %v4226_v45, %v4224_v61  ;;  %v7478_v61 = vld [vmem:[#allocation64_spill] sm:$0xff]  ;;  %v7479_v45 = vld [vmem:[#allocation30_spill] sm:$0xff] }
 0xd37   :  { %v4228_v1 = vpop.eup %4227 }
 0xd38   :  { %v3216_v53 = vmul.f32 %v4228_v1, %v6456_v23  ;;  %v4230_v27 = vpop.eup %4229  ;;  %v7468_v23 = vld [vmem:[#allocation37_spill] sm:$0xff] }
 0xd39   :  { %v7481_v1 = vld [vmem:[#allocation65_spill] sm:$0xff] }
 0xd3a   :  { %v6630_v48 = vadd.f32 %v3217_v2, %v3216_v53  ;;  %v7480_v2 = vld [vmem:[#allocation31_spill] sm:$0xff]  ;;  %v7483_v53 = vld [vmem:[#allocation66_spill] sm:$0xff] }
 0xd3c   :  { %4231 = vtanh.f32 %v6630_v48 }
 0xd49   :  { %v4232_v34 = vpop.eup %4231 }
 0xd4a   :  { %v3220_v32 = vmul.f32 %v4232_v34, %v4230_v27  ;;  %v7484_v27 = vld [vmem:[#allocation68_spill] sm:$0xff]  ;;  %v7485_v34 = vld [vmem:[#allocation33_spill] sm:$0xff] }
 0xd4c   :  { %3291 = vmatmul.mubr.f32.vlgmr.msra.gmra.mxu0 %v3220_v32  ;;  %3362 = vmatmul.mubr.f32.vlgmr.msra.gmra.mxu1 %v3220_v32  ;;  %v7486_v32 = vld [vmem:[#allocation52_spill] sm:$0xff] }
 0xd4d   :  { %3398 = vmatpush1.msra.mxu0 %v6349_v16  ;;  %3469 = vmatpush1.msra.mxu1 %v6352_v19 }
 0xd4e   :  { %3399 = vmatprep.subr.mxu0 %v6355_v15  ;;  %3470 = vmatprep.subr.mxu1 %v6358_v30 }
 0xd4f   :  { %3400 = vmatpush1.msra.mxu0 %v6361_v17  ;;  %3471 = vmatpush1.msra.mxu1 %v6364_v33 }
 0xd50   :  { %3401 = vmatprep.subr.mxu0 %v6367_v52  ;;  %3472 = vmatprep.subr.mxu1 %v6370_v55 }
 0xd51   :  { %3402 = vmatpush1.msra.mxu0 %v6373_v50  ;;  %3473 = vmatpush1.msra.mxu1 %v6376_v56 }
 0xd52   :  { %3403 = vmatprep.subr.mxu0 %v6379_v21  ;;  %3474 = vmatprep.subr.mxu1 %v6382_v12 }
 0xd53   :  { %3404 = vmatpush1.msra.mxu0 %v6385_v47  ;;  %3475 = vmatpush1.msra.mxu1 %v6388_v22 }
 0xd54   :  { %3405 = vmatprep.subr.mxu0 %v6473_v51  ;;  %3476 = vmatprep.subr.mxu1 %v6476_v13 }
 0xd55   :  { %3406 = vmatpush1.msra.mxu0 %v6479_v0  ;;  %3477 = vmatpush1.msra.mxu1 %v6482_v3 }
 0xd56   :  { %3407 = vmatprep.subr.mxu0 %v6485_v7  ;;  %3478 = vmatprep.subr.mxu1 %v6488_v54 }
 0xd57   :  { %3408 = vmatpush1.msra.mxu0 %v6491_v62  ;;  %3479 = vmatpush1.msra.mxu1 %v6494_v58 }
 0xd58   :  { %3409 = vmatprep.subr.mxu0 %v6497_v63  ;;  %3480 = vmatprep.subr.mxu1 %v6500_v35 }
 0xd59   :  { %3410 = vmatpush1.msra.mxu0 %v6503_v37  ;;  %3481 = vmatpush1.msra.mxu1 %v6506_v39 }
 0xd5a   :  { %3411 = vmatprep.subr.mxu0 %v6509_v40  ;;  %3482 = vmatprep.subr.mxu1 %v6512_v24 }
 0xd5b   :  { %3412 = vmatpush1.msra.mxu0 %v6515_v25  ;;  %3483 = vmatpush1.msra.mxu1 %v6518_v26 }
 0xd5c   :  { %3413 = vmatprep.subr.mxu0 %v6521_v28  ;;  %3484 = vmatprep.subr.mxu1 %v6524_v29 }
 0xd5d   :  { %3414 = vmatpush1.msra.mxu0 %v6527_v31  ;;  %3485 = vmatpush1.msra.mxu1 %v6530_v38 }
 0xd5e   :  { %3415 = vmatprep.subr.mxu0 %v6533_v41  ;;  %3486 = vmatprep.subr.mxu1 %v6536_v42 }
 0xd5f   :  { %3416 = vmatpush1.msra.mxu0 %v6539_v43  ;;  %3487 = vmatpush1.msra.mxu1 %v6542_v44 }
 0xd60   :  { %3417 = vmatprep.subr.mxu0 %v6545_v46  ;;  %3488 = vmatprep.subr.mxu1 %v6548_v10 }
 0xd61   :  { %3418 = vmatpush1.msra.mxu0 %v6551_v60  ;;  %3489 = vmatpush1.msra.mxu1 %v7468_v23 }
 0xd62   :  { %3419 = vmatprep.subr.mxu0 %v7469_v18  ;;  %3490 = vmatprep.subr.mxu1 %v7470_v6  ;;  %v7496_v6 = vld [vmem:[#allocation32_spill] sm:$0xff] }
 0xd63   :  { %3420 = vmatpush1.msra.mxu0 %v7471_v57  ;;  %3491 = vmatpush1.msra.mxu1 %v7472_v14 }
 0xd64   :  { %3421 = vmatprep.subr.mxu0 %v7473_v36  ;;  %3492 = vmatprep.subr.mxu1 %v7474_v11 }
 0xd65   :  { %3422 = vmatpush1.msra.mxu0 %v7475_v4  ;;  %3493 = vmatpush1.msra.mxu1 %v7476_v9  ;;  %v7487_v9 = vld [vmem:[#allocation57_spill] sm:$0xff] }
 0xd66   :  { %3423 = vmatprep.subr.mxu0 %v7477_v59  ;;  %3494 = vmatprep.subr.mxu1 %v7478_v61  ;;  %v7488_v59 = vmov 0.0   ;;  %v7489_v61 = vld [vmem:[#allocation39_spill] sm:$0xff] }
 0xd67   :  { %3424 = vmatpush1.msra.mxu0 %v7479_v45  ;;  %3495 = vmatpush1.msra.mxu1 %v7480_v2  ;;  %v7490_v2 = vld [vmem:[#allocation36_spill] sm:$0xff] }
 0xd68   :  { %3425 = vmatprep.subr.mxu0 %v7481_v1  ;;  %3496 = vmatprep.subr.mxu1 %v7482_v5  ;;  %v7491_v1 = vld [vmem:[#allocation79_spill] sm:$0xff] }
 0xd69   :  { %3426 = vmatpush1.msra.mxu0 %v7483_v53  ;;  %3497 = vmatpush1.msra.mxu1 %v7484_v27  ;;  %v7492_v5 = vld [vmem:[#allocation55_spill] sm:$0xff]  ;;  %v7493_v53 = vld [vmem:[#allocation73_spill] sm:$0xff] }
 0xd6a   :  { %3427 = vmatprep.subr.mxu0 %v7485_v34  ;;  %3498 = vmatprep.subr.mxu1 %v7486_v32  ;;  %v2138_v45 = vadd.f32 %v7493_v53, %v7492_v5  ;;  %v7494_v34 = vld [vmem:[#allocation74_spill] sm:$0xff]  ;;  %v2253_v53 = vadd.f32 %v7496_v6, %v6187_v8 }
 0xd6b   :  { %3428 = vmatpush1.msra.mxu0 %v7487_v9  ;;  %3461 = vmatprep.mubr.f32.mxu0 %v7488_v59  ;;  %v2140_v4 = vadd.f32 %v7494_v34, %v7394_v20 }
 0xd6c   :  { %3499 = vmatpush1.msra.mxu1 %v7489_v61  ;;  %3532 = vmatprep.mubr.f32.mxu1 %v7488_v59  ;;  %v7495_v59 = vld [vmem:[#allocation76_spill] sm:$0xff] }
 0xd6d   :  { %3568 = vmatprep.subr.mxu0 %v7490_v2  ;;  %3639 = vmatprep.subr.mxu1 %v7491_v1  ;;  %v2251_v2 = vadd.f32 %v7495_v59, %v7396_v49 }
 0xe0c   :  { %v3292_v27 = vpop.f32.mrf.mxu0  ;;  %v3363_v61 = vpop.f32.mrf.mxu1 }
 0xe0d   :  { %v3293_v32 = vadd.f32 %v3292_v27, %v2138_v45  ;;  %v3364_v57 = vadd.f32 %v3363_v61, %v2251_v2 }
 0xe0e   :  { %v3294_v11 = vpop.f32.mrf.mxu0  ;;  %v3365_v1 = vpop.f32.mrf.mxu1 }
 0xe0f   :  { %v3945_v9 = vmul.f32 -1.442695, %v3293_v32  ;;  %v3295_v36 = vadd.f32 %v3294_v11, %v2140_v4  ;;  %v3947_v5 = vmul.f32 -1.442695, %v3364_v57  ;;  %v3366_v18 = vadd.f32 %v3365_v1, %v2253_v53 }
 0xe11   :  { %4233 = vpow2.f32 %v3945_v9  ;;  %v3946_v14 = vmul.f32 -1.442695, %v3295_v36 }
 0xe13   :  { %4235 = vpow2.f32 %v3946_v14 }
 0xe14   :  { %4237 = vpow2.f32 %v3947_v5 }
 0xe15   :  { %4239 = vtanh.f32 %v3366_v18 }
 0xe1e   :  { %v4234_v23 = vpop.eup %4233 }
 0xe1f   :  { %v3377_v34 = vadd.f32 1.0, %v4234_v23 }
 0xe20   :  { %v4236_v45 = vpop.eup %4235 }
 0xe21   :  { %4241 = vrcp.f32 %v3377_v34  ;;  %v3378_v11 = vadd.f32 1.0, %v4236_v45  ;;  %v4238_v14 = vpop.eup %4237 }
 0xe22   :  { %v4240_v36 = vpop.eup %4239  ;;  %v3379_v61 = vadd.f32 1.0, %v4238_v14 }
 0xe23   :  { %4243 = vrcp.f32 %v3378_v11 }
 0xe24   :  { %4245 = vrcp.f32 %v3379_v61 }
 0xe2e   :  { %v4242_v4 = vpop.eup %4241 }
 0xe2f   :  { %v3388_v9 = vmul.f32 %v4242_v4, %v4240_v36 }
 0xe30   :  { %v4244_v59 = vpop.eup %4243 }
 0xe31   :  { %v3387_v27 = vmul.f32 %v4244_v59, %v6630_v48  ;;  %v4246_v23 = vpop.eup %4245 }
 0xe33   :  { %v6708_v32 = vadd.f32 %v3388_v9, %v3387_v27 }
 0xe35   :  { %4247 = vtanh.f32 %v6708_v32 }
 0xe42   :  { %v4248_v6 = vpop.eup %4247 }
 0xe43   :  { %v3391_v57 = vmul.f32 %v4248_v6, %v4246_v23  ;;  %v3754_v23 = vld [vmem:[%s6885_s9 + $0x78] sm:$0xff]  ;;  %v3752_v6 = vld [vmem:[%s6885_s9 + $0x68] sm:$0xff] }
 0xe45   :  { %3462 = vmatmul.mubr.f32.vlgmr.msra.gmra.mxu0 %v3391_v57  ;;  %3533 = vmatmul.mubr.f32.vlgmr.msra.gmra.mxu1 %v3391_v57  ;;  %v3751_v57 = vld [vmem:[%s6885_s9 + $0x60] sm:$0xff] }
 0xe46   :  { %3569 = vmatpush1.msra.mxu0 %v6349_v16  ;;  %3640 = vmatpush1.msra.mxu1 %v6352_v19  ;;  %v7497_v16 = vld [vmem:[#allocation37_spill] sm:$0xff]  ;;  %v7498_v19 = vld [vmem:[#allocation83_spill] sm:$0xff] }
 0xe47   :  { %3570 = vmatprep.subr.mxu0 %v6355_v15  ;;  %3641 = vmatprep.subr.mxu1 %v6358_v30  ;;  %v7499_v15 = vld [vmem:[#allocation38_spill] sm:$0xff]  ;;  %v7500_v30 = vld [vmem:[#allocation40_spill] sm:$0xff] }
 0xe48   :  { %3571 = vmatpush1.msra.mxu0 %v6361_v17  ;;  %3642 = vmatpush1.msra.mxu1 %v6364_v33  ;;  %v7501_v17 = vld [vmem:[#allocation59_spill] sm:$0xff]  ;;  %v7502_v33 = vld [vmem:[#allocation58_spill] sm:$0xff] }
 0xe49   :  { %3572 = vmatprep.subr.mxu0 %v6367_v52  ;;  %3643 = vmatprep.subr.mxu1 %v6370_v55  ;;  %v7503_v52 = vld [vmem:[#allocation60_spill] sm:$0xff]  ;;  %v7504_v55 = vld [vmem:[#allocation61_spill] sm:$0xff] }
 0xe4a   :  { %3573 = vmatpush1.msra.mxu0 %v6373_v50  ;;  %3644 = vmatpush1.msra.mxu1 %v6376_v56  ;;  %v7505_v50 = vld [vmem:[#allocation63_spill] sm:$0xff]  ;;  %v7506_v56 = vld [vmem:[#allocation62_spill] sm:$0xff] }
 0xe4b   :  { %3574 = vmatprep.subr.mxu0 %v6379_v21  ;;  %3645 = vmatprep.subr.mxu1 %v6382_v12  ;;  %v7507_v21 = vld [vmem:[#allocation64_spill] sm:$0xff]  ;;  %v7508_v12 = vld [vmem:[#allocation30_spill] sm:$0xff] }
 0xe4c   :  { %3575 = vmatpush1.msra.mxu0 %v6385_v47  ;;  %3646 = vmatpush1.msra.mxu1 %v6388_v22  ;;  %v7509_v47 = vld [vmem:[#allocation31_spill] sm:$0xff]  ;;  %v7510_v22 = vld [vmem:[#allocation65_spill] sm:$0xff] }
 0xe4d   :  { %3576 = vmatprep.subr.mxu0 %v6473_v51  ;;  %3647 = vmatprep.subr.mxu1 %v6476_v13  ;;  %v7511_v51 = vld [vmem:[#allocation67_spill] sm:$0xff]  ;;  %v7512_v13 = vld [vmem:[#allocation66_spill] sm:$0xff] }
 0xe4e   :  { %3577 = vmatpush1.msra.mxu0 %v6479_v0  ;;  %3648 = vmatpush1.msra.mxu1 %v6482_v3  ;;  %v7513_v0 = vld [vmem:[#allocation68_spill] sm:$0xff]  ;;  %v7514_v3 = vld [vmem:[#allocation33_spill] sm:$0xff] }
 0xe4f   :  { %3578 = vmatprep.subr.mxu0 %v6485_v7  ;;  %3649 = vmatprep.subr.mxu1 %v6488_v54  ;;  %v7515_v7 = vld [vmem:[#allocation52_spill] sm:$0xff]  ;;  %v7516_v54 = vld [vmem:[#allocation57_spill] sm:$0xff] }
 0xe50   :  { %3579 = vmatpush1.msra.mxu0 %v6491_v62  ;;  %3650 = vmatpush1.msra.mxu1 %v6494_v58  ;;  %v7517_v62 = vmov 0.0   ;;  %v7518_v58 = vld [vmem:[#allocation39_spill] sm:$0xff] }
 0xe51   :  { %3580 = vmatprep.subr.mxu0 %v6497_v63  ;;  %3651 = vmatprep.subr.mxu1 %v6500_v35  ;;  %v7519_v63 = vld [vmem:[#allocation55_spill] sm:$0xff]  ;;  %v7520_v35 = vld [vmem:[#allocation81_spill] sm:$0xff] }
 0xe52   :  { %3581 = vmatpush1.msra.mxu0 %v6503_v37  ;;  %3652 = vmatpush1.msra.mxu1 %v6506_v39  ;;  %v2144_v37 = vadd.f32 %v7520_v35, %v7519_v63 }
 0xe53   :  { %3582 = vmatprep.subr.mxu0 %v6509_v40  ;;  %3653 = vmatprep.subr.mxu1 %v6512_v24  ;;  %v7521_v40 = vld [vmem:[#allocation35_spill] sm:$0xff] }
 0xe54   :  { %3583 = vmatpush1.msra.mxu0 %v6515_v25  ;;  %3654 = vmatpush1.msra.mxu1 %v6518_v26  ;;  %v2146_v24 = vadd.f32 %v7521_v40, %v7394_v20 }
 0xe55   :  { %3584 = vmatprep.subr.mxu0 %v6521_v28  ;;  %3655 = vmatprep.subr.mxu1 %v6524_v29 }
 0xe56   :  { %3585 = vmatpush1.msra.mxu0 %v6527_v31  ;;  %3656 = vmatpush1.msra.mxu1 %v6530_v38 }
 0xe57   :  { %3586 = vmatprep.subr.mxu0 %v6533_v41  ;;  %3657 = vmatprep.subr.mxu1 %v6536_v42  ;;  %v7522_v41 = vld [vmem:[#allocation51_spill] sm:$0xff] }
 0xe58   :  { %3587 = vmatpush1.msra.mxu0 %v6539_v43  ;;  %3658 = vmatpush1.msra.mxu1 %v6542_v44  ;;  %v2257_v42 = vadd.f32 %v7522_v41, %v7396_v49 }
 0xe59   :  { %3588 = vmatprep.subr.mxu0 %v6545_v46  ;;  %3659 = vmatprep.subr.mxu1 %v6548_v10  ;;  %v7523_v46 = vld [vmem:[#allocation80_spill] sm:$0xff] }
 0xe5a   :  { %3589 = vmatpush1.msra.mxu0 %v6551_v60  ;;  %3660 = vmatpush1.msra.mxu1 %v7497_v16  ;;  %v2259_v10 = vadd.f32 %v7523_v46, %v6187_v8  ;;  %v3750_v16 = vld [vmem:[%s6885_s9 + $0x58] sm:$0xff] }
 0xe5b   :  { %3590 = vmatprep.subr.mxu0 %v7498_v19  ;;  %3661 = vmatprep.subr.mxu1 %v7499_v15  ;;  %v3749_v19 = vld [vmem:[%s6885_s9 + $0x50] sm:$0xff]  ;;  %v3748_v15 = vld [vmem:[%s6885_s9 + $0x48] sm:$0xff] }
 0xe5c   :  { %3591 = vmatpush1.msra.mxu0 %v7500_v30  ;;  %3662 = vmatpush1.msra.mxu1 %v7501_v17  ;;  %v3747_v30 = vld [vmem:[%s6885_s9 + $0x40] sm:$0xff]  ;;  %v3746_v17 = vld [vmem:[%s6885_s9 + $0x38] sm:$0xff] }
 0xe5d   :  { %3592 = vmatprep.subr.mxu0 %v7502_v33  ;;  %3663 = vmatprep.subr.mxu1 %v7503_v52  ;;  %v3745_v33 = vld [vmem:[%s6885_s9 + $0x30] sm:$0xff]  ;;  %v3744_v52 = vld [vmem:[%s6885_s9 + $0x28] sm:$0xff] }
 0xe5e   :  { %3593 = vmatpush1.msra.mxu0 %v7504_v55  ;;  %3664 = vmatpush1.msra.mxu1 %v7505_v50  ;;  %v3743_v55 = vld [vmem:[%s6885_s9 + $0x20] sm:$0xff]  ;;  %v3742_v50 = vld [vmem:[%s6885_s9 + $0x18] sm:$0xff] }
 0xe5f   :  { %3594 = vmatprep.subr.mxu0 %v7506_v56  ;;  %3665 = vmatprep.subr.mxu1 %v7507_v21  ;;  %v3741_v56 = vld [vmem:[%s6885_s9 + $0x10] sm:$0xff]  ;;  %v3740_v21 = vld [vmem:[%s6885_s9 + $0x8] sm:$0xff] }
 0xe60   :  { %3595 = vmatpush1.msra.mxu0 %v7508_v12  ;;  %3666 = vmatpush1.msra.mxu1 %v7509_v47  ;;  %v3739_v12 = vld [vmem:[%s6885_s9] sm:$0xff]  ;;  %v7524_v47 = vld [vmem:[#allocation77_spill] sm:$0xff] }
 0xe61   :  { %3596 = vmatprep.subr.mxu0 %v7510_v22  ;;  %3667 = vmatprep.subr.mxu1 %v7511_v51  ;;  %v2150_v22 = vadd.f32 %v7524_v47, %v7519_v63 }
 0xe62   :  { %3597 = vmatpush1.msra.mxu0 %v7512_v13  ;;  %3668 = vmatpush1.msra.mxu1 %v7513_v0  ;;  %v7525_v13 = vld [vmem:[#allocation78_spill] sm:$0xff] }
 0xe63   :  { %3598 = vmatprep.subr.mxu0 %v7514_v3  ;;  %3669 = vmatprep.subr.mxu1 %v7515_v7  ;;  %v2152_v0 = vadd.f32 %v7525_v13, %v7394_v20 }
 0xe64   :  { %3599 = vmatpush1.msra.mxu0 %v7516_v54  ;;  %3632 = vmatprep.mubr.f32.mxu0 %v7517_v62 }
 0xe65   :  { %3670 = vmatpush1.msra.mxu1 %v7518_v58  ;;  %3703 = vmatprep.mubr.f32.mxu1 %v7517_v62 }
 0xe66   :  { %3972 = vmatprep.subr.mxu0 %v7517_v62 }
 0xf05   :  { %v3463_v39 = vpop.f32.mrf.mxu0  ;;  %v3534_v38 = vpop.f32.mrf.mxu1 }
 0xf06   :  { %v3464_v25 = vadd.f32 %v3463_v39, %v2144_v37  ;;  %v3535_v43 = vadd.f32 %v3534_v38, %v2257_v42  ;;  %v7526_v39 = vld [vmem:[#allocation53_spill] sm:$0xff] }
 0xf07   :  { %v3465_v26 = vpop.f32.mrf.mxu0  ;;  %v3536_v44 = vpop.f32.mrf.mxu1  ;;  %v2263_v40 = vadd.f32 %v7526_v39, %v7396_v49 }
 0xf08   :  { %v3948_v28 = vmul.f32 -1.442695, %v3464_v25  ;;  %v3466_v29 = vadd.f32 %v3465_v26, %v2146_v24  ;;  %v3950_v60 = vmul.f32 -1.442695, %v3535_v43  ;;  %v3537_v18 = vadd.f32 %v3536_v44, %v2259_v10  ;;  %v7527_v25 = vld [vmem:[#allocation82_spill] sm:$0xff] }
 0xf09   :  { %v2265_v63 = vadd.f32 %v7527_v25, %v6187_v8 }
 0xf0a   :  { %4249 = vpow2.f32 %v3948_v28  ;;  %v3949_v31 = vmul.f32 -1.442695, %v3466_v29 }
 0xf0c   :  { %4251 = vpow2.f32 %v3949_v31 }
 0xf0d   :  { %4253 = vpow2.f32 %v3950_v60 }
 0xf17   :  { %v4250_v48 = vpop.eup %4249 }
 0xf18   :  { %v3548_v5 = vadd.f32 1.0, %v4250_v48 }
 0xf19   :  { %v4252_v2 = vpop.eup %4251 }
 0xf1a   :  { %4255 = vrcp.f32 %v3548_v5  ;;  %v3549_v1 = vadd.f32 1.0, %v4252_v2  ;;  %v4254_v53 = vpop.eup %4253 }
 0xf1b   :  { %4257 = vtanh.f32 %v3537_v18  ;;  %v3550_v14 = vadd.f32 1.0, %v4254_v53 }
 0xf1c   :  { %4259 = vrcp.f32 %v3549_v1 }
 0xf1d   :  { %4261 = vrcp.f32 %v3550_v14 }
 0xf27   :  { %v4256_v34 = vpop.eup %4255 }
 0xf28   :  { %v4258_v45 = vpop.eup %4257 }
 0xf29   :  { %v4260_v11 = vpop.eup %4259  ;;  %v3559_v4 = vmul.f32 %v4258_v45, %v4256_v34 }
 0xf2a   :  { %v3558_v36 = vmul.f32 %v4260_v11, %v6708_v32  ;;  %v4262_v59 = vpop.eup %4261  ;;  %v3753_v32 = vld [vmem:[%s6885_s9 + $0x70] sm:$0xff]  ;;  %s4678_s9 = smov [#allocation20]  }
 0xf2b   :  { %s3848_s14 = sshll.u32 %s4678_s9, 4  ;;  %s3849_s14 = int_to_ptr.vmem [resolvable:$true] %s3848_s14 }
 0xf2c   :  { %v6785_v9 = vadd.f32 %v3559_v4, %v3558_v36  ;;  %s4589_s17 = scalar_lea.vmem %s3849_s14, 256  ;;  %p4594_p4 = scmp.lt.s32.totalorder %s3849_s14, %s3849_s14 }
 0xf2d   :  { %p4590_p3 = scmp.ne.s32.totalorder %s3849_s14, %s4589_s17  ;;  %p4595_p5 = scmp.lt.s32.totalorder %s4589_s17, %s4589_s17 }
 0xf2e   :  { %4263 = vtanh.f32 %v6785_v9 }
 0xf2f   :  { %p4596_p6 = por %p4595_p5, %p4594_p4 }
 0xf31   :  { %p4597_p7 = pnand %p4596_p6, %p4590_p3 }
 0xf3b   :  { %v4264_v61 = vpop.eup %4263 }
 0xf3c   :  { %v3562_v27 = vmul.f32 %v4264_v61, %v4262_v59 }
 0xf3e   :  { %3633 = vmatmul.mubr.f32.vlgmr.msra.gmra.mxu0 %v3562_v27  ;;  %3704 = vmatmul.mubr.f32.vlgmr.msra.gmra.mxu1 %v3562_v27 }
 0xf3f   :  { %3973 = vmatpush3.msra.mxu0 %v3754_v23  ;;  %4004 = vmatprep.mubr.msk.f32.mxu0 %vm4677_vm1, %v7517_v62 }
 0xf40   :  { %3974 = vmatprep.subr.mxu0 %v7517_v62 }
 0xf41   :  { %3975 = vmatpush3.msra.mxu0 %v3753_v32 }
 0xf42   :  { %3976 = vmatprep.subr.mxu0 %v7517_v62 }
 0xf43   :  { %3977 = vmatpush3.msra.mxu0 %v3752_v6 }
 0xf44   :  { %3978 = vmatprep.subr.mxu0 %v7517_v62 }
 0xf45   :  { %3979 = vmatpush3.msra.mxu0 %v3751_v57 }
 0xf46   :  { %3980 = vmatprep.subr.mxu0 %v7517_v62 }
 0xf47   :  { %3981 = vmatpush3.msra.mxu0 %v3750_v16 }
 0xf48   :  { %3982 = vmatprep.subr.mxu0 %v7517_v62 }
 0xf49   :  { %3983 = vmatpush3.msra.mxu0 %v3749_v19 }
 0xf4a   :  { %3984 = vmatprep.subr.mxu0 %v7517_v62 }
 0xf4b   :  { %3985 = vmatpush3.msra.mxu0 %v3748_v15 }
 0xf4c   :  { %3986 = vmatprep.subr.mxu0 %v7517_v62 }
 0xf4d   :  { %3987 = vmatpush3.msra.mxu0 %v3747_v30 }
 0xf4e   :  { %3988 = vmatprep.subr.mxu0 %v7517_v62 }
 0xf4f   :  { %3989 = vmatpush3.msra.mxu0 %v3746_v17 }
 0xf50   :  { %3990 = vmatprep.subr.mxu0 %v7517_v62 }
 0xf51   :  { %3991 = vmatpush3.msra.mxu0 %v3745_v33 }
 0xf52   :  { %3992 = vmatprep.subr.mxu0 %v7517_v62 }
 0xf53   :  { %3993 = vmatpush3.msra.mxu0 %v3744_v52 }
 0xf54   :  { %3994 = vmatprep.subr.mxu0 %v7517_v62 }
 0xf55   :  { %3995 = vmatpush3.msra.mxu0 %v3743_v55 }
 0xf56   :  { %3996 = vmatprep.subr.mxu0 %v7517_v62 }
 0xf57   :  { %3997 = vmatpush3.msra.mxu0 %v3742_v50 }
 0xf58   :  { %3998 = vmatprep.subr.mxu0 %v7517_v62 }
 0xf59   :  { %3999 = vmatpush3.msra.mxu0 %v3741_v56 }
 0xf5a   :  { %4000 = vmatprep.subr.mxu0 %v7517_v62 }
 0xf5b   :  { %4001 = vmatpush3.msra.mxu0 %v3740_v21 }
 0xf5c   :  { %4002 = vmatprep.subr.mxu0 %v7517_v62 }
 0xf5d   :  { %4003 = vmatpush3.msra.mxu0 %v3739_v12 }
 0xffe   :  { %v3634_v51 = vpop.f32.mrf.mxu0  ;;  %v3705_v37 = vpop.f32.mrf.mxu1 }
 0xfff   :  { %v3635_v3 = vadd.f32 %v3634_v51, %v2150_v22  ;;  %v3706_v62 = vadd.f32 %v3705_v37, %v2263_v40 }
0x1000   :  { %v3636_v7 = vpop.f32.mrf.mxu0  ;;  %v3707_v24 = vpop.f32.mrf.mxu1 }
0x1001   :  { %v3951_v54 = vmul.f32 -1.442695, %v3635_v3  ;;  %v3637_v58 = vadd.f32 %v3636_v7, %v2152_v0  ;;  %v3953_v26 = vmul.f32 -1.442695, %v3706_v62  ;;  %v3708_v28 = vadd.f32 %v3707_v24, %v2265_v63 }
0x1003   :  { %4265 = vpow2.f32 %v3951_v54  ;;  %v3952_v35 = vmul.f32 -1.442695, %v3637_v58 }
0x1005   :  { %4267 = vpow2.f32 %v3952_v35 }
0x1006   :  { %4269 = vpow2.f32 %v3953_v26 }
0x1007   :  { %4271 = vtanh.f32 %v3708_v28 }
0x1010   :  { %v4266_v29 = vpop.eup %4265 }
0x1011   :  { %v3719_v20 = vadd.f32 1.0, %v4266_v29 }
0x1012   :  { %v4268_v31 = vpop.eup %4267 }
0x1013   :  { %4273 = vrcp.f32 %v3719_v20  ;;  %v3720_v38 = vadd.f32 1.0, %v4268_v31  ;;  %v4270_v41 = vpop.eup %4269 }
0x1014   :  { %v4272_v42 = vpop.eup %4271  ;;  %v3721_v46 = vadd.f32 1.0, %v4270_v41 }
0x1015   :  { %4275 = vrcp.f32 %v3720_v38 }
0x1016   :  { %4277 = vrcp.f32 %v3721_v46 }
0x1020   :  { %v4274_v43 = vpop.eup %4273 }
0x1021   :  { %v3730_v44 = vmul.f32 %v4274_v43, %v4272_v42 }
0x1022   :  { %v4276_v49 = vpop.eup %4275 }
0x1023   :  { %v3729_v10 = vmul.f32 %v4276_v49, %v6785_v9  ;;  %v4278_v8 = vpop.eup %4277 }
0x1025   :  { %v3731_v60 = vadd.f32 %v3730_v44, %v3729_v10 }
0x1027   :  { %4279 = vtanh.f32 %v3731_v60  ;;  %3738 = vst [vmem:[#allocation22 + $0x8] sm:$0xff] %v3731_v60 }
0x1034   :  { %v4280_v48 = vpop.eup %4279 }
0x1035   :  { %v3733_v18 = vmul.f32 %v4280_v48, %v4278_v8 }
0x1037   :  { %4005 = vmatmul.mubr.f32.vlgmr.msra.gmra.mxu0 %v3733_v18  ;;  %3736 = vst [vmem:[#allocation20 + $0x8] sm:$0xff] %v3733_v18 }
0x1038   :  { %4600 = shalt.err (!%p4597_p7)
}
0x1039   :  { %3854 = dma.vmem_to_hbm [thread:$0]  %s3849_s14, 256, %s6888_s12, [#allocation21], %s4670_s28, %s4670_s28, %s4671_s29  }
0x103a   :  { %s4679_s18 = smov [#allocation22]  }
0x103b   :  { %s3860_s19 = sshll.u32 %s4679_s18, 4  ;;  %s3861_s19 = int_to_ptr.vmem [resolvable:$true] %s3860_s19 }
0x103c   :  { %s4609_s20 = scalar_lea.vmem %s3861_s19, 256  ;;  %p4614_p9 = scmp.lt.s32.totalorder %s3861_s19, %s3861_s19 }
0x103d   :  { %p4610_p8 = scmp.ne.s32.totalorder %s3861_s19, %s4609_s20  ;;  %p4615_p10 = scmp.lt.s32.totalorder %s4609_s20, %s4609_s20 }
0x103f   :  { %p4616_p11 = por %p4615_p10, %p4614_p9 }
0x1041   :  { %p4617_p12 = pnand %p4616_p11, %p4610_p8 }
0x1043   :  { %4620 = shalt.err (!%p4617_p12)
}
0x1044   :  { %3866 = dma.vmem_to_hbm [thread:$0]  %s3861_s19, 256, %s6889_s13, [#allocation21], %s4670_s28, %s4670_s28, %s4671_s29   ;;  %v3954_v5 = vld [vmem:[#allocation18] ss:$0 sm:$0xff] }
0x1045   :  { %s4680_s22 = smov [#allocation19]  }
0x1046   :  { %s3839_s12 = sshll.u32 %s4680_s22, 4  ;;  %s3840_s12 = int_to_ptr.vmem [resolvable:$true] %s3839_s12 }
0x1047   :  { %s4629_s2 = scalar_lea.vmem %s3840_s12, 128  ;;  %p4634_p0 = scmp.lt.s32.totalorder %s3840_s12, %s3840_s12 }
0x1048   :  { %p4630_p13 = scmp.ne.s32.totalorder %s3840_s12, %s4629_s2  ;;  %p4635_p1 = scmp.lt.s32.totalorder %s4629_s2, %s4629_s2 }
0x104a   :  { %p4636_p2 = por %p4635_p1, %p4634_p0 }
0x104c   :  { %p4637_p3 = pnand %p4636_p2, %p4630_p13 }
0x10f7   :  { %v3828_v2 = vpop.f32.mrf.mxu0 }
0x10f8   :  { %v3829_v1 = vadd.f32 %v3954_v5, %v3828_v2 }
0x10f9   :  { %v4006_v53 = vpop.f32.mrf.mxu0 }
0x10fa   :  { %3832 = vst [vmem:[#allocation19] sm:$0xff] %v3829_v1 }
0x10fb   :  { %4640 = shalt.err (!%p4637_p3)
}
0x10fc   :  { %3842 = dma.vmem_to_hbm [thread:$0]  %s3840_s12, 128, %s6887_s11, [#allocation6]  }
0x10fd   :  { %4659 = dma.done.wait [#allocation6], 128  }
0x10fe   :  { %4660 = vsyncadd [#allocation6], 4294967168 }
0x10ff   :  { %4661 = dma.done.wait [#allocation21], 512  }
0x1100   :  { %4662 = vsyncadd [#allocation21], 4294966784 }
0x1101   :  { %3876 = vsyncpa [#allocation5], 1 }
0x1102   :  { %3877 = vsyncpa [#allocation8], 1 }
0x1103   :  { %3878 = vsyncpa [#allocation11], 1 }
0x1104   :  { %3879 = vsyncpa [#allocation14], 1 }
0x1105   :  { %3880 = vsyncpa [#allocation17], 1 }
0x1106   :  { %3881 = vsyncpa [#allocation6], 1 }
0x1107   :  { %3882 = vsyncpa [#allocation21], 1 }

</bundles_post_ra>
